<compile_context>
chip_gen: v7x
topology: tpu7x:2x2x1
jax: 0.10.0
libtpu: 0.0.40
codegen_flags: <defaults>
</compile_context>

<pallas_src>
import math
import numpy as np
import jax
import jax.numpy as jnp
from jax.experimental import pallas as pl
from jax.experimental.pallas import tpu as pltpu


# ----------------------------------------------------------------------------
# Pallas kernel: full transformer + head for one batch tile.
# ----------------------------------------------------------------------------
def build_kernel(*, depth, heads, dim_head, dim, n_pad, n_real, bt, dim_out,
                 mm_dtype=jnp.float32, ln_eps=1e-5):
    inner = heads * dim_head
    sqrt2 = math.sqrt(2.0)
    rows = bt * n_pad
    mask_needed = (n_pad != n_real)

    def layernorm(h, g, b):
        mu = jnp.mean(h, axis=-1, keepdims=True)
        var = jnp.mean((h - mu) ** 2, axis=-1, keepdims=True)
        return (h - mu) * jax.lax.rsqrt(var + ln_eps) * g + b

    def mm(a, w):
        # weights arrive already in mm_dtype; cast only the activation operand.
        return jnp.dot(a.astype(mm_dtype), w, preferred_element_type=jnp.float32)

    def kernel(x_ref,
               ln1g_ref, ln1b_ref, wqkv_ref, wout_ref,
               ln2g_ref, ln2b_ref, wff1_ref, bff1_ref, wff2_ref, bff2_ref,
               lnfg_ref, lnfb_ref, wlog_ref, blog_ref,
               out_ref):
        # (bt, n_pad, dim) -> (bt*n_pad, dim): all row-wise ops run on one big tile
        xf = x_ref[...].reshape(rows, dim)

        # key-padding bias, hoisted out of the depth/head loops (loop-invariant)
        if mask_needed:
            kidx = jax.lax.broadcasted_iota(jnp.int32, (1, 1, n_pad), 2)
            key_bias = jnp.where(kidx < n_real, 0.0, -1e30).astype(jnp.float32)

        for l in range(depth):
            # ---------------- attention block ----------------
            # (RoPE rotation + 1/sqrt(dim_head) scale are pre-folded into wqkv)
            xn = layernorm(xf, ln1g_ref[l], ln1b_ref[l])
            qkv = mm(xn, wqkv_ref[l])                       # (rows, 3*inner), f32
            q3 = qkv[:, :inner].reshape(bt, n_pad, inner)
            k3 = qkv[:, inner:2 * inner].reshape(bt, n_pad, inner)
            v3 = qkv[:, 2 * inner:].reshape(bt, n_pad, inner)

            head_outs = []
            for h in range(heads):
                sl = slice(h * dim_head, (h + 1) * dim_head)
                qh = q3[:, :, sl].astype(mm_dtype)
                kh = k3[:, :, sl].astype(mm_dtype)
                vh = v3[:, :, sl].astype(mm_dtype)
                sim = jnp.einsum('bqd,bkd->bqk', qh, kh,
                                 preferred_element_type=jnp.float32)
                if mask_needed:
                    sim = sim + key_bias
                sim = sim - jnp.max(sim, axis=-1, keepdims=True)
                p = jnp.exp(sim)
                denom = jnp.sum(p, axis=-1, keepdims=True)
                attn = p * pl.reciprocal(denom, approx=True)
                head_outs.append(
                    jnp.einsum('bqk,bkd->bqd', attn.astype(mm_dtype), vh,
                               preferred_element_type=jnp.float32))
            o = jnp.concatenate(head_outs, axis=-1).reshape(rows, inner)
            xf = xf + mm(o, wout_ref[l])

            # ---------------- GEGLU feed-forward block ----------------
            xn = layernorm(xf, ln2g_ref[l], ln2b_ref[l])
            hp = mm(xn, wff1_ref[l]) + bff1_ref[l]
            half = hp.shape[-1] // 2
            a = hp[:, :half]
            g = hp[:, half:]
            gelu_g = 0.5 * g * (1.0 + jax.lax.erf(g / sqrt2))   # exact GELU
            xf = xf + mm(a * gelu_g, wff2_ref[l]) + bff2_ref[l]

        # ---------------- final head on CLS tokens, whole tile at once ----------
        cls = xf.reshape(bt, n_pad, dim)[:, 0, :]               # (bt, dim)
        cls = layernorm(cls, lnfg_ref[...], lnfb_ref[...])
        cls = jnp.maximum(cls, 0.0)
        out_ref[...] = mm(cls, wlog_ref[...]) + blog_ref[...]   # (bt, dim_out)

    return kernel


def run_transformer_pallas(x_emb, W, *, depth, heads, dim_head, dim_out,
                           matmul_dtype=jnp.float32):
    B, N, D = x_emb.shape
    n_pad = ((N + 7) // 8) * 8            # pad sequence to a sublane multiple
    bt = B if B <= 16 else 16             # batch tile: bt*n_pad rows >= 128 for big B
    b_pad = ((B + bt - 1) // bt) * bt
    x = jnp.pad(x_emb.astype(jnp.float32),
                ((0, b_pad - B), (0, n_pad - N), (0, 0)))

    def mm_w(w):                          # matmul weights optionally stored in bf16
        return w.astype(matmul_dtype)

    wlist = [W["ln1g"], W["ln1b"], mm_w(W["wqkv_rope"]), mm_w(W["wout"]),
             W["ln2g"], W["ln2b"], mm_w(W["wff1"]), W["bff1"],
             mm_w(W["wff2"]), W["bff2"],
             W["lnfg"], W["lnfb"], mm_w(W["wlog"]), W["blog"]]

    kernel = build_kernel(depth=depth, heads=heads, dim_head=dim_head, dim=D,
                          n_pad=n_pad, n_real=N, bt=bt, dim_out=dim_out,
                          mm_dtype=matmul_dtype)

    in_specs = [pl.BlockSpec((bt, n_pad, D), lambda t: (t, 0, 0))]
    for w in wlist:
        in_specs.append(pl.BlockSpec(w.shape, (lambda t, _nd=w.ndim: (0,) * _nd)))
    out_spec = pl.BlockSpec((bt, dim_out), lambda t: (t, 0))

    out = pl.pallas_call(
        kernel,
        out_shape=jax.ShapeDtypeStruct((b_pad, dim_out), jnp.float32),
        grid=(b_pad // bt,),
        in_specs=in_specs,
        out_specs=out_spec,
        compiler_params=pltpu.CompilerParams(
            dimension_semantics=("parallel",),        # batch tiles are independent
            vmem_limit_bytes=64 * 1024 * 1024),
    )(x, *wlist)
    return out[:B]


# ----------------------------------------------------------------------------
# Pure-JAX reference (original math: explicit RoPE, unfused scale, division).
# ----------------------------------------------------------------------------
def reference_logits(x, W, *, depth, heads, dim_head, ln_eps=1e-5):
    inner = heads * dim_head
    cos, sin, pswap = W["cos"], W["sin"], W["pswap"]

    def ln(h, g, b):
        mu = h.mean(-1, keepdims=True)
        var = ((h - mu) ** 2).mean(-1, keepdims=True)
        return (h - mu) * jax.lax.rsqrt(var + ln_eps) * g + b

    hi = jax.lax.Precision.HIGHEST
    for l in range(depth):
        xn = ln(x, W["ln1g"][l], W["ln1b"][l])
        qkv = jnp.einsum("bnd,de->bne", xn, W["wqkv"][l], precision=hi)
        q = qkv[..., :inner] * (dim_head ** -0.5)
        k = qkv[..., inner:2 * inner]
        v = qkv[..., 2 * inner:]
        q = q * cos + jnp.einsum("bne,ef->bnf", q, pswap, precision=hi) * sin
        k = k * cos + jnp.einsum("bne,ef->bnf", k, pswap, precision=hi) * sin

        def sh(t):
            return t.reshape(t.shape[0], t.shape[1], heads, dim_head).transpose(0, 2, 1, 3)

        qh, kh, vh = sh(q), sh(k), sh(v)
        sim = jnp.einsum("bhid,bhjd->bhij", qh, kh, precision=hi)
        attn = jax.nn.softmax(sim, axis=-1)
        o = jnp.einsum("bhij,bhjd->bhid", attn, vh, precision=hi)
        o = o.transpose(0, 2, 1, 3).reshape(x.shape[0], x.shape[1], inner)
        x = x + jnp.einsum("bne,ed->bnd", o, W["wout"][l], precision=hi)

        xn = ln(x, W["ln2g"][l], W["ln2b"][l])
        hp = jnp.einsum("bnd,de->bne", xn, W["wff1"][l], precision=hi) + W["bff1"][l]
        half = hp.shape[-1] // 2
        a, g = hp[..., :half], hp[..., half:]
        gg = 0.5 * g * (1.0 + jax.lax.erf(g / math.sqrt(2.0)))
        x = x + jnp.einsum("bne,ed->bnd", a * gg, W["wff2"][l], precision=hi) + W["bff2"][l]

    cls = x[:, 0, :]
    cls = ln(cls, W["lnfg"][0], W["lnfb"][0])
    cls = jnp.maximum(cls, 0.0)
    return cls @ W["wlog"] + W["blog"]


# ----------------------------------------------------------------------------
# Parameter construction (deterministic, synthetic) + host-side RoPE fold.
# ----------------------------------------------------------------------------
def make_params(key, *, categories, num_continuous, dim, depth, heads, dim_head,
                dim_out, num_special_tokens, dim_rope_seq):
    inner = heads * dim_head
    total_tokens = sum(categories) + num_special_tokens
    ks = list(jax.random.split(key, 16))

    def rnd(k, shape, s=0.05):
        return (s * jax.random.normal(k, shape)).astype(jnp.float32)

    P = {
        "embed_table": rnd(ks[0], (total_tokens, dim), 0.5),
        "num_w": rnd(ks[1], (num_continuous, dim), 0.5),
        "num_b": rnd(ks[2], (num_continuous, dim), 0.5),
        "cls": rnd(ks[3], (1, 1, dim), 0.5),
        # transformer (stacked over depth)
        "ln1g": jnp.ones((depth, 1, dim), jnp.float32),
        "ln1b": jnp.zeros((depth, 1, dim), jnp.float32),
        "wqkv": rnd(ks[4], (depth, dim, 3 * inner)),
        "wout": rnd(ks[5], (depth, inner, dim)),
        "ln2g": jnp.ones((depth, 1, dim), jnp.float32),
        "ln2b": jnp.zeros((depth, 1, dim), jnp.float32),
        "wff1": rnd(ks[6], (depth, dim, 8 * dim)),
        "bff1": rnd(ks[7], (depth, 1, 8 * dim)),
        "wff2": rnd(ks[8], (depth, 4 * dim, dim)),
        "bff2": rnd(ks[9], (depth, 1, dim)),
        # head
        "lnfg": jnp.ones((1, dim), jnp.float32),
        "lnfb": jnp.zeros((1, dim), jnp.float32),
        "wlog": rnd(ks[10], (dim, dim_out)),
        "blog": rnd(ks[11], (1, dim_out)),
    }

    # RoPE constants (torchtune cache; positions indexed by HEAD because the
    # reference module feeds (b, h, n, d) into RotaryPositionalEmbeddings).
    assert dim_rope_seq >= heads
    theta = 1.0 / (10000.0 ** (np.arange(0, dim_head, 2, dtype=np.float64) / dim_head))
    pos = np.arange(heads, dtype=np.float64)
    ang = pos[:, None] * theta[None, :]                      # (heads, dim_head//2)
    cos = np.repeat(np.cos(ang), 2, axis=1).reshape(1, inner)
    sin = np.repeat(np.sin(ang), 2, axis=1).reshape(1, inner)
    pswap = np.zeros((inner, inner), np.float64)
    for j in range(0, inner, 2):
        pswap[j + 1, j] = -1.0     # out_even = x_even*cos - x_odd*sin
        pswap[j, j + 1] = 1.0      # out_odd  = x_odd*cos + x_even*sin
    P["cos"] = jnp.asarray(cos, jnp.float32)
    P["sin"] = jnp.asarray(sin, jnp.float32)
    P["pswap"] = jnp.asarray(pswap, jnp.float32)

    # Host-side fold: rope(q*scale) == x @ (scale * Wq @ R), rope(k) == x @ (Wk @ R),
    # with R = diag(cos) + pswap @ diag(sin).  Done in float64 -> exact to f32.
    scale = dim_head ** -0.5
    R = np.diag(cos.reshape(-1)) + pswap * sin.reshape(-1)[None, :]
    wqkv_np = np.asarray(P["wqkv"], np.float64)              # (depth, dim, 3*inner)
    Wq, Wk, Wv = (wqkv_np[..., :inner], wqkv_np[..., inner:2 * inner],
                  wqkv_np[..., 2 * inner:])
    P["wqkv_rope"] = jnp.asarray(
        np.concatenate([scale * (Wq @ R), Wk @ R, Wv], axis=-1), jnp.float32)

    # categories_offset buffer
    off = np.concatenate([[num_special_tokens], np.asarray(categories)]).cumsum()[:-1]
    P["categories_offset"] = jnp.asarray(off, jnp.int32)
    return P


def ft_transformer_de_forward(P, x_categ, x_numer, *, depth, heads, dim_head,
                              dim_out, variance_constant,
                              matmul_dtype=jnp.float32):
    # glue: embeddings + cls concat (cheap gathers / broadcasts, kept in plain JAX)
    x_categ = x_categ + P["categories_offset"]
    cat_emb = jnp.take(P["embed_table"], x_categ, axis=0)                # (B, n_cat, D)
    num_emb = x_numer[:, :, None] * P["num_w"][None] + P["num_b"][None]  # (B, n_cont, D)
    x = jnp.concatenate([cat_emb, num_emb], axis=1)
    B = x.shape[0]
    cls = jnp.broadcast_to(P["cls"], (B, 1, P["cls"].shape[-1]))
    x = jnp.concatenate([cls, x], axis=1).astype(jnp.float32)            # (B, N, D)

    logits = run_transformer_pallas(x, P, depth=depth, heads=heads,
                                    dim_head=dim_head, dim_out=dim_out,
                                    matmul_dtype=matmul_dtype)
    half = dim_out // 2
    mean = logits[:, :half]
    variance = jax.nn.softplus(logits[:, half:2 * half]) + variance_constant
    return mean, variance, x, logits


if __name__ == "__main__":
    # small configuration consistent with the module
    categories = (5, 6)
    num_continuous = 4
    dim = 32
    depth = 2
    heads = 4
    dim_head = 16
    dim_out = 2
    num_special_tokens = 2
    dim_rope_seq = 8
    variance_constant = 5e-9
    B = 2

    key = jax.random.PRNGKey(0)
    kp, kc, kn = jax.random.split(key, 3)
    P = make_params(kp, categories=categories, num_continuous=num_continuous,
                    dim=dim, depth=depth, heads=heads, dim_head=dim_head,
                    dim_out=dim_out, num_special_tokens=num_special_tokens,
                    dim_rope_seq=dim_rope_seq)

    kcs = jax.random.split(kc, len(categories))
    x_categ = jnp.concatenate(
        [jax.random.randint(kcs[j], (B, 1), 0, categories[j]) for j in range(len(categories))],
        axis=1)
    x_numer = jax.random.normal(kn, (B, num_continuous), dtype=jnp.float32)

    # f32 matmul-operand run (tight correctness check)
    mean, variance, x_emb, logits = ft_transformer_de_forward(
        P, x_categ, x_numer, depth=depth, heads=heads, dim_head=dim_head,
        dim_out=dim_out, variance_constant=variance_constant)
    jax.block_until_ready((mean, variance))

    ref = reference_logits(x_emb, P, depth=depth, heads=heads, dim_head=dim_head)
    assert np.allclose(np.asarray(logits), np.asarray(ref), atol=5e-3, rtol=2e-2), (
        np.asarray(logits), np.asarray(ref))
    assert mean.shape == (B, dim_out // 2) and variance.shape == (B, dim_out // 2)
    assert bool(jnp.all(variance > 0.0))

    # bf16 matmul-operand run (v5e/v6e throughput lever); looser tolerance
    logits_bf16 = run_transformer_pallas(
        x_emb, P, depth=depth, heads=heads, dim_head=dim_head, dim_out=dim_out,
        matmul_dtype=jnp.bfloat16)
    jax.block_until_ready(logits_bf16)
    assert np.allclose(np.asarray(logits_bf16), np.asarray(ref), atol=5e-2, rtol=1e-1), (
        np.asarray(logits_bf16), np.asarray(ref))

    print("KERNEL_OK")
</pallas_src>

<mosaic_0001>
module attributes {stable_mosaic.version = 11 : i64} {
  func.func @kernel(%arg0: i32, %arg1: memref<2x8x32xf32, #tpu.memory_space<vmem>>, %arg2: memref<2x1x32xf32, #tpu.memory_space<vmem>>, %arg3: memref<2x1x32xf32, #tpu.memory_space<vmem>>, %arg4: memref<2x32x192xf32, #tpu.memory_space<vmem>>, %arg5: memref<2x64x32xf32, #tpu.memory_space<vmem>>, %arg6: memref<2x1x32xf32, #tpu.memory_space<vmem>>, %arg7: memref<2x1x32xf32, #tpu.memory_space<vmem>>, %arg8: memref<2x32x256xf32, #tpu.memory_space<vmem>>, %arg9: memref<2x1x256xf32, #tpu.memory_space<vmem>>, %arg10: memref<2x128x32xf32, #tpu.memory_space<vmem>>, %arg11: memref<2x1x32xf32, #tpu.memory_space<vmem>>, %arg12: memref<1x32xf32, #tpu.memory_space<vmem>>, %arg13: memref<1x32xf32, #tpu.memory_space<vmem>>, %arg14: memref<32x2xf32, #tpu.memory_space<vmem>>, %arg15: memref<1x2xf32, #tpu.memory_space<vmem>>, %arg16: memref<2x2xf32, #tpu.memory_space<vmem>>) attributes {dimension_semantics = [#tpu.dimension_semantics<parallel>], iteration_bounds = array<i64: 1>, scalar_prefetch = 0 : i64, scratch_operands = 0 : i64, tpu.core_type = #tpu.core_type<tc>, window_params = [{transform_indices = @transform_0, window_bounds = array<i64: 2, 8, 32>}, {pipeline_mode = #tpu.pipeline_mode<synchronous>, transform_indices = @transform_1, window_bounds = array<i64: 2, 1, 32>}, {pipeline_mode = #tpu.pipeline_mode<synchronous>, transform_indices = @transform_2, window_bounds = array<i64: 2, 1, 32>}, {pipeline_mode = #tpu.pipeline_mode<synchronous>, transform_indices = @transform_3, window_bounds = array<i64: 2, 32, 192>}, {pipeline_mode = #tpu.pipeline_mode<synchronous>, transform_indices = @transform_4, window_bounds = array<i64: 2, 64, 32>}, {pipeline_mode = #tpu.pipeline_mode<synchronous>, transform_indices = @transform_5, window_bounds = array<i64: 2, 1, 32>}, {pipeline_mode = #tpu.pipeline_mode<synchronous>, transform_indices = @transform_6, window_bounds = array<i64: 2, 1, 32>}, {pipeline_mode = #tpu.pipeline_mode<synchronous>, transform_indices = @transform_7, window_bounds = array<i64: 2, 32, 256>}, {pipeline_mode = #tpu.pipeline_mode<synchronous>, transform_indices = @transform_8, window_bounds = array<i64: 2, 1, 256>}, {pipeline_mode = #tpu.pipeline_mode<synchronous>, transform_indices = @transform_9, window_bounds = array<i64: 2, 128, 32>}, {pipeline_mode = #tpu.pipeline_mode<synchronous>, transform_indices = @transform_10, window_bounds = array<i64: 2, 1, 32>}, {pipeline_mode = #tpu.pipeline_mode<synchronous>, transform_indices = @transform_11, window_bounds = array<i64: 1, 32>}, {pipeline_mode = #tpu.pipeline_mode<synchronous>, transform_indices = @transform_12, window_bounds = array<i64: 1, 32>}, {pipeline_mode = #tpu.pipeline_mode<synchronous>, transform_indices = @transform_13, window_bounds = array<i64: 32, 2>}, {pipeline_mode = #tpu.pipeline_mode<synchronous>, transform_indices = @transform_14, window_bounds = array<i64: 1, 2>}, {transform_indices = @transform_15, window_bounds = array<i64: 2, 2>}]} {
    %c0 = arith.constant 0 : index
    %c0_0 = arith.constant 0 : index
    %c0_1 = arith.constant 0 : index
    %0 = vector.load %arg1[%c0, %c0_0, %c0_1] : memref<2x8x32xf32, #tpu.memory_space<vmem>>, vector<2x8x32xf32>
    %1 = vector.shape_cast %0 : vector<2x8x32xf32> to vector<16x32xf32>
    %2 = tpu.iota {dimensions = array<i32: 2>} : vector<1x1x8xi32>
    %c7_i32 = arith.constant 7 : i32
    %3 = vector.broadcast %c7_i32 : i32 to vector<1x1x8xi32>
    %4 = arith.cmpi slt, %2, %3 : vector<1x1x8xi32>
    %cst = arith.constant 0.000000e+00 : f32
    %cst_2 = arith.constant -1.000000e+30 : f32
    %5 = vector.broadcast %cst : f32 to vector<1x1x8xf32>
    %6 = vector.broadcast %cst_2 : f32 to vector<1x1x8xf32>
    %7 = arith.select %4, %5, %6 : vector<1x1x8xi1>, vector<1x1x8xf32>
    %c0_3 = arith.constant 0 : index
    %c0_4 = arith.constant 0 : index
    %c0_5 = arith.constant 0 : index
    %8 = vector.load %arg2[%c0_3, %c0_4, %c0_5] : memref<2x1x32xf32, #tpu.memory_space<vmem>>, vector<1x1x32xf32>
    %9 = vector.shape_cast %8 : vector<1x1x32xf32> to vector<1x32xf32>
    %c0_6 = arith.constant 0 : index
    %c0_7 = arith.constant 0 : index
    %c0_8 = arith.constant 0 : index
    %10 = vector.load %arg3[%c0_6, %c0_7, %c0_8] : memref<2x1x32xf32, #tpu.memory_space<vmem>>, vector<1x1x32xf32>
    %11 = vector.shape_cast %10 : vector<1x1x32xf32> to vector<1x32xf32>
    %cst_9 = arith.constant dense<0.000000e+00> : vector<16xf32>
    %12 = vector.multi_reduction <add>, %1, %cst_9 [1] : vector<16x32xf32> to vector<16xf32>
    %13 = vector.shape_cast %12 : vector<16xf32> to vector<16x1xf32>
    %cst_10 = arith.constant 3.200000e+01 : f32
    %14 = vector.broadcast %cst_10 : f32 to vector<16x1xf32>
    %15 = arith.divf %13, %14 : vector<16x1xf32>
    %16 = vector.broadcast %15 : vector<16x1xf32> to vector<16x32xf32>
    %17 = arith.subf %1, %16 : vector<16x32xf32>
    %18 = arith.mulf %17, %17 : vector<16x32xf32>
    %cst_11 = arith.constant dense<0.000000e+00> : vector<16xf32>
    %19 = vector.multi_reduction <add>, %18, %cst_11 [1] : vector<16x32xf32> to vector<16xf32>
    %20 = vector.shape_cast %19 : vector<16xf32> to vector<16x1xf32>
    %cst_12 = arith.constant 3.200000e+01 : f32
    %21 = vector.broadcast %cst_12 : f32 to vector<16x1xf32>
    %22 = arith.divf %20, %21 : vector<16x1xf32>
    %23 = vector.broadcast %15 : vector<16x1xf32> to vector<16x32xf32>
    %24 = arith.subf %1, %23 : vector<16x32xf32>
    %cst_13 = arith.constant 9.99999974E-6 : f32
    %25 = vector.broadcast %cst_13 : f32 to vector<16x1xf32>
    %26 = arith.addf %22, %25 : vector<16x1xf32>
    %27 = math.rsqrt %26 : vector<16x1xf32>
    %28 = vector.broadcast %27 : vector<16x1xf32> to vector<16x32xf32>
    %29 = arith.mulf %24, %28 : vector<16x32xf32>
    %30 = vector.broadcast %9 : vector<1x32xf32> to vector<16x32xf32>
    %31 = arith.mulf %29, %30 : vector<16x32xf32>
    %32 = vector.broadcast %11 : vector<1x32xf32> to vector<16x32xf32>
    %33 = arith.addf %31, %32 : vector<16x32xf32>
    %c0_14 = arith.constant 0 : index
    %c0_15 = arith.constant 0 : index
    %c0_16 = arith.constant 0 : index
    %34 = vector.load %arg4[%c0_14, %c0_15, %c0_16] : memref<2x32x192xf32, #tpu.memory_space<vmem>>, vector<1x32x192xf32>
    %35 = vector.shape_cast %34 : vector<1x32x192xf32> to vector<32x192xf32>
    %cst_17 = arith.constant dense<0.000000e+00> : vector<16x192xf32>
    %36 = tpu.matmul %33, %35, %cst_17 {dimension_numbers = #tpu.dot_dimension_numbers<[1], [0], [0], [1], [0, 0, 1, 1], [], []>} : vector<16x32xf32>, vector<32x192xf32>, vector<16x192xf32> -> vector<16x192xf32>
    %37 = vector.extract_strided_slice %36 {offsets = [0, 0], sizes = [16, 64], strides = [1, 1]} : vector<16x192xf32> to vector<16x64xf32>
    %38 = vector.shape_cast %37 : vector<16x64xf32> to vector<2x8x64xf32>
    %39 = vector.extract_strided_slice %36 {offsets = [0, 64], sizes = [16, 64], strides = [1, 1]} : vector<16x192xf32> to vector<16x64xf32>
    %40 = vector.shape_cast %39 : vector<16x64xf32> to vector<2x8x64xf32>
    %41 = vector.extract_strided_slice %36 {offsets = [0, 128], sizes = [16, 64], strides = [1, 1]} : vector<16x192xf32> to vector<16x64xf32>
    %42 = vector.shape_cast %41 : vector<16x64xf32> to vector<2x8x64xf32>
    %43 = vector.extract_strided_slice %38 {offsets = [0, 0, 0], sizes = [2, 8, 16], strides = [1, 1, 1]} : vector<2x8x64xf32> to vector<2x8x16xf32>
    %44 = vector.extract_strided_slice %40 {offsets = [0, 0, 0], sizes = [2, 8, 16], strides = [1, 1, 1]} : vector<2x8x64xf32> to vector<2x8x16xf32>
    %45 = vector.extract_strided_slice %42 {offsets = [0, 0, 0], sizes = [2, 8, 16], strides = [1, 1, 1]} : vector<2x8x64xf32> to vector<2x8x16xf32>
    "tpu.trace_start"() <{level = 10 : i32, message = "bqd,bkd->bqk"}> : () -> ()
    %cst_18 = arith.constant dense<0.000000e+00> : vector<2x8x8xf32>
    %46 = tpu.matmul %43, %44, %cst_18 {dimension_numbers = #tpu.dot_dimension_numbers<[2], [2], [1], [1], [0, 0, 0, 1, 1, 1], [0], [0]>} : vector<2x8x16xf32>, vector<2x8x16xf32>, vector<2x8x8xf32> -> vector<2x8x8xf32>
    "tpu.trace_stop"() : () -> ()
    %47 = vector.broadcast %7 : vector<1x1x8xf32> to vector<2x8x8xf32>
    %48 = arith.addf %46, %47 : vector<2x8x8xf32>
    %cst_19 = arith.constant dense<0xFF800000> : vector<2x8xf32>
    %49 = vector.multi_reduction <maximumf>, %48, %cst_19 [2] : vector<2x8x8xf32> to vector<2x8xf32>
    %50 = vector.shape_cast %49 : vector<2x8xf32> to vector<2x8x1xf32>
    %51 = vector.broadcast %50 : vector<2x8x1xf32> to vector<2x8x8xf32>
    %52 = arith.subf %48, %51 : vector<2x8x8xf32>
    %53 = math.exp %52 : vector<2x8x8xf32>
    %cst_20 = arith.constant dense<0.000000e+00> : vector<2x8xf32>
    %54 = vector.multi_reduction <add>, %53, %cst_20 [2] : vector<2x8x8xf32> to vector<2x8xf32>
    %55 = vector.shape_cast %54 : vector<2x8xf32> to vector<2x8x1xf32>
    %56 = tpu.reciprocal %55 {approx = true} : vector<2x8x1xf32> -> vector<2x8x1xf32>
    %57 = vector.broadcast %56 : vector<2x8x1xf32> to vector<2x8x8xf32>
    %58 = arith.mulf %53, %57 : vector<2x8x8xf32>
    "tpu.trace_start"() <{level = 10 : i32, message = "bqk,bkd->bqd"}> : () -> ()
    %cst_21 = arith.constant dense<0.000000e+00> : vector<2x8x16xf32>
    %59 = tpu.matmul %58, %45, %cst_21 {dimension_numbers = #tpu.dot_dimension_numbers<[2], [1], [1], [2], [0, 0, 0, 1, 1, 2], [0], [0]>} : vector<2x8x8xf32>, vector<2x8x16xf32>, vector<2x8x16xf32> -> vector<2x8x16xf32>
    "tpu.trace_stop"() : () -> ()
    %60 = vector.extract_strided_slice %38 {offsets = [0, 0, 16], sizes = [2, 8, 16], strides = [1, 1, 1]} : vector<2x8x64xf32> to vector<2x8x16xf32>
    %61 = vector.extract_strided_slice %40 {offsets = [0, 0, 16], sizes = [2, 8, 16], strides = [1, 1, 1]} : vector<2x8x64xf32> to vector<2x8x16xf32>
    %62 = vector.extract_strided_slice %42 {offsets = [0, 0, 16], sizes = [2, 8, 16], strides = [1, 1, 1]} : vector<2x8x64xf32> to vector<2x8x16xf32>
    "tpu.trace_start"() <{level = 10 : i32, message = "bqd,bkd->bqk"}> : () -> ()
    %cst_22 = arith.constant dense<0.000000e+00> : vector<2x8x8xf32>
    %63 = tpu.matmul %60, %61, %cst_22 {dimension_numbers = #tpu.dot_dimension_numbers<[2], [2], [1], [1], [0, 0, 0, 1, 1, 1], [0], [0]>} : vector<2x8x16xf32>, vector<2x8x16xf32>, vector<2x8x8xf32> -> vector<2x8x8xf32>
    "tpu.trace_stop"() : () -> ()
    %64 = vector.broadcast %7 : vector<1x1x8xf32> to vector<2x8x8xf32>
    %65 = arith.addf %63, %64 : vector<2x8x8xf32>
    %cst_23 = arith.constant dense<0xFF800000> : vector<2x8xf32>
    %66 = vector.multi_reduction <maximumf>, %65, %cst_23 [2] : vector<2x8x8xf32> to vector<2x8xf32>
    %67 = vector.shape_cast %66 : vector<2x8xf32> to vector<2x8x1xf32>
    %68 = vector.broadcast %67 : vector<2x8x1xf32> to vector<2x8x8xf32>
    %69 = arith.subf %65, %68 : vector<2x8x8xf32>
    %70 = math.exp %69 : vector<2x8x8xf32>
    %cst_24 = arith.constant dense<0.000000e+00> : vector<2x8xf32>
    %71 = vector.multi_reduction <add>, %70, %cst_24 [2] : vector<2x8x8xf32> to vector<2x8xf32>
    %72 = vector.shape_cast %71 : vector<2x8xf32> to vector<2x8x1xf32>
    %73 = tpu.reciprocal %72 {approx = true} : vector<2x8x1xf32> -> vector<2x8x1xf32>
    %74 = vector.broadcast %73 : vector<2x8x1xf32> to vector<2x8x8xf32>
    %75 = arith.mulf %70, %74 : vector<2x8x8xf32>
    "tpu.trace_start"() <{level = 10 : i32, message = "bqk,bkd->bqd"}> : () -> ()
    %cst_25 = arith.constant dense<0.000000e+00> : vector<2x8x16xf32>
    %76 = tpu.matmul %75, %62, %cst_25 {dimension_numbers = #tpu.dot_dimension_numbers<[2], [1], [1], [2], [0, 0, 0, 1, 1, 2], [0], [0]>} : vector<2x8x8xf32>, vector<2x8x16xf32>, vector<2x8x16xf32> -> vector<2x8x16xf32>
    "tpu.trace_stop"() : () -> ()
    %77 = vector.extract_strided_slice %38 {offsets = [0, 0, 32], sizes = [2, 8, 16], strides = [1, 1, 1]} : vector<2x8x64xf32> to vector<2x8x16xf32>
    %78 = vector.extract_strided_slice %40 {offsets = [0, 0, 32], sizes = [2, 8, 16], strides = [1, 1, 1]} : vector<2x8x64xf32> to vector<2x8x16xf32>
    %79 = vector.extract_strided_slice %42 {offsets = [0, 0, 32], sizes = [2, 8, 16], strides = [1, 1, 1]} : vector<2x8x64xf32> to vector<2x8x16xf32>
    "tpu.trace_start"() <{level = 10 : i32, message = "bqd,bkd->bqk"}> : () -> ()
    %cst_26 = arith.constant dense<0.000000e+00> : vector<2x8x8xf32>
    %80 = tpu.matmul %77, %78, %cst_26 {dimension_numbers = #tpu.dot_dimension_numbers<[2], [2], [1], [1], [0, 0, 0, 1, 1, 1], [0], [0]>} : vector<2x8x16xf32>, vector<2x8x16xf32>, vector<2x8x8xf32> -> vector<2x8x8xf32>
    "tpu.trace_stop"() : () -> ()
    %81 = vector.broadcast %7 : vector<1x1x8xf32> to vector<2x8x8xf32>
    %82 = arith.addf %80, %81 : vector<2x8x8xf32>
    %cst_27 = arith.constant dense<0xFF800000> : vector<2x8xf32>
    %83 = vector.multi_reduction <maximumf>, %82, %cst_27 [2] : vector<2x8x8xf32> to vector<2x8xf32>
    %84 = vector.shape_cast %83 : vector<2x8xf32> to vector<2x8x1xf32>
    %85 = vector.broadcast %84 : vector<2x8x1xf32> to vector<2x8x8xf32>
    %86 = arith.subf %82, %85 : vector<2x8x8xf32>
    %87 = math.exp %86 : vector<2x8x8xf32>
    %cst_28 = arith.constant dense<0.000000e+00> : vector<2x8xf32>
    %88 = vector.multi_reduction <add>, %87, %cst_28 [2] : vector<2x8x8xf32> to vector<2x8xf32>
    %89 = vector.shape_cast %88 : vector<2x8xf32> to vector<2x8x1xf32>
    %90 = tpu.reciprocal %89 {approx = true} : vector<2x8x1xf32> -> vector<2x8x1xf32>
    %91 = vector.broadcast %90 : vector<2x8x1xf32> to vector<2x8x8xf32>
    %92 = arith.mulf %87, %91 : vector<2x8x8xf32>
    "tpu.trace_start"() <{level = 10 : i32, message = "bqk,bkd->bqd"}> : () -> ()
    %cst_29 = arith.constant dense<0.000000e+00> : vector<2x8x16xf32>
    %93 = tpu.matmul %92, %79, %cst_29 {dimension_numbers = #tpu.dot_dimension_numbers<[2], [1], [1], [2], [0, 0, 0, 1, 1, 2], [0], [0]>} : vector<2x8x8xf32>, vector<2x8x16xf32>, vector<2x8x16xf32> -> vector<2x8x16xf32>
    "tpu.trace_stop"() : () -> ()
    %94 = vector.extract_strided_slice %38 {offsets = [0, 0, 48], sizes = [2, 8, 16], strides = [1, 1, 1]} : vector<2x8x64xf32> to vector<2x8x16xf32>
    %95 = vector.extract_strided_slice %40 {offsets = [0, 0, 48], sizes = [2, 8, 16], strides = [1, 1, 1]} : vector<2x8x64xf32> to vector<2x8x16xf32>
    %96 = vector.extract_strided_slice %42 {offsets = [0, 0, 48], sizes = [2, 8, 16], strides = [1, 1, 1]} : vector<2x8x64xf32> to vector<2x8x16xf32>
    "tpu.trace_start"() <{level = 10 : i32, message = "bqd,bkd->bqk"}> : () -> ()
    %cst_30 = arith.constant dense<0.000000e+00> : vector<2x8x8xf32>
    %97 = tpu.matmul %94, %95, %cst_30 {dimension_numbers = #tpu.dot_dimension_numbers<[2], [2], [1], [1], [0, 0, 0, 1, 1, 1], [0], [0]>} : vector<2x8x16xf32>, vector<2x8x16xf32>, vector<2x8x8xf32> -> vector<2x8x8xf32>
    "tpu.trace_stop"() : () -> ()
    %98 = vector.broadcast %7 : vector<1x1x8xf32> to vector<2x8x8xf32>
    %99 = arith.addf %97, %98 : vector<2x8x8xf32>
    %cst_31 = arith.constant dense<0xFF800000> : vector<2x8xf32>
    %100 = vector.multi_reduction <maximumf>, %99, %cst_31 [2] : vector<2x8x8xf32> to vector<2x8xf32>
    %101 = vector.shape_cast %100 : vector<2x8xf32> to vector<2x8x1xf32>
    %102 = vector.broadcast %101 : vector<2x8x1xf32> to vector<2x8x8xf32>
    %103 = arith.subf %99, %102 : vector<2x8x8xf32>
    %104 = math.exp %103 : vector<2x8x8xf32>
    %cst_32 = arith.constant dense<0.000000e+00> : vector<2x8xf32>
    %105 = vector.multi_reduction <add>, %104, %cst_32 [2] : vector<2x8x8xf32> to vector<2x8xf32>
    %106 = vector.shape_cast %105 : vector<2x8xf32> to vector<2x8x1xf32>
    %107 = tpu.reciprocal %106 {approx = true} : vector<2x8x1xf32> -> vector<2x8x1xf32>
    %108 = vector.broadcast %107 : vector<2x8x1xf32> to vector<2x8x8xf32>
    %109 = arith.mulf %104, %108 : vector<2x8x8xf32>
    "tpu.trace_start"() <{level = 10 : i32, message = "bqk,bkd->bqd"}> : () -> ()
    %cst_33 = arith.constant dense<0.000000e+00> : vector<2x8x16xf32>
    %110 = tpu.matmul %109, %96, %cst_33 {dimension_numbers = #tpu.dot_dimension_numbers<[2], [1], [1], [2], [0, 0, 0, 1, 1, 2], [0], [0]>} : vector<2x8x8xf32>, vector<2x8x16xf32>, vector<2x8x16xf32> -> vector<2x8x16xf32>
    "tpu.trace_stop"() : () -> ()
    %111 = tpu.concatenate %59, %76, %93, %110 in 2 : vector<2x8x16xf32>, vector<2x8x16xf32>, vector<2x8x16xf32>, vector<2x8x16xf32> -> vector<2x8x64xf32>
    %112 = vector.shape_cast %111 : vector<2x8x64xf32> to vector<16x64xf32>
    %c0_34 = arith.constant 0 : index
    %c0_35 = arith.constant 0 : index
    %c0_36 = arith.constant 0 : index
    %113 = vector.load %arg5[%c0_34, %c0_35, %c0_36] : memref<2x64x32xf32, #tpu.memory_space<vmem>>, vector<1x64x32xf32>
    %114 = vector.shape_cast %113 : vector<1x64x32xf32> to vector<64x32xf32>
    %cst_37 = arith.constant dense<0.000000e+00> : vector<16x32xf32>
    %115 = tpu.matmul %112, %114, %cst_37 {dimension_numbers = #tpu.dot_dimension_numbers<[1], [0], [0], [1], [0, 0, 1, 1], [], []>} : vector<16x64xf32>, vector<64x32xf32>, vector<16x32xf32> -> vector<16x32xf32>
    %116 = arith.addf %1, %115 : vector<16x32xf32>
    %c0_38 = arith.constant 0 : index
    %c0_39 = arith.constant 0 : index
    %c0_40 = arith.constant 0 : index
    %117 = vector.load %arg6[%c0_38, %c0_39, %c0_40] : memref<2x1x32xf32, #tpu.memory_space<vmem>>, vector<1x1x32xf32>
    %118 = vector.shape_cast %117 : vector<1x1x32xf32> to vector<1x32xf32>
    %c0_41 = arith.constant 0 : index
    %c0_42 = arith.constant 0 : index
    %c0_43 = arith.constant 0 : index
    %119 = vector.load %arg7[%c0_41, %c0_42, %c0_43] : memref<2x1x32xf32, #tpu.memory_space<vmem>>, vector<1x1x32xf32>
    %120 = vector.shape_cast %119 : vector<1x1x32xf32> to vector<1x32xf32>
    %cst_44 = arith.constant dense<0.000000e+00> : vector<16xf32>
    %121 = vector.multi_reduction <add>, %116, %cst_44 [1] : vector<16x32xf32> to vector<16xf32>
    %122 = vector.shape_cast %121 : vector<16xf32> to vector<16x1xf32>
    %cst_45 = arith.constant 3.200000e+01 : f32
    %123 = vector.broadcast %cst_45 : f32 to vector<16x1xf32>
    %124 = arith.divf %122, %123 : vector<16x1xf32>
    %125 = vector.broadcast %124 : vector<16x1xf32> to vector<16x32xf32>
    %126 = arith.subf %116, %125 : vector<16x32xf32>
    %127 = arith.mulf %126, %126 : vector<16x32xf32>
    %cst_46 = arith.constant dense<0.000000e+00> : vector<16xf32>
    %128 = vector.multi_reduction <add>, %127, %cst_46 [1] : vector<16x32xf32> to vector<16xf32>
    %129 = vector.shape_cast %128 : vector<16xf32> to vector<16x1xf32>
    %cst_47 = arith.constant 3.200000e+01 : f32
    %130 = vector.broadcast %cst_47 : f32 to vector<16x1xf32>
    %131 = arith.divf %129, %130 : vector<16x1xf32>
    %132 = vector.broadcast %124 : vector<16x1xf32> to vector<16x32xf32>
    %133 = arith.subf %116, %132 : vector<16x32xf32>
    %cst_48 = arith.constant 9.99999974E-6 : f32
    %134 = vector.broadcast %cst_48 : f32 to vector<16x1xf32>
    %135 = arith.addf %131, %134 : vector<16x1xf32>
    %136 = math.rsqrt %135 : vector<16x1xf32>
    %137 = vector.broadcast %136 : vector<16x1xf32> to vector<16x32xf32>
    %138 = arith.mulf %133, %137 : vector<16x32xf32>
    %139 = vector.broadcast %118 : vector<1x32xf32> to vector<16x32xf32>
    %140 = arith.mulf %138, %139 : vector<16x32xf32>
    %141 = vector.broadcast %120 : vector<1x32xf32> to vector<16x32xf32>
    %142 = arith.addf %140, %141 : vector<16x32xf32>
    %c0_49 = arith.constant 0 : index
    %c0_50 = arith.constant 0 : index
    %c0_51 = arith.constant 0 : index
    %143 = vector.load %arg8[%c0_49, %c0_50, %c0_51] : memref<2x32x256xf32, #tpu.memory_space<vmem>>, vector<1x32x256xf32>
    %144 = vector.shape_cast %143 : vector<1x32x256xf32> to vector<32x256xf32>
    %cst_52 = arith.constant dense<0.000000e+00> : vector<16x256xf32>
    %145 = tpu.matmul %142, %144, %cst_52 {dimension_numbers = #tpu.dot_dimension_numbers<[1], [0], [0], [1], [0, 0, 1, 1], [], []>} : vector<16x32xf32>, vector<32x256xf32>, vector<16x256xf32> -> vector<16x256xf32>
    %c0_53 = arith.constant 0 : index
    %c0_54 = arith.constant 0 : index
    %c0_55 = arith.constant 0 : index
    %146 = vector.load %arg9[%c0_53, %c0_54, %c0_55] : memref<2x1x256xf32, #tpu.memory_space<vmem>>, vector<1x1x256xf32>
    %147 = vector.shape_cast %146 : vector<1x1x256xf32> to vector<1x256xf32>
    %148 = vector.broadcast %147 : vector<1x256xf32> to vector<16x256xf32>
    %149 = arith.addf %145, %148 : vector<16x256xf32>
    %150 = vector.extract_strided_slice %149 {offsets = [0, 0], sizes = [16, 128], strides = [1, 1]} : vector<16x256xf32> to vector<16x128xf32>
    %151 = vector.extract_strided_slice %149 {offsets = [0, 128], sizes = [16, 128], strides = [1, 1]} : vector<16x256xf32> to vector<16x128xf32>
    %cst_56 = arith.constant 5.000000e-01 : f32
    %152 = vector.broadcast %cst_56 : f32 to vector<16x128xf32>
    %153 = arith.mulf %152, %151 : vector<16x128xf32>
    %cst_57 = arith.constant 1.41421354 : f32
    %154 = vector.broadcast %cst_57 : f32 to vector<16x128xf32>
    %155 = arith.divf %151, %154 : vector<16x128xf32>
    %156 = math.erf %155 : vector<16x128xf32>
    %cst_58 = arith.constant 1.000000e+00 : f32
    %157 = vector.broadcast %cst_58 : f32 to vector<16x128xf32>
    %158 = arith.addf %157, %156 : vector<16x128xf32>
    %159 = arith.mulf %153, %158 : vector<16x128xf32>
    %160 = arith.mulf %150, %159 : vector<16x128xf32>
    %c0_59 = arith.constant 0 : index
    %c0_60 = arith.constant 0 : index
    %c0_61 = arith.constant 0 : index
    %161 = vector.load %arg10[%c0_59, %c0_60, %c0_61] : memref<2x128x32xf32, #tpu.memory_space<vmem>>, vector<1x128x32xf32>
    %162 = vector.shape_cast %161 : vector<1x128x32xf32> to vector<128x32xf32>
    %cst_62 = arith.constant dense<0.000000e+00> : vector<16x32xf32>
    %163 = tpu.matmul %160, %162, %cst_62 {dimension_numbers = #tpu.dot_dimension_numbers<[1], [0], [0], [1], [0, 0, 1, 1], [], []>} : vector<16x128xf32>, vector<128x32xf32>, vector<16x32xf32> -> vector<16x32xf32>
    %164 = arith.addf %116, %163 : vector<16x32xf32>
    %c0_63 = arith.constant 0 : index
    %c0_64 = arith.constant 0 : index
    %c0_65 = arith.constant 0 : index
    %165 = vector.load %arg11[%c0_63, %c0_64, %c0_65] : memref<2x1x32xf32, #tpu.memory_space<vmem>>, vector<1x1x32xf32>
    %166 = vector.shape_cast %165 : vector<1x1x32xf32> to vector<1x32xf32>
    %167 = vector.broadcast %166 : vector<1x32xf32> to vector<16x32xf32>
    %168 = arith.addf %164, %167 : vector<16x32xf32>
    %c1 = arith.constant 1 : index
    %c0_66 = arith.constant 0 : index
    %c0_67 = arith.constant 0 : index
    %169 = vector.load %arg2[%c1, %c0_66, %c0_67] : memref<2x1x32xf32, #tpu.memory_space<vmem>>, vector<1x1x32xf32>
    %170 = vector.shape_cast %169 : vector<1x1x32xf32> to vector<1x32xf32>
    %c1_68 = arith.constant 1 : index
    %c0_69 = arith.constant 0 : index
    %c0_70 = arith.constant 0 : index
    %171 = vector.load %arg3[%c1_68, %c0_69, %c0_70] : memref<2x1x32xf32, #tpu.memory_space<vmem>>, vector<1x1x32xf32>
    %172 = vector.shape_cast %171 : vector<1x1x32xf32> to vector<1x32xf32>
    %cst_71 = arith.constant dense<0.000000e+00> : vector<16xf32>
    %173 = vector.multi_reduction <add>, %168, %cst_71 [1] : vector<16x32xf32> to vector<16xf32>
    %174 = vector.shape_cast %173 : vector<16xf32> to vector<16x1xf32>
    %cst_72 = arith.constant 3.200000e+01 : f32
    %175 = vector.broadcast %cst_72 : f32 to vector<16x1xf32>
    %176 = arith.divf %174, %175 : vector<16x1xf32>
    %177 = vector.broadcast %176 : vector<16x1xf32> to vector<16x32xf32>
    %178 = arith.subf %168, %177 : vector<16x32xf32>
    %179 = arith.mulf %178, %178 : vector<16x32xf32>
    %cst_73 = arith.constant dense<0.000000e+00> : vector<16xf32>
    %180 = vector.multi_reduction <add>, %179, %cst_73 [1] : vector<16x32xf32> to vector<16xf32>
    %181 = vector.shape_cast %180 : vector<16xf32> to vector<16x1xf32>
    %cst_74 = arith.constant 3.200000e+01 : f32
    %182 = vector.broadcast %cst_74 : f32 to vector<16x1xf32>
    %183 = arith.divf %181, %182 : vector<16x1xf32>
    %184 = vector.broadcast %176 : vector<16x1xf32> to vector<16x32xf32>
    %185 = arith.subf %168, %184 : vector<16x32xf32>
    %cst_75 = arith.constant 9.99999974E-6 : f32
    %186 = vector.broadcast %cst_75 : f32 to vector<16x1xf32>
    %187 = arith.addf %183, %186 : vector<16x1xf32>
    %188 = math.rsqrt %187 : vector<16x1xf32>
    %189 = vector.broadcast %188 : vector<16x1xf32> to vector<16x32xf32>
    %190 = arith.mulf %185, %189 : vector<16x32xf32>
    %191 = vector.broadcast %170 : vector<1x32xf32> to vector<16x32xf32>
    %192 = arith.mulf %190, %191 : vector<16x32xf32>
    %193 = vector.broadcast %172 : vector<1x32xf32> to vector<16x32xf32>
    %194 = arith.addf %192, %193 : vector<16x32xf32>
    %c1_76 = arith.constant 1 : index
    %c0_77 = arith.constant 0 : index
    %c0_78 = arith.constant 0 : index
    %195 = vector.load %arg4[%c1_76, %c0_77, %c0_78] : memref<2x32x192xf32, #tpu.memory_space<vmem>>, vector<1x32x192xf32>
    %196 = vector.shape_cast %195 : vector<1x32x192xf32> to vector<32x192xf32>
    %cst_79 = arith.constant dense<0.000000e+00> : vector<16x192xf32>
    %197 = tpu.matmul %194, %196, %cst_79 {dimension_numbers = #tpu.dot_dimension_numbers<[1], [0], [0], [1], [0, 0, 1, 1], [], []>} : vector<16x32xf32>, vector<32x192xf32>, vector<16x192xf32> -> vector<16x192xf32>
    %198 = vector.extract_strided_slice %197 {offsets = [0, 0], sizes = [16, 64], strides = [1, 1]} : vector<16x192xf32> to vector<16x64xf32>
    %199 = vector.shape_cast %198 : vector<16x64xf32> to vector<2x8x64xf32>
    %200 = vector.extract_strided_slice %197 {offsets = [0, 64], sizes = [16, 64], strides = [1, 1]} : vector<16x192xf32> to vector<16x64xf32>
    %201 = vector.shape_cast %200 : vector<16x64xf32> to vector<2x8x64xf32>
    %202 = vector.extract_strided_slice %197 {offsets = [0, 128], sizes = [16, 64], strides = [1, 1]} : vector<16x192xf32> to vector<16x64xf32>
    %203 = vector.shape_cast %202 : vector<16x64xf32> to vector<2x8x64xf32>
    %204 = vector.extract_strided_slice %199 {offsets = [0, 0, 0], sizes = [2, 8, 16], strides = [1, 1, 1]} : vector<2x8x64xf32> to vector<2x8x16xf32>
    %205 = vector.extract_strided_slice %201 {offsets = [0, 0, 0], sizes = [2, 8, 16], strides = [1, 1, 1]} : vector<2x8x64xf32> to vector<2x8x16xf32>
    %206 = vector.extract_strided_slice %203 {offsets = [0, 0, 0], sizes = [2, 8, 16], strides = [1, 1, 1]} : vector<2x8x64xf32> to vector<2x8x16xf32>
    "tpu.trace_start"() <{level = 10 : i32, message = "bqd,bkd->bqk"}> : () -> ()
    %cst_80 = arith.constant dense<0.000000e+00> : vector<2x8x8xf32>
    %207 = tpu.matmul %204, %205, %cst_80 {dimension_numbers = #tpu.dot_dimension_numbers<[2], [2], [1], [1], [0, 0, 0, 1, 1, 1], [0], [0]>} : vector<2x8x16xf32>, vector<2x8x16xf32>, vector<2x8x8xf32> -> vector<2x8x8xf32>
    "tpu.trace_stop"() : () -> ()
    %208 = vector.broadcast %7 : vector<1x1x8xf32> to vector<2x8x8xf32>
    %209 = arith.addf %207, %208 : vector<2x8x8xf32>
    %cst_81 = arith.constant dense<0xFF800000> : vector<2x8xf32>
    %210 = vector.multi_reduction <maximumf>, %209, %cst_81 [2] : vector<2x8x8xf32> to vector<2x8xf32>
    %211 = vector.shape_cast %210 : vector<2x8xf32> to vector<2x8x1xf32>
    %212 = vector.broadcast %211 : vector<2x8x1xf32> to vector<2x8x8xf32>
    %213 = arith.subf %209, %212 : vector<2x8x8xf32>
    %214 = math.exp %213 : vector<2x8x8xf32>
    %cst_82 = arith.constant dense<0.000000e+00> : vector<2x8xf32>
    %215 = vector.multi_reduction <add>, %214, %cst_82 [2] : vector<2x8x8xf32> to vector<2x8xf32>
    %216 = vector.shape_cast %215 : vector<2x8xf32> to vector<2x8x1xf32>
    %217 = tpu.reciprocal %216 {approx = true} : vector<2x8x1xf32> -> vector<2x8x1xf32>
    %218 = vector.broadcast %217 : vector<2x8x1xf32> to vector<2x8x8xf32>
    %219 = arith.mulf %214, %218 : vector<2x8x8xf32>
    "tpu.trace_start"() <{level = 10 : i32, message = "bqk,bkd->bqd"}> : () -> ()
    %cst_83 = arith.constant dense<0.000000e+00> : vector<2x8x16xf32>
    %220 = tpu.matmul %219, %206, %cst_83 {dimension_numbers = #tpu.dot_dimension_numbers<[2], [1], [1], [2], [0, 0, 0, 1, 1, 2], [0], [0]>} : vector<2x8x8xf32>, vector<2x8x16xf32>, vector<2x8x16xf32> -> vector<2x8x16xf32>
    "tpu.trace_stop"() : () -> ()
    %221 = vector.extract_strided_slice %199 {offsets = [0, 0, 16], sizes = [2, 8, 16], strides = [1, 1, 1]} : vector<2x8x64xf32> to vector<2x8x16xf32>
    %222 = vector.extract_strided_slice %201 {offsets = [0, 0, 16], sizes = [2, 8, 16], strides = [1, 1, 1]} : vector<2x8x64xf32> to vector<2x8x16xf32>
    %223 = vector.extract_strided_slice %203 {offsets = [0, 0, 16], sizes = [2, 8, 16], strides = [1, 1, 1]} : vector<2x8x64xf32> to vector<2x8x16xf32>
    "tpu.trace_start"() <{level = 10 : i32, message = "bqd,bkd->bqk"}> : () -> ()
    %cst_84 = arith.constant dense<0.000000e+00> : vector<2x8x8xf32>
    %224 = tpu.matmul %221, %222, %cst_84 {dimension_numbers = #tpu.dot_dimension_numbers<[2], [2], [1], [1], [0, 0, 0, 1, 1, 1], [0], [0]>} : vector<2x8x16xf32>, vector<2x8x16xf32>, vector<2x8x8xf32> -> vector<2x8x8xf32>
    "tpu.trace_stop"() : () -> ()
    %225 = vector.broadcast %7 : vector<1x1x8xf32> to vector<2x8x8xf32>
    %226 = arith.addf %224, %225 : vector<2x8x8xf32>
    %cst_85 = arith.constant dense<0xFF800000> : vector<2x8xf32>
    %227 = vector.multi_reduction <maximumf>, %226, %cst_85 [2] : vector<2x8x8xf32> to vector<2x8xf32>
    %228 = vector.shape_cast %227 : vector<2x8xf32> to vector<2x8x1xf32>
    %229 = vector.broadcast %228 : vector<2x8x1xf32> to vector<2x8x8xf32>
    %230 = arith.subf %226, %229 : vector<2x8x8xf32>
    %231 = math.exp %230 : vector<2x8x8xf32>
    %cst_86 = arith.constant dense<0.000000e+00> : vector<2x8xf32>
    %232 = vector.multi_reduction <add>, %231, %cst_86 [2] : vector<2x8x8xf32> to vector<2x8xf32>
    %233 = vector.shape_cast %232 : vector<2x8xf32> to vector<2x8x1xf32>
    %234 = tpu.reciprocal %233 {approx = true} : vector<2x8x1xf32> -> vector<2x8x1xf32>
    %235 = vector.broadcast %234 : vector<2x8x1xf32> to vector<2x8x8xf32>
    %236 = arith.mulf %231, %235 : vector<2x8x8xf32>
    "tpu.trace_start"() <{level = 10 : i32, message = "bqk,bkd->bqd"}> : () -> ()
    %cst_87 = arith.constant dense<0.000000e+00> : vector<2x8x16xf32>
    %237 = tpu.matmul %236, %223, %cst_87 {dimension_numbers = #tpu.dot_dimension_numbers<[2], [1], [1], [2], [0, 0, 0, 1, 1, 2], [0], [0]>} : vector<2x8x8xf32>, vector<2x8x16xf32>, vector<2x8x16xf32> -> vector<2x8x16xf32>
    "tpu.trace_stop"() : () -> ()
    %238 = vector.extract_strided_slice %199 {offsets = [0, 0, 32], sizes = [2, 8, 16], strides = [1, 1, 1]} : vector<2x8x64xf32> to vector<2x8x16xf32>
    %239 = vector.extract_strided_slice %201 {offsets = [0, 0, 32], sizes = [2, 8, 16], strides = [1, 1, 1]} : vector<2x8x64xf32> to vector<2x8x16xf32>
    %240 = vector.extract_strided_slice %203 {offsets = [0, 0, 32], sizes = [2, 8, 16], strides = [1, 1, 1]} : vector<2x8x64xf32> to vector<2x8x16xf32>
    "tpu.trace_start"() <{level = 10 : i32, message = "bqd,bkd->bqk"}> : () -> ()
    %cst_88 = arith.constant dense<0.000000e+00> : vector<2x8x8xf32>
    %241 = tpu.matmul %238, %239, %cst_88 {dimension_numbers = #tpu.dot_dimension_numbers<[2], [2], [1], [1], [0, 0, 0, 1, 1, 1], [0], [0]>} : vector<2x8x16xf32>, vector<2x8x16xf32>, vector<2x8x8xf32> -> vector<2x8x8xf32>
    "tpu.trace_stop"() : () -> ()
    %242 = vector.broadcast %7 : vector<1x1x8xf32> to vector<2x8x8xf32>
    %243 = arith.addf %241, %242 : vector<2x8x8xf32>
    %cst_89 = arith.constant dense<0xFF800000> : vector<2x8xf32>
    %244 = vector.multi_reduction <maximumf>, %243, %cst_89 [2] : vector<2x8x8xf32> to vector<2x8xf32>
    %245 = vector.shape_cast %244 : vector<2x8xf32> to vector<2x8x1xf32>
    %246 = vector.broadcast %245 : vector<2x8x1xf32> to vector<2x8x8xf32>
    %247 = arith.subf %243, %246 : vector<2x8x8xf32>
    %248 = math.exp %247 : vector<2x8x8xf32>
    %cst_90 = arith.constant dense<0.000000e+00> : vector<2x8xf32>
    %249 = vector.multi_reduction <add>, %248, %cst_90 [2] : vector<2x8x8xf32> to vector<2x8xf32>
    %250 = vector.shape_cast %249 : vector<2x8xf32> to vector<2x8x1xf32>
    %251 = tpu.reciprocal %250 {approx = true} : vector<2x8x1xf32> -> vector<2x8x1xf32>
    %252 = vector.broadcast %251 : vector<2x8x1xf32> to vector<2x8x8xf32>
    %253 = arith.mulf %248, %252 : vector<2x8x8xf32>
    "tpu.trace_start"() <{level = 10 : i32, message = "bqk,bkd->bqd"}> : () -> ()
    %cst_91 = arith.constant dense<0.000000e+00> : vector<2x8x16xf32>
    %254 = tpu.matmul %253, %240, %cst_91 {dimension_numbers = #tpu.dot_dimension_numbers<[2], [1], [1], [2], [0, 0, 0, 1, 1, 2], [0], [0]>} : vector<2x8x8xf32>, vector<2x8x16xf32>, vector<2x8x16xf32> -> vector<2x8x16xf32>
    "tpu.trace_stop"() : () -> ()
    %255 = vector.extract_strided_slice %199 {offsets = [0, 0, 48], sizes = [2, 8, 16], strides = [1, 1, 1]} : vector<2x8x64xf32> to vector<2x8x16xf32>
    %256 = vector.extract_strided_slice %201 {offsets = [0, 0, 48], sizes = [2, 8, 16], strides = [1, 1, 1]} : vector<2x8x64xf32> to vector<2x8x16xf32>
    %257 = vector.extract_strided_slice %203 {offsets = [0, 0, 48], sizes = [2, 8, 16], strides = [1, 1, 1]} : vector<2x8x64xf32> to vector<2x8x16xf32>
    "tpu.trace_start"() <{level = 10 : i32, message = "bqd,bkd->bqk"}> : () -> ()
    %cst_92 = arith.constant dense<0.000000e+00> : vector<2x8x8xf32>
    %258 = tpu.matmul %255, %256, %cst_92 {dimension_numbers = #tpu.dot_dimension_numbers<[2], [2], [1], [1], [0, 0, 0, 1, 1, 1], [0], [0]>} : vector<2x8x16xf32>, vector<2x8x16xf32>, vector<2x8x8xf32> -> vector<2x8x8xf32>
    "tpu.trace_stop"() : () -> ()
    %259 = vector.broadcast %7 : vector<1x1x8xf32> to vector<2x8x8xf32>
    %260 = arith.addf %258, %259 : vector<2x8x8xf32>
    %cst_93 = arith.constant dense<0xFF800000> : vector<2x8xf32>
    %261 = vector.multi_reduction <maximumf>, %260, %cst_93 [2] : vector<2x8x8xf32> to vector<2x8xf32>
    %262 = vector.shape_cast %261 : vector<2x8xf32> to vector<2x8x1xf32>
    %263 = vector.broadcast %262 : vector<2x8x1xf32> to vector<2x8x8xf32>
    %264 = arith.subf %260, %263 : vector<2x8x8xf32>
    %265 = math.exp %264 : vector<2x8x8xf32>
    %cst_94 = arith.constant dense<0.000000e+00> : vector<2x8xf32>
    %266 = vector.multi_reduction <add>, %265, %cst_94 [2] : vector<2x8x8xf32> to vector<2x8xf32>
    %267 = vector.shape_cast %266 : vector<2x8xf32> to vector<2x8x1xf32>
    %268 = tpu.reciprocal %267 {approx = true} : vector<2x8x1xf32> -> vector<2x8x1xf32>
    %269 = vector.broadcast %268 : vector<2x8x1xf32> to vector<2x8x8xf32>
    %270 = arith.mulf %265, %269 : vector<2x8x8xf32>
    "tpu.trace_start"() <{level = 10 : i32, message = "bqk,bkd->bqd"}> : () -> ()
    %cst_95 = arith.constant dense<0.000000e+00> : vector<2x8x16xf32>
    %271 = tpu.matmul %270, %257, %cst_95 {dimension_numbers = #tpu.dot_dimension_numbers<[2], [1], [1], [2], [0, 0, 0, 1, 1, 2], [0], [0]>} : vector<2x8x8xf32>, vector<2x8x16xf32>, vector<2x8x16xf32> -> vector<2x8x16xf32>
    "tpu.trace_stop"() : () -> ()
    %272 = tpu.concatenate %220, %237, %254, %271 in 2 : vector<2x8x16xf32>, vector<2x8x16xf32>, vector<2x8x16xf32>, vector<2x8x16xf32> -> vector<2x8x64xf32>
    %273 = vector.shape_cast %272 : vector<2x8x64xf32> to vector<16x64xf32>
    %c1_96 = arith.constant 1 : index
    %c0_97 = arith.constant 0 : index
    %c0_98 = arith.constant 0 : index
    %274 = vector.load %arg5[%c1_96, %c0_97, %c0_98] : memref<2x64x32xf32, #tpu.memory_space<vmem>>, vector<1x64x32xf32>
    %275 = vector.shape_cast %274 : vector<1x64x32xf32> to vector<64x32xf32>
    %cst_99 = arith.constant dense<0.000000e+00> : vector<16x32xf32>
    %276 = tpu.matmul %273, %275, %cst_99 {dimension_numbers = #tpu.dot_dimension_numbers<[1], [0], [0], [1], [0, 0, 1, 1], [], []>} : vector<16x64xf32>, vector<64x32xf32>, vector<16x32xf32> -> vector<16x32xf32>
    %277 = arith.addf %168, %276 : vector<16x32xf32>
    %c1_100 = arith.constant 1 : index
    %c0_101 = arith.constant 0 : index
    %c0_102 = arith.constant 0 : index
    %278 = vector.load %arg6[%c1_100, %c0_101, %c0_102] : memref<2x1x32xf32, #tpu.memory_space<vmem>>, vector<1x1x32xf32>
    %279 = vector.shape_cast %278 : vector<1x1x32xf32> to vector<1x32xf32>
    %c1_103 = arith.constant 1 : index
    %c0_104 = arith.constant 0 : index
    %c0_105 = arith.constant 0 : index
    %280 = vector.load %arg7[%c1_103, %c0_104, %c0_105] : memref<2x1x32xf32, #tpu.memory_space<vmem>>, vector<1x1x32xf32>
    %281 = vector.shape_cast %280 : vector<1x1x32xf32> to vector<1x32xf32>
    %cst_106 = arith.constant dense<0.000000e+00> : vector<16xf32>
    %282 = vector.multi_reduction <add>, %277, %cst_106 [1] : vector<16x32xf32> to vector<16xf32>
    %283 = vector.shape_cast %282 : vector<16xf32> to vector<16x1xf32>
    %cst_107 = arith.constant 3.200000e+01 : f32
    %284 = vector.broadcast %cst_107 : f32 to vector<16x1xf32>
    %285 = arith.divf %283, %284 : vector<16x1xf32>
    %286 = vector.broadcast %285 : vector<16x1xf32> to vector<16x32xf32>
    %287 = arith.subf %277, %286 : vector<16x32xf32>
    %288 = arith.mulf %287, %287 : vector<16x32xf32>
    %cst_108 = arith.constant dense<0.000000e+00> : vector<16xf32>
    %289 = vector.multi_reduction <add>, %288, %cst_108 [1] : vector<16x32xf32> to vector<16xf32>
    %290 = vector.shape_cast %289 : vector<16xf32> to vector<16x1xf32>
    %cst_109 = arith.constant 3.200000e+01 : f32
    %291 = vector.broadcast %cst_109 : f32 to vector<16x1xf32>
    %292 = arith.divf %290, %291 : vector<16x1xf32>
    %293 = vector.broadcast %285 : vector<16x1xf32> to vector<16x32xf32>
    %294 = arith.subf %277, %293 : vector<16x32xf32>
    %cst_110 = arith.constant 9.99999974E-6 : f32
    %295 = vector.broadcast %cst_110 : f32 to vector<16x1xf32>
    %296 = arith.addf %292, %295 : vector<16x1xf32>
    %297 = math.rsqrt %296 : vector<16x1xf32>
    %298 = vector.broadcast %297 : vector<16x1xf32> to vector<16x32xf32>
    %299 = arith.mulf %294, %298 : vector<16x32xf32>
    %300 = vector.broadcast %279 : vector<1x32xf32> to vector<16x32xf32>
    %301 = arith.mulf %299, %300 : vector<16x32xf32>
    %302 = vector.broadcast %281 : vector<1x32xf32> to vector<16x32xf32>
    %303 = arith.addf %301, %302 : vector<16x32xf32>
    %c1_111 = arith.constant 1 : index
    %c0_112 = arith.constant 0 : index
    %c0_113 = arith.constant 0 : index
    %304 = vector.load %arg8[%c1_111, %c0_112, %c0_113] : memref<2x32x256xf32, #tpu.memory_space<vmem>>, vector<1x32x256xf32>
    %305 = vector.shape_cast %304 : vector<1x32x256xf32> to vector<32x256xf32>
    %cst_114 = arith.constant dense<0.000000e+00> : vector<16x256xf32>
    %306 = tpu.matmul %303, %305, %cst_114 {dimension_numbers = #tpu.dot_dimension_numbers<[1], [0], [0], [1], [0, 0, 1, 1], [], []>} : vector<16x32xf32>, vector<32x256xf32>, vector<16x256xf32> -> vector<16x256xf32>
    %c1_115 = arith.constant 1 : index
    %c0_116 = arith.constant 0 : index
    %c0_117 = arith.constant 0 : index
    %307 = vector.load %arg9[%c1_115, %c0_116, %c0_117] : memref<2x1x256xf32, #tpu.memory_space<vmem>>, vector<1x1x256xf32>
    %308 = vector.shape_cast %307 : vector<1x1x256xf32> to vector<1x256xf32>
    %309 = vector.broadcast %308 : vector<1x256xf32> to vector<16x256xf32>
    %310 = arith.addf %306, %309 : vector<16x256xf32>
    %311 = vector.extract_strided_slice %310 {offsets = [0, 0], sizes = [16, 128], strides = [1, 1]} : vector<16x256xf32> to vector<16x128xf32>
    %312 = vector.extract_strided_slice %310 {offsets = [0, 128], sizes = [16, 128], strides = [1, 1]} : vector<16x256xf32> to vector<16x128xf32>
    %cst_118 = arith.constant 5.000000e-01 : f32
    %313 = vector.broadcast %cst_118 : f32 to vector<16x128xf32>
    %314 = arith.mulf %313, %312 : vector<16x128xf32>
    %cst_119 = arith.constant 1.41421354 : f32
    %315 = vector.broadcast %cst_119 : f32 to vector<16x128xf32>
    %316 = arith.divf %312, %315 : vector<16x128xf32>
    %317 = math.erf %316 : vector<16x128xf32>
    %cst_120 = arith.constant 1.000000e+00 : f32
    %318 = vector.broadcast %cst_120 : f32 to vector<16x128xf32>
    %319 = arith.addf %318, %317 : vector<16x128xf32>
    %320 = arith.mulf %314, %319 : vector<16x128xf32>
    %321 = arith.mulf %311, %320 : vector<16x128xf32>
    %c1_121 = arith.constant 1 : index
    %c0_122 = arith.constant 0 : index
    %c0_123 = arith.constant 0 : index
    %322 = vector.load %arg10[%c1_121, %c0_122, %c0_123] : memref<2x128x32xf32, #tpu.memory_space<vmem>>, vector<1x128x32xf32>
    %323 = vector.shape_cast %322 : vector<1x128x32xf32> to vector<128x32xf32>
    %cst_124 = arith.constant dense<0.000000e+00> : vector<16x32xf32>
    %324 = tpu.matmul %321, %323, %cst_124 {dimension_numbers = #tpu.dot_dimension_numbers<[1], [0], [0], [1], [0, 0, 1, 1], [], []>} : vector<16x128xf32>, vector<128x32xf32>, vector<16x32xf32> -> vector<16x32xf32>
    %325 = arith.addf %277, %324 : vector<16x32xf32>
    %c1_125 = arith.constant 1 : index
    %c0_126 = arith.constant 0 : index
    %c0_127 = arith.constant 0 : index
    %326 = vector.load %arg11[%c1_125, %c0_126, %c0_127] : memref<2x1x32xf32, #tpu.memory_space<vmem>>, vector<1x1x32xf32>
    %327 = vector.shape_cast %326 : vector<1x1x32xf32> to vector<1x32xf32>
    %328 = vector.broadcast %327 : vector<1x32xf32> to vector<16x32xf32>
    %329 = arith.addf %325, %328 : vector<16x32xf32>
    %330 = vector.shape_cast %329 : vector<16x32xf32> to vector<2x8x32xf32>
    %331 = vector.extract_strided_slice %330 {offsets = [0, 0, 0], sizes = [2, 1, 32], strides = [1, 1, 1]} : vector<2x8x32xf32> to vector<2x1x32xf32>
    %332 = vector.shape_cast %331 : vector<2x1x32xf32> to vector<2x32xf32>
    %c0_128 = arith.constant 0 : index
    %c0_129 = arith.constant 0 : index
    %333 = vector.load %arg12[%c0_128, %c0_129] : memref<1x32xf32, #tpu.memory_space<vmem>>, vector<1x32xf32>
    %c0_130 = arith.constant 0 : index
    %c0_131 = arith.constant 0 : index
    %334 = vector.load %arg13[%c0_130, %c0_131] : memref<1x32xf32, #tpu.memory_space<vmem>>, vector<1x32xf32>
    %cst_132 = arith.constant dense<0.000000e+00> : vector<2xf32>
    %335 = vector.multi_reduction <add>, %332, %cst_132 [1] : vector<2x32xf32> to vector<2xf32>
    %336 = vector.shape_cast %335 : vector<2xf32> to vector<2x1xf32>
    %cst_133 = arith.constant 3.200000e+01 : f32
    %337 = vector.broadcast %cst_133 : f32 to vector<2x1xf32>
    %338 = arith.divf %336, %337 : vector<2x1xf32>
    %339 = vector.broadcast %338 : vector<2x1xf32> to vector<2x32xf32>
    %340 = arith.subf %332, %339 : vector<2x32xf32>
    %341 = arith.mulf %340, %340 : vector<2x32xf32>
    %cst_134 = arith.constant dense<0.000000e+00> : vector<2xf32>
    %342 = vector.multi_reduction <add>, %341, %cst_134 [1] : vector<2x32xf32> to vector<2xf32>
    %343 = vector.shape_cast %342 : vector<2xf32> to vector<2x1xf32>
    %cst_135 = arith.constant 3.200000e+01 : f32
    %344 = vector.broadcast %cst_135 : f32 to vector<2x1xf32>
    %345 = arith.divf %343, %344 : vector<2x1xf32>
    %346 = vector.broadcast %338 : vector<2x1xf32> to vector<2x32xf32>
    %347 = arith.subf %332, %346 : vector<2x32xf32>
    %cst_136 = arith.constant 9.99999974E-6 : f32
    %348 = vector.broadcast %cst_136 : f32 to vector<2x1xf32>
    %349 = arith.addf %345, %348 : vector<2x1xf32>
    %350 = math.rsqrt %349 : vector<2x1xf32>
    %351 = vector.broadcast %350 : vector<2x1xf32> to vector<2x32xf32>
    %352 = arith.mulf %347, %351 : vector<2x32xf32>
    %353 = vector.broadcast %333 : vector<1x32xf32> to vector<2x32xf32>
    %354 = arith.mulf %352, %353 : vector<2x32xf32>
    %355 = vector.broadcast %334 : vector<1x32xf32> to vector<2x32xf32>
    %356 = arith.addf %354, %355 : vector<2x32xf32>
    %cst_137 = arith.constant 0.000000e+00 : f32
    %357 = vector.broadcast %cst_137 : f32 to vector<2x32xf32>
    %358 = arith.maximumf %356, %357 : vector<2x32xf32>
    %c0_138 = arith.constant 0 : index
    %c0_139 = arith.constant 0 : index
    %359 = vector.load %arg14[%c0_138, %c0_139] : memref<32x2xf32, #tpu.memory_space<vmem>>, vector<32x2xf32>
    %cst_140 = arith.constant dense<0.000000e+00> : vector<2x2xf32>
    %360 = tpu.matmul %358, %359, %cst_140 {dimension_numbers = #tpu.dot_dimension_numbers<[1], [0], [0], [1], [0, 0, 1, 1], [], []>} : vector<2x32xf32>, vector<32x2xf32>, vector<2x2xf32> -> vector<2x2xf32>
    %c0_141 = arith.constant 0 : index
    %c0_142 = arith.constant 0 : index
    %361 = vector.load %arg15[%c0_141, %c0_142] : memref<1x2xf32, #tpu.memory_space<vmem>>, vector<1x2xf32>
    %362 = vector.broadcast %361 : vector<1x2xf32> to vector<2x2xf32>
    %363 = arith.addf %360, %362 : vector<2x2xf32>
    %c0_143 = arith.constant 0 : index
    %c0_144 = arith.constant 0 : index
    %364 = vector.load %arg16[%c0_143, %c0_144] : memref<2x2xf32, #tpu.memory_space<vmem>>, vector<2x2xf32>
    tpu.vector_store %arg16[%c0_143, %c0_144], %363 {strides = array<i32>} : memref<2x2xf32, #tpu.memory_space<vmem>>, vector<2x2xf32>,
    return
  }
  func.func @transform_0(%arg0: i32) -> (i32, i32, i32) {
    %c0_i32 = arith.constant 0 : i32
    %c0_i32_0 = arith.constant 0 : i32
    %c0_i32_1 = arith.constant 0 : i32
    return %arg0, %c0_i32, %c0_i32_0 : i32, i32, i32
  }
  func.func @transform_1(%arg0: i32) -> (i32, i32, i32) {
    %c0_i32 = arith.constant 0 : i32
    %c0_i32_0 = arith.constant 0 : i32
    %c0_i32_1 = arith.constant 0 : i32
    %c0_i32_2 = arith.constant 0 : i32
    return %c0_i32, %c0_i32_0, %c0_i32_1 : i32, i32, i32
  }
  func.func @transform_2(%arg0: i32) -> (i32, i32, i32) {
    %c0_i32 = arith.constant 0 : i32
    %c0_i32_0 = arith.constant 0 : i32
    %c0_i32_1 = arith.constant 0 : i32
    %c0_i32_2 = arith.constant 0 : i32
    return %c0_i32, %c0_i32_0, %c0_i32_1 : i32, i32, i32
  }
  func.func @transform_3(%arg0: i32) -> (i32, i32, i32) {
    %c0_i32 = arith.constant 0 : i32
    %c0_i32_0 = arith.constant 0 : i32
    %c0_i32_1 = arith.constant 0 : i32
    %c0_i32_2 = arith.constant 0 : i32
    return %c0_i32, %c0_i32_0, %c0_i32_1 : i32, i32, i32
  }
  func.func @transform_4(%arg0: i32) -> (i32, i32, i32) {
    %c0_i32 = arith.constant 0 : i32
    %c0_i32_0 = arith.constant 0 : i32
    %c0_i32_1 = arith.constant 0 : i32
    %c0_i32_2 = arith.constant 0 : i32
    return %c0_i32, %c0_i32_0, %c0_i32_1 : i32, i32, i32
  }
  func.func @transform_5(%arg0: i32) -> (i32, i32, i32) {
    %c0_i32 = arith.constant 0 : i32
    %c0_i32_0 = arith.constant 0 : i32
    %c0_i32_1 = arith.constant 0 : i32
    %c0_i32_2 = arith.constant 0 : i32
    return %c0_i32, %c0_i32_0, %c0_i32_1 : i32, i32, i32
  }
  func.func @transform_6(%arg0: i32) -> (i32, i32, i32) {
    %c0_i32 = arith.constant 0 : i32
    %c0_i32_0 = arith.constant 0 : i32
    %c0_i32_1 = arith.constant 0 : i32
    %c0_i32_2 = arith.constant 0 : i32
    return %c0_i32, %c0_i32_0, %c0_i32_1 : i32, i32, i32
  }
  func.func @transform_7(%arg0: i32) -> (i32, i32, i32) {
    %c0_i32 = arith.constant 0 : i32
    %c0_i32_0 = arith.constant 0 : i32
    %c0_i32_1 = arith.constant 0 : i32
    %c0_i32_2 = arith.constant 0 : i32
    return %c0_i32, %c0_i32_0, %c0_i32_1 : i32, i32, i32
  }
  func.func @transform_8(%arg0: i32) -> (i32, i32, i32) {
    %c0_i32 = arith.constant 0 : i32
    %c0_i32_0 = arith.constant 0 : i32
    %c0_i32_1 = arith.constant 0 : i32
    %c0_i32_2 = arith.constant 0 : i32
    return %c0_i32, %c0_i32_0, %c0_i32_1 : i32, i32, i32
  }
  func.func @transform_9(%arg0: i32) -> (i32, i32, i32) {
    %c0_i32 = arith.constant 0 : i32
    %c0_i32_0 = arith.constant 0 : i32
    %c0_i32_1 = arith.constant 0 : i32
    %c0_i32_2 = arith.constant 0 : i32
    return %c0_i32, %c0_i32_0, %c0_i32_1 : i32, i32, i32
  }
  func.func @transform_10(%arg0: i32) -> (i32, i32, i32) {
    %c0_i32 = arith.constant 0 : i32
    %c0_i32_0 = arith.constant 0 : i32
    %c0_i32_1 = arith.constant 0 : i32
    %c0_i32_2 = arith.constant 0 : i32
    return %c0_i32, %c0_i32_0, %c0_i32_1 : i32, i32, i32
  }
  func.func @transform_11(%arg0: i32) -> (i32, i32) {
    %c0_i32 = arith.constant 0 : i32
    %c0_i32_0 = arith.constant 0 : i32
    %c0_i32_1 = arith.constant 0 : i32
    return %c0_i32, %c0_i32_0 : i32, i32
  }
  func.func @transform_12(%arg0: i32) -> (i32, i32) {
    %c0_i32 = arith.constant 0 : i32
    %c0_i32_0 = arith.constant 0 : i32
    %c0_i32_1 = arith.constant 0 : i32
    return %c0_i32, %c0_i32_0 : i32, i32
  }
  func.func @transform_13(%arg0: i32) -> (i32, i32) {
    %c0_i32 = arith.constant 0 : i32
    %c0_i32_0 = arith.constant 0 : i32
    %c0_i32_1 = arith.constant 0 : i32
    return %c0_i32, %c0_i32_0 : i32, i32
  }
  func.func @transform_14(%arg0: i32) -> (i32, i32) {
    %c0_i32 = arith.constant 0 : i32
    %c0_i32_0 = arith.constant 0 : i32
    %c0_i32_1 = arith.constant 0 : i32
    return %c0_i32, %c0_i32_0 : i32, i32
  }
  func.func @transform_15(%arg0: i32) -> (i32, i32) {
    %c0_i32 = arith.constant 0 : i32
    %c0_i32_0 = arith.constant 0 : i32
    return %arg0, %c0_i32 : i32, i32
  }
}

</mosaic_0001>

<bundles_post_ra>
// kernel: tpu_custom_call.1
= control target key start
LH: loop header
LB: loop body
LE: loop exit
PB: predicated region body
PF: predicated region fallthrough
CT: control target
= control target key end

     0   :  { %20 = vsyncpa [#allocation3], 0  ;;  %s5985_s0 = inlined_call_operand.hbm [shape: f32[2,8,32], index: 0, kind: input, shape index: {}]   ;;  %s5986_s1 = inlined_call_operand.hbm [shape: f32[2,1,32], index: 1, kind: input, shape index: {}]   ;;  %s5987_s2 = inlined_call_operand.hbm [shape: f32[2,1,32], index: 2, kind: input, shape index: {}]   ;;  %s5988_s3 = inlined_call_operand.hbm [shape: f32[2,32,192], index: 3, kind: input, shape index: {}]   ;;  %s5989_s4 = inlined_call_operand.hbm [shape: f32[2,64,32], index: 4, kind: input, shape index: {}]   ;;  %s5990_s5 = inlined_call_operand.hbm [shape: f32[2,1,32], index: 5, kind: input, shape index: {}]   ;;  %s5991_s6 = inlined_call_operand.hbm [shape: f32[2,1,32], index: 6, kind: input, shape index: {}]   ;;  %s5992_s7 = inlined_call_operand.hbm [shape: f32[2,32,256], index: 7, kind: input, shape index: {}]   ;;  %s5993_s8 = inlined_call_operand.hbm [shape: f32[2,1,256], index: 8, kind: input, shape index: {}]   ;;  %s5994_s9 = inlined_call_operand.hbm [shape: f32[2,128,32], index: 9, kind: input, shape index: {}]   ;;  %s5995_s10 = inlined_call_operand.hbm [shape: f32[2,1,32], index: 10, kind: input, shape index: {}]   ;;  %s5996_s11 = inlined_call_operand.hbm [shape: f32[1,32], index: 11, kind: input, shape index: {}]   ;;  %s5997_s12 = inlined_call_operand.hbm [shape: f32[1,32], index: 12, kind: input, shape index: {}]   ;;  %s5998_s13 = inlined_call_operand.hbm [shape: f32[32,2], index: 13, kind: input, shape index: {}]   ;;  %s5999_s14 = inlined_call_operand.hbm [shape: f32[1,2], index: 14, kind: input, shape index: {}]   ;;  %s6000_s15 = inlined_call_operand.hbm [shape: f32[2,2], index: 15, kind: output, shape index: {}]  }
   0x1   :  { %21 = vsyncpa [#allocation6], 0 }
   0x2   :  { %22 = vsyncpa [#allocation9], 0 }
   0x3   :  { %23 = vsyncpa [#allocation12], 0 }
   0x4   :  { %24 = vsyncpa [#allocation15], 0 }
   0x5   :  { %25 = vsyncpa [#allocation18], 0 }
   0x6   :  { %26 = vsyncpa [#allocation21], 0 }
   0x7   :  { %27 = vsyncpa [#allocation24], 0 }
   0x8   :  { %28 = vsyncpa [#allocation4], 0  ;;  %s5204_s18 = smov [#allocation5]   ;;  %s4834_s22 = scalar_lea.hbm %s5986_s1, 32 }
   0x9   :  { %s46_s19 = sshll.u32 %s5204_s18, 4  ;;  %p4835_p0 = scmp.ne.s32.totalorder %s5986_s1, %s4834_s22  ;;  %s47_s19 = int_to_ptr.vmem [resolvable:$true] %s46_s19 }
   0xa   :  { %p4838_p1 = scmp.lt.u32.totalorder %s4834_s22, %s5986_s1 }
   0xc   :  { %p4840_p2 = pnand %p4838_p1, %p4835_p0 }
   0xe   :  { %4843 = shalt.err (!%p4840_p2)
}
   0xf   :  { %s4844_s27 = scalar_lea.vmem %s47_s19, 32  ;;  %p4849_p4 = scmp.lt.s32.totalorder %s47_s19, %s47_s19 }
  0x10   :  { %p4845_p3 = scmp.ne.s32.totalorder %s47_s19, %s4844_s27  ;;  %p4850_p5 = scmp.lt.s32.totalorder %s4844_s27, %s4844_s27 }
  0x12   :  { %p4851_p6 = por %p4850_p5, %p4849_p4 }
  0x14   :  { %p4852_p7 = pnand %p4851_p6, %p4845_p3 }
  0x16   :  { %4855 = shalt.err (!%p4852_p7)
}
  0x17   :  { %s5205_s28 = smov 16   ;;  %s6001_s29 = smov 1  }
  0x18   :  { %52 = dma.hbm_to_vmem [thread:$0]  %s5986_s1, 32, %s47_s19, [#allocation6], %s5205_s28, %s5205_s28, %s6001_s29  }
  0x19   :  { %s5207_s17 = smov [#allocation8]   ;;  %s4856_s22 = scalar_lea.hbm %s5988_s3, 2048 }
  0x1a   :  { %s70_s18 = sshll.u32 %s5207_s17, 4  ;;  %p4857_p8 = scmp.ne.s32.totalorder %s5988_s3, %s4856_s22  ;;  %s71_s18 = int_to_ptr.vmem [resolvable:$true] %s70_s18 }
  0x1b   :  { %p4860_p9 = scmp.lt.u32.totalorder %s4856_s22, %s5988_s3 }
  0x1d   :  { %p4862_p10 = pnand %p4860_p9, %p4857_p8 }
  0x1f   :  { %4865 = shalt.err (!%p4862_p10)
}
  0x20   :  { %s4866_s27 = scalar_lea.vmem %s71_s18, 2048  ;;  %p4871_p12 = scmp.lt.s32.totalorder %s71_s18, %s71_s18 }
  0x21   :  { %p4867_p11 = scmp.ne.s32.totalorder %s71_s18, %s4866_s27  ;;  %p4872_p13 = scmp.lt.s32.totalorder %s4866_s27, %s4866_s27 }
  0x23   :  { %p4873_p0 = por %p4872_p13, %p4871_p12 }
  0x25   :  { %p4874_p1 = pnand %p4873_p0, %p4867_p11 }
  0x27   :  { %4877 = shalt.err (!%p4874_p1)
}
  0x28   :  { %s5208_s1 = smov 256   ;;  %s5209_s16 = smov [#allocation11]  }
  0x29   :  { %76 = dma.hbm_to_vmem [thread:$0]  %s5988_s3, 2048, %s71_s18, [#allocation9], %s5208_s1, %s5208_s1, %s5205_s28  }
  0x2a   :  { %s94_s17 = sshll.u32 %s5209_s16, 4  ;;  %s5210_s20 = smov [#allocation14]   ;;  %s95_s17 = int_to_ptr.vmem [resolvable:$true] %s94_s17 }
  0x2b   :  { %s118_s21 = sshll.u32 %s5210_s20, 4  ;;  %s4878_s24 = scalar_lea.hbm %s5990_s5, 32  ;;  %s119_s21 = int_to_ptr.vmem [resolvable:$true] %s118_s21 }
  0x2c   :  { %p4879_p2 = scmp.ne.s32.totalorder %s5990_s5, %s4878_s24  ;;  %p4882_p3 = scmp.lt.u32.totalorder %s4878_s24, %s5990_s5 }
  0x2e   :  { %p4884_p4 = pnand %p4882_p3, %p4879_p2 }
  0x30   :  { %4887 = shalt.err (!%p4884_p4)
}
  0x31   :  { %s4888_s3 = scalar_lea.vmem %s95_s17, 32  ;;  %p4893_p6 = scmp.lt.s32.totalorder %s95_s17, %s95_s17 }
  0x32   :  { %p4889_p5 = scmp.ne.s32.totalorder %s95_s17, %s4888_s3  ;;  %p4894_p7 = scmp.lt.s32.totalorder %s4888_s3, %s4888_s3 }
  0x34   :  { %p4895_p8 = por %p4894_p7, %p4893_p6 }
  0x36   :  { %p4896_p9 = pnand %p4895_p8, %p4889_p5 }
  0x38   :  { %4899 = shalt.err (!%p4896_p9)
}
  0x39   :  { %s6003_s18 = smov 1   ;;  %s4900_s20 = scalar_lea.hbm %s5992_s7, 2048 }
  0x3a   :  { %100 = dma.hbm_to_vmem [thread:$0]  %s5990_s5, 32, %s95_s17, [#allocation12], %s5205_s28, %s5205_s28, %s6003_s18  }
  0x3b   :  { %p4901_p10 = scmp.ne.s32.totalorder %s5992_s7, %s4900_s20  ;;  %p4904_p11 = scmp.lt.u32.totalorder %s4900_s20, %s5992_s7 }
  0x3d   :  { %p4906_p12 = pnand %p4904_p11, %p4901_p10 }
  0x3f   :  { %4909 = shalt.err (!%p4906_p12)
}
  0x40   :  { %s4910_s26 = scalar_lea.vmem %s119_s21, 2048  ;;  %p4915_p0 = scmp.lt.s32.totalorder %s119_s21, %s119_s21 }
  0x41   :  { %p4911_p13 = scmp.ne.s32.totalorder %s119_s21, %s4910_s26  ;;  %p4916_p1 = scmp.lt.s32.totalorder %s4910_s26, %s4910_s26 }
  0x43   :  { %p4917_p2 = por %p4916_p1, %p4915_p0 }
  0x45   :  { %p4918_p3 = pnand %p4917_p2, %p4911_p13 }
  0x47   :  { %4921 = shalt.err (!%p4918_p3)
}
  0x48   :  { %124 = dma.hbm_to_vmem [thread:$0]  %s5992_s7, 2048, %s119_s21, [#allocation15], %s5208_s1, %s5208_s1, %s5205_s28  }
  0x49   :  { %s5211_s27 = smov [#allocation17]   ;;  %s5212_s19 = smov [#allocation20]  }
  0x4a   :  { %s142_s3 = sshll.u32 %s5211_s27, 4  ;;  %s167_s30 = sshll.u32 %s5212_s19, 4  ;;  %s143_s3 = int_to_ptr.vmem [resolvable:$true] %s142_s3  ;;  %s168_s30 = int_to_ptr.vmem [resolvable:$true] %s167_s30 }
  0x4b   :  { %s4922_s20 = scalar_lea.hbm %s5994_s9, 4096 }
  0x4c   :  { %p4923_p4 = scmp.ne.s32.totalorder %s5994_s9, %s4922_s20  ;;  %p4926_p5 = scmp.lt.u32.totalorder %s4922_s20, %s5994_s9 }
  0x4e   :  { %p4928_p6 = pnand %p4926_p5, %p4923_p4 }
  0x50   :  { %4931 = shalt.err (!%p4928_p6)
}
  0x51   :  { %s4932_s7 = scalar_lea.vmem %s143_s3, 4096  ;;  %p4937_p8 = scmp.lt.s32.totalorder %s143_s3, %s143_s3 }
  0x52   :  { %p4933_p7 = scmp.ne.s32.totalorder %s143_s3, %s4932_s7  ;;  %p4938_p9 = scmp.lt.s32.totalorder %s4932_s7, %s4932_s7 }
  0x54   :  { %p4939_p10 = por %p4938_p9, %p4937_p8 }
  0x56   :  { %p4940_p11 = pnand %p4939_p10, %p4933_p7 }
  0x58   :  { %4943 = shalt.err (!%p4940_p11)
}
  0x59   :  { %s5213_s1 = smov 128   ;;  %s5214_s21 = smov 8  }
  0x5a   :  { %148 = dma.hbm_to_vmem [thread:$0]  %s5994_s9, 4096, %s143_s3, [#allocation18], %s5213_s1, %s5213_s1, %s5214_s21  }
  0x5b   :  { %s4944_s19 = scalar_lea.hbm %s5996_s11, 16 }
  0x5c   :  { %p4945_p12 = scmp.ne.s32.totalorder %s5996_s11, %s4944_s19  ;;  %p4948_p13 = scmp.lt.u32.totalorder %s4944_s19, %s5996_s11 }
  0x5e   :  { %p4950_p0 = pnand %p4948_p13, %p4945_p12 }
  0x60   :  { %4953 = shalt.err (!%p4950_p0)
}
  0x61   :  { %s4954_s23 = scalar_lea.vmem %s168_s30, 16  ;;  %s4958_s24 = scalar_lea.vmem %s168_s30, 32 }
  0x62   :  { %p4955_p1 = scmp.ne.s32.totalorder %s168_s30, %s4954_s23  ;;  %p4959_p2 = scmp.lt.s32.totalorder %s168_s30, %s168_s30 }
  0x63   :  { %p4960_p3 = scmp.lt.s32.totalorder %s4958_s24, %s4954_s23 }
  0x65   :  { %p4961_p4 = por %p4960_p3, %p4959_p2 }
  0x67   :  { %p4962_p5 = pnand %p4961_p4, %p4955_p1 }
  0x69   :  { %4965 = shalt.err (!%p4962_p5)
}
  0x6a   :  { %170 = dma.hbm_to_vmem [thread:$0]  %s5996_s11, 16, %s168_s30, [#allocation21]  }
  0x6b   :  { %s5215_s25 = smov [#allocation23]   ;;  %s5216_s26 = smov [#allocation2]  }
  0x6c   :  { %s186_s7 = sshll.u32 %s5215_s25, 4  ;;  %s34_s5 = sshll.u32 %s5216_s26, 4  ;;  %s187_s7 = int_to_ptr.vmem [resolvable:$true] %s186_s7  ;;  %s35_s5 = int_to_ptr.vmem [resolvable:$true] %s34_s5 }
  0x6d   :  { %s4966_s19 = scalar_lea.hbm %s5998_s13, 512 }
  0x6e   :  { %p4967_p6 = scmp.ne.s32.totalorder %s5998_s13, %s4966_s19  ;;  %p4970_p7 = scmp.lt.u32.totalorder %s4966_s19, %s5998_s13 }
  0x70   :  { %p4972_p8 = pnand %p4970_p7, %p4967_p6 }
  0x72   :  { %4975 = shalt.err (!%p4972_p8)
}
  0x73   :  { %s4976_s11 = scalar_lea.vmem %s187_s7, 512  ;;  %p4981_p10 = scmp.lt.s32.totalorder %s187_s7, %s187_s7 }
  0x74   :  { %p4977_p9 = scmp.ne.s32.totalorder %s187_s7, %s4976_s11  ;;  %p4982_p11 = scmp.lt.s32.totalorder %s4976_s11, %s4976_s11 }
  0x76   :  { %p4983_p12 = por %p4982_p11, %p4981_p10 }
  0x78   :  { %p4984_p13 = pnand %p4983_p12, %p4977_p9 }
  0x7a   :  { %4987 = shalt.err (!%p4984_p13)
}
  0x7b   :  { %192 = dma.hbm_to_vmem [thread:$0]  %s5998_s13, 512, %s187_s7, [#allocation24], %s5213_s1, %s5213_s1, %s5214_s21  }
  0x7c   :  { %s4988_s3 = scalar_lea.hbm %s5985_s0, 256 }
  0x7d   :  { %p4989_p0 = scmp.ne.s32.totalorder %s5985_s0, %s4988_s3  ;;  %p4992_p1 = scmp.lt.u32.totalorder %s4988_s3, %s5985_s0 }
  0x7f   :  { %p4994_p2 = pnand %p4992_p1, %p4989_p0 }
  0x81   :  { %4997 = shalt.err (!%p4994_p2)
}
  0x82   :  { %s4998_s19 = scalar_lea.vmem %s35_s5, 256  ;;  %p5003_p4 = scmp.lt.s32.totalorder %s35_s5, %s35_s5 }
  0x83   :  { %p4999_p3 = scmp.ne.s32.totalorder %s35_s5, %s4998_s19  ;;  %p5004_p5 = scmp.lt.s32.totalorder %s4998_s19, %s4998_s19 }
  0x85   :  { %p5005_p6 = por %p5004_p5, %p5003_p4 }
  0x87   :  { %p5006_p7 = pnand %p5005_p6, %p4999_p3 }
  0x89   :  { %5009 = shalt.err (!%p5006_p7)
}
  0x8a   :  { %40 = dma.hbm_to_vmem [thread:$0]  %s5985_s0, 256, %s35_s5, [#allocation3], %s5213_s1, %s5213_s1, %s5214_s21  }
  0x8b   :  { %s5217_s16 = smov [#allocation7]   ;;  %s5218_s20 = smov [#allocation10]  }
  0x8c   :  { %s58_s29 = sshll.u32 %s5217_s16, 4  ;;  %s82_s22 = sshll.u32 %s5218_s20, 4  ;;  %s59_s29 = int_to_ptr.vmem [resolvable:$true] %s58_s29  ;;  %s83_s22 = int_to_ptr.vmem [resolvable:$true] %s82_s22 }
  0x8d   :  { %s5010_s23 = scalar_lea.hbm %s5987_s2, 32 }
  0x8e   :  { %p5011_p8 = scmp.ne.s32.totalorder %s5987_s2, %s5010_s23  ;;  %p5014_p9 = scmp.lt.u32.totalorder %s5010_s23, %s5987_s2 }
  0x90   :  { %p5016_p10 = pnand %p5014_p9, %p5011_p8 }
  0x92   :  { %5019 = shalt.err (!%p5016_p10)
}
  0x93   :  { %s5020_s0 = scalar_lea.vmem %s59_s29, 32  ;;  %p5025_p12 = scmp.lt.s32.totalorder %s59_s29, %s59_s29 }
  0x94   :  { %p5021_p11 = scmp.ne.s32.totalorder %s59_s29, %s5020_s0  ;;  %p5026_p13 = scmp.lt.s32.totalorder %s5020_s0, %s5020_s0 }
  0x96   :  { %p5027_p0 = por %p5026_p13, %p5025_p12 }
  0x98   :  { %p5028_p1 = pnand %p5027_p0, %p5021_p11 }
  0x9a   :  { %5031 = shalt.err (!%p5028_p1)
}
  0x9b   :  { %64 = dma.hbm_to_vmem [thread:$0]  %s5987_s2, 32, %s59_s29, [#allocation6], %s5205_s28, %s5205_s28, %s6003_s18  }
  0x9c   :  { %s5032_s19 = scalar_lea.hbm %s5989_s4, 2048 }
  0x9d   :  { %p5033_p2 = scmp.ne.s32.totalorder %s5989_s4, %s5032_s19  ;;  %p5036_p3 = scmp.lt.u32.totalorder %s5032_s19, %s5989_s4 }
  0x9f   :  { %p5038_p4 = pnand %p5036_p3, %p5033_p2 }
  0xa1   :  { %5041 = shalt.err (!%p5038_p4)
}
  0xa2   :  { %s5042_s11 = scalar_lea.vmem %s83_s22, 2048  ;;  %p5047_p6 = scmp.lt.s32.totalorder %s83_s22, %s83_s22 }
  0xa3   :  { %p5043_p5 = scmp.ne.s32.totalorder %s83_s22, %s5042_s11  ;;  %p5048_p7 = scmp.lt.s32.totalorder %s5042_s11, %s5042_s11 }
  0xa5   :  { %p5049_p8 = por %p5048_p7, %p5047_p6 }
  0xa7   :  { %p5050_p9 = pnand %p5049_p8, %p5043_p5 }
  0xa9   :  { %5053 = shalt.err (!%p5050_p9)
}
  0xaa   :  { %88 = dma.hbm_to_vmem [thread:$0]  %s5989_s4, 2048, %s83_s22, [#allocation9], %s5213_s1, %s5213_s1, %s5214_s21  }
  0xab   :  { %s5219_s30 = smov [#allocation13]   ;;  %s5220_s24 = smov [#allocation16]  }
  0xac   :  { %s106_s23 = sshll.u32 %s5219_s30, 4  ;;  %s130_s9 = sshll.u32 %s5220_s24, 4  ;;  %s107_s23 = int_to_ptr.vmem [resolvable:$true] %s106_s23  ;;  %s131_s9 = int_to_ptr.vmem [resolvable:$true] %s130_s9 }
  0xad   :  { %s5054_s0 = scalar_lea.hbm %s5991_s6, 32 }
  0xae   :  { %p5055_p10 = scmp.ne.s32.totalorder %s5991_s6, %s5054_s0  ;;  %p5058_p11 = scmp.lt.u32.totalorder %s5054_s0, %s5991_s6 }
  0xb0   :  { %p5060_p12 = pnand %p5058_p11, %p5055_p10 }
  0xb2   :  { %5063 = shalt.err (!%p5060_p12)
}
  0xb3   :  { %s5064_s4 = scalar_lea.vmem %s107_s23, 32  ;;  %p5069_p0 = scmp.lt.s32.totalorder %s107_s23, %s107_s23 }
  0xb4   :  { %p5065_p13 = scmp.ne.s32.totalorder %s107_s23, %s5064_s4  ;;  %p5070_p1 = scmp.lt.s32.totalorder %s5064_s4, %s5064_s4 }
  0xb6   :  { %p5071_p2 = por %p5070_p1, %p5069_p0 }
  0xb8   :  { %p5072_p3 = pnand %p5071_p2, %p5065_p13 }
  0xba   :  { %5075 = shalt.err (!%p5072_p3)
}
  0xbb   :  { %112 = dma.hbm_to_vmem [thread:$0]  %s5991_s6, 32, %s107_s23, [#allocation12], %s5205_s28, %s5205_s28, %s6003_s18  }
  0xbc   :  { %s5076_s13 = scalar_lea.hbm %s5993_s8, 64 }
  0xbd   :  { %p5077_p4 = scmp.ne.s32.totalorder %s5993_s8, %s5076_s13  ;;  %p5080_p5 = scmp.lt.u32.totalorder %s5076_s13, %s5993_s8 }
  0xbf   :  { %p5082_p6 = pnand %p5080_p5, %p5077_p4 }
  0xc1   :  { %5085 = shalt.err (!%p5082_p6)
}
  0xc2   :  { %s5086_s2 = scalar_lea.vmem %s131_s9, 64  ;;  %p5091_p8 = scmp.lt.s32.totalorder %s131_s9, %s131_s9 }
  0xc3   :  { %p5087_p7 = scmp.ne.s32.totalorder %s131_s9, %s5086_s2  ;;  %p5092_p9 = scmp.lt.s32.totalorder %s5086_s2, %s5086_s2 }
  0xc5   :  { %p5093_p10 = por %p5092_p9, %p5091_p8 }
  0xc7   :  { %p5094_p11 = pnand %p5093_p10, %p5087_p7 }
  0xc9   :  { %5097 = shalt.err (!%p5094_p11)
}
  0xca   :  { %s5221_s6 = smov 32   ;;  %s5222_s29 = smov 2  }
  0xcb   :  { %136 = dma.hbm_to_vmem [thread:$0]  %s5993_s8, 64, %s131_s9, [#allocation15], %s5221_s6, %s5221_s6, %s5222_s29  }
  0xcc   :  { %s5223_s24 = smov [#allocation19]   ;;  %s5224_s25 = smov [#allocation22]  }
  0xcd   :  { %s154_s3 = sshll.u32 %s5223_s24, 4  ;;  %s177_s0 = sshll.u32 %s5224_s25, 4  ;;  %s155_s3 = int_to_ptr.vmem [resolvable:$true] %s154_s3  ;;  %s178_s0 = int_to_ptr.vmem [resolvable:$true] %s177_s0 }
  0xce   :  { %s5098_s17 = scalar_lea.hbm %s5995_s10, 32 }
  0xcf   :  { %p5099_p12 = scmp.ne.s32.totalorder %s5995_s10, %s5098_s17  ;;  %p5102_p13 = scmp.lt.u32.totalorder %s5098_s17, %s5995_s10 }
  0xd1   :  { %p5104_p0 = pnand %p5102_p13, %p5099_p12 }
  0xd3   :  { %5107 = shalt.err (!%p5104_p0)
}
  0xd4   :  { %s5108_s8 = scalar_lea.vmem %s155_s3, 32  ;;  %p5113_p2 = scmp.lt.s32.totalorder %s155_s3, %s155_s3 }
  0xd5   :  { %p5109_p1 = scmp.ne.s32.totalorder %s155_s3, %s5108_s8  ;;  %p5114_p3 = scmp.lt.s32.totalorder %s5108_s8, %s5108_s8 }
  0xd7   :  { %p5115_p4 = por %p5114_p3, %p5113_p2 }
  0xd9   :  { %p5116_p5 = pnand %p5115_p4, %p5109_p1 }
  0xdb   :  { %5119 = shalt.err (!%p5116_p5)
}
  0xdc   :  { %160 = dma.hbm_to_vmem [thread:$0]  %s5995_s10, 32, %s155_s3, [#allocation18], %s5205_s28, %s5205_s28, %s6003_s18  }
  0xdd   :  { %s5120_s7 = scalar_lea.hbm %s5997_s12, 16 }
  0xde   :  { %p5121_p6 = scmp.ne.s32.totalorder %s5997_s12, %s5120_s7  ;;  %p5124_p7 = scmp.lt.u32.totalorder %s5120_s7, %s5997_s12 }
  0xe0   :  { %p5126_p8 = pnand %p5124_p7, %p5121_p6 }
  0xe2   :  { %5129 = shalt.err (!%p5126_p8)
}
  0xe3   :  { %s5130_s29 = scalar_lea.vmem %s178_s0, 16  ;;  %s5134_s30 = scalar_lea.vmem %s178_s0, 32 }
  0xe4   :  { %p5131_p9 = scmp.ne.s32.totalorder %s178_s0, %s5130_s29  ;;  %p5135_p10 = scmp.lt.s32.totalorder %s178_s0, %s178_s0 }
  0xe5   :  { %p5136_p11 = scmp.lt.s32.totalorder %s5134_s30, %s5130_s29 }
  0xe7   :  { %p5137_p12 = por %p5136_p11, %p5135_p10 }
  0xe9   :  { %p5138_p13 = pnand %p5137_p12, %p5131_p9 }
  0xeb   :  { %5141 = shalt.err (!%p5138_p13)
}
  0xec   :  { %180 = dma.hbm_to_vmem [thread:$0]  %s5997_s12, 16, %s178_s0, [#allocation21]  }
  0xed   :  { %s5225_s23 = smov [#allocation25]   ;;  %s5142_s5 = scalar_lea.hbm %s5999_s14, 16 }
  0xee   :  { %s199_s24 = sshll.u32 %s5225_s23, 4  ;;  %p5143_p0 = scmp.ne.s32.totalorder %s5999_s14, %s5142_s5  ;;  %s200_s24 = int_to_ptr.vmem [resolvable:$true] %s199_s24 }
  0xef   :  { %p5146_p1 = scmp.lt.u32.totalorder %s5142_s5, %s5999_s14 }
  0xf1   :  { %p5148_p2 = pnand %p5146_p1, %p5143_p0 }
  0xf3   :  { %5151 = shalt.err (!%p5148_p2)
}
  0xf4   :  { %s5152_s1 = scalar_lea.vmem %s200_s24, 16  ;;  %s5156_s12 = scalar_lea.vmem %s200_s24, 32 }
  0xf5   :  { %p5153_p3 = scmp.ne.s32.totalorder %s200_s24, %s5152_s1  ;;  %p5157_p4 = scmp.lt.s32.totalorder %s200_s24, %s200_s24 }
  0xf6   :  { %p5158_p5 = scmp.lt.s32.totalorder %s5156_s12, %s5152_s1 }
  0xf8   :  { %p5159_p6 = por %p5158_p5, %p5157_p4 }
  0xfa   :  { %p5160_p7 = pnand %p5159_p6, %p5153_p3 }
  0xfc   :  { %5163 = shalt.err (!%p5160_p7)
}
  0xfd   :  { %202 = dma.hbm_to_vmem [thread:$0]  %s5999_s14, 16, %s200_s24, [#allocation24]  }
  0xfe   :  { %5186 = dma.done.wait [#allocation3], 256  }
  0xff   :  { %5187 = vsyncadd [#allocation3], 4294967040 }
 0x100   :  { %5188 = dma.done.wait [#allocation6], 64  }
 0x101   :  { %5189 = vsyncadd [#allocation6], 4294967232 }
 0x102   :  { %5190 = dma.done.wait [#allocation9], 4096  }
 0x103   :  { %5191 = vsyncadd [#allocation9], 4294963200 }
 0x104   :  { %5192 = dma.done.wait [#allocation12], 64  }
 0x105   :  { %5193 = vsyncadd [#allocation12], 4294967232 }
 0x106   :  { %5194 = dma.done.wait [#allocation15], 2112  }
 0x107   :  { %5195 = vsyncadd [#allocation15], 4294965184 }
 0x108   :  { %5196 = dma.done.wait [#allocation18], 4128  }
 0x109   :  { %5197 = vsyncadd [#allocation18], 4294963168 }
 0x10a   :  { %5198 = dma.done.wait [#allocation21], 32  }
 0x10b   :  { %5199 = vsyncadd [#allocation21], 4294967264 }
 0x10c   :  { %5200 = dma.done.wait [#allocation24], 528  }
 0x10d   :  { %5201 = vsyncadd [#allocation24], 4294966768  ;;  %vm256_vm0 = vcmask 261120   ;;  %v5531_v0 = vld [vmem:[#allocation2] sm:$0xff]  ;;  %v5533_v1 = vld [vmem:[#allocation2 + $0x8] sm:$0xff]  ;;  %v5226_v21 = vmov 0.0   ;;  %v250_v49 = vlaneseq }
 0x10e   :  { %v257_v2 = vsel %vm256_vm0, %v5531_v0, 0.0  ;;  %v260_v3 = vsel %vm256_vm0, %v5533_v1, 0.0  ;;  %v301_v14 = vld [vmem:[#allocation8 + $0x8] sm:$0xff]  ;;  %v303_v15 = vld [vmem:[#allocation8 + $0x18] sm:$0xff]  ;;  %v300_v16 = vld [vmem:[#allocation8] sm:$0xff]  ;;  %378 = vmatprep.mubr.f32.mxu0 %v5226_v21  ;;  %4299 = vmatprep.subr.mxu1 %v5226_v21  ;;  %vm5227_vm1 = vmmov 0  }
 0x10f   :  { %258 = vadd.xlane.f32.xlu0 %v257_v2  ;;  %v4578_v17 = vpack.c.bf16 %v303_v15, %v301_v14  ;;  %v302_v18 = vld [vmem:[#allocation8 + $0x10] sm:$0xff]  ;;  %v305_v19 = vld [vmem:[#allocation8 + $0x28] sm:$0xff]  ;;  %v307_v20 = vld [vmem:[#allocation8 + $0x38] sm:$0xff]  ;;  %4301 = vmatprep.mubr.msk.f32.mxu1 %vm5227_vm1, %v5226_v21  ;;  %s5228_s14 = smov 64   ;;  %vm394_vm2 = vcmask 130048   ;;  %v251_v50 = vand.u32 127, %v250_v49 }
 0x110   :  { %v4580_v22 = vpack.c.bf16 %v302_v18, %v300_v16  ;;  %v4582_v23 = vpack.c.bf16 %v307_v20, %v305_v19  ;;  %v304_v24 = vld [vmem:[#allocation8 + $0x20] sm:$0xff]  ;;  %v306_v25 = vld [vmem:[#allocation8 + $0x30] sm:$0xff]  ;;  %v4100_v34 = vld [vmem:[#allocation5] ss:$0 sm:$0xff]  ;;  %v5229_v51 = vmov -1e+30  }
 0x111   :  { %4579 = vmatprep.subr.bf16.mxu0 %v4578_v17  ;;  %v4584_v26 = vpack.c.bf16 %v306_v25, %v304_v24  ;;  %v4101_v36 = vld [vmem:[#allocation7] ss:$0 sm:$0xff]  ;;  %vm252_vm3 = vcmp.lt.s32.totalorder %v251_v50, 7  ;;  %vm546_vm4 = vcmask 64512   ;;  %s5230_s8 = smov 48   ;;  %s5231_s9 = smov 112  }
 0x112   :  { %4581 = vmatpush1.bf16.msra.mxu0 %v4580_v22  ;;  %v5582_v52 = vsel %vm252_vm3, 0.0, %v5229_v51  ;;  %s5232_s22 = smov 96   ;;  %s5233_s19 = smov 80   ;;  %vm1735_vm5 = vcmask 392192   ;;  %vm1746_vm6 = vcmask 523264   ;;  %vm3938_vm7 = vcmask 1041409  }
 0x113   :  { %261 = vadd.xlane.f32.xlu0 %v260_v3  ;;  %4583 = vmatprep.subr.bf16.mxu0 %v4582_v23  ;;  %vm3941_vm8 = vcmask 254976   ;;  %vm4076_vm9 = vcmask 9216  }
 0x116   :  { %4585 = vmatpush1.bf16.msra.mxu0 %v4584_v26 }
 0x117   :  { %4314 = vmatprep.subr.mxu0 %v5226_v21 }
 0x19c   :  { %v259_v4 = vpop.xlane.xlu0 %258 }
 0x19d   :  { %v264_v5 = vmul.f32 0.03125, %v259_v4 }
 0x19f   :  { %v266_v6 = vsub.f32 %v5531_v0, %v264_v5 }
 0x1a0   :  { %v262_v7 = vpop.xlane.xlu0 %261 }
 0x1a1   :  { %v265_v8 = vmul.f32 0.03125, %v262_v7  ;;  %v268_v9 = vmul.f32 %v266_v6, %v266_v6 }
 0x1a3   :  { %v267_v10 = vsub.f32 %v5533_v1, %v265_v8  ;;  %v270_v11 = vsel %vm256_vm0, %v268_v9, 0.0 }
 0x1a4   :  { %271 = vadd.xlane.f32.xlu1 %v270_v11 }
 0x1a5   :  { %v269_v12 = vmul.f32 %v267_v10, %v267_v10 }
 0x1a7   :  { %v273_v13 = vsel %vm256_vm0, %v269_v12, 0.0 }
 0x1a8   :  { %274 = vadd.xlane.f32.xlu1 %v273_v13 }
 0x231   :  { %v272_v27 = vpop.xlane.xlu1 %271 }
 0x232   :  { %v276_v28 = vmul.f32 0.03125, %v272_v27 }
 0x234   :  { %v278_v29 = vadd.f32 1e-05, %v276_v28 }
 0x235   :  { %v275_v30 = vpop.xlane.xlu1 %274 }
 0x236   :  { %4744 = vrsqrt.f32 %v278_v29  ;;  %v277_v31 = vmul.f32 0.03125, %v275_v30 }
 0x238   :  { %v279_v32 = vadd.f32 1e-05, %v277_v31 }
 0x23a   :  { %4746 = vrsqrt.f32 %v279_v32 }
 0x240   :  { %v4745_v33 = vpop.eup %4744 }
 0x241   :  { %v282_v35 = vmul.f32 %v4745_v33, %v266_v6 }
 0x243   :  { %v290_v37 = vmul.f32 %v4100_v34, %v282_v35 }
 0x244   :  { %v4747_v38 = vpop.eup %4746 }
 0x245   :  { %v298_v39 = vadd.f32 %v4101_v36, %v290_v37  ;;  %v283_v40 = vmul.f32 %v4747_v38, %v267_v10 }
 0x247   :  { %4102 = vmatmul.mubr.msk.f32.vlgmr.msra.gmra.mrb[0].mxu0 %vm256_vm0, %v298_v39  ;;  %v291_v41 = vmul.f32 %v4100_v34, %v283_v40 }
 0x248   :  { %384 = vmatprep.mubr.f32.mxu0 %v5226_v21 }
 0x249   :  { %v299_v42 = vadd.f32 %v4101_v36, %v291_v41 }
 0x24b   :  { %4103 = vmatmul.mubr.msk.f32.gmra.mrb[2].mxu0 %vm256_vm0, %v299_v42 }
 0x24c   :  { %4316 = vmatprep.mubr.msk.f32.mxu0 %vm5227_vm1, %v5226_v21 }
 0x31a   :  { %v5553_v43 = vpop.f32.mrb[0].mxu0 }
 0x31b   :  { %392 = vrot.lane.b32.xlu0 %v5553_v43, %s5228_s14  ;;  %v5557_v44 = vpop.f32.mrb[1].mxu0 }
 0x31e   :  { %v5559_v45 = vpop.f32.mrb[2].mxu0 }
 0x31f   :  { %470 = vrot.lane.b32.xlu1 %v5559_v45, %s5228_s14  ;;  %v5563_v46 = vpop.f32.mrb[3].mxu0 }
 0x320   :  { %4315 = vmatpush3.msra.mxu0 %v5563_v46 }
 0x321   :  { %4324 = vmatprep.subr.mxu0 %v5226_v21 }
 0x38d   :  { %v393_v47 = vpop.permute.xlu0 %392 }
 0x38e   :  { %4300 = vmatpush3.xpose.msk.msra.mxu1 %vm394_vm2, %v393_v47 }
 0x38f   :  { %4304 = vmatprep.subr.mxu1 %v5226_v21 }
 0x391   :  { %v471_v48 = vpop.permute.xlu1 %470  ;;  %4302 = vmatmul.mubr.msk.f32.vlgmr.msra.gmra.mrb[0].mxu1 %vm394_vm2, %v5553_v43 }
 0x392   :  { %4305 = vmatpush3.xpose.msk.msra.mxu1 %vm394_vm2, %v471_v48  ;;  %4306 = vmatprep.mubr.msk.f32.mxu1 %vm5227_vm1, %v5226_v21 }
 0x393   :  { %4309 = vmatprep.subr.mxu1 %v5226_v21 }
 0x395   :  { %4307 = vmatmul.mubr.msk.f32.vlgmr.msra.gmra.mrb[2].mxu1 %vm394_vm2, %v5559_v45 }
 0x396   :  { %4310 = vmatpush3.msra.mxu1 %v5557_v44  ;;  %4311 = vmatprep.mubr.msk.f32.mxu1 %vm5227_vm1, %v5226_v21 }
 0x397   :  { %4319 = vmatprep.subr.mxu1 %v5226_v21 }
 0x464   :  { %v465_v53 = vpop.f32.mrb[0].mxu1 }
 0x465   :  { %v466_v54 = vadd.f32 %v465_v53, %v5582_v52  ;;  %v4303_v55 = vpop.f32.mrb[1].mxu1 }
 0x467   :  { %v547_v56 = vsel %vm546_vm4, %v466_v54, -inf }
 0x468   :  { %548 = vmax.xlane.f32.xlu1 %v547_v56  ;;  %v542_v57 = vpop.f32.mrb[2].mxu1 }
 0x469   :  { %v543_v58 = vadd.f32 %v542_v57, %v5582_v52  ;;  %v4308_v59 = vpop.f32.mrb[3].mxu1 }
 0x46b   :  { %v550_v60 = vsel %vm546_vm4, %v543_v58, -inf }
 0x46c   :  { %551 = vmax.xlane.f32.xlu0 %v550_v60 }
 0x479   :  { %795 = vrot.lane.b32.xlu1 %v5559_v45, %s5230_s8 }
 0x47d   :  { %715 = vrot.lane.b32.xlu1 %v5553_v43, %s5231_s9 }
 0x4f5   :  { %v549_v61 = vpop.xlane.xlu1 %548 }
 0x4f6   :  { %v553_v62 = vsub.f32 %v466_v54, %v549_v61 }
 0x4f8   :  { %v555_v63 = vmul.f32 1.442695, %v553_v62 }
 0x4f9   :  { %v552_v2 = vpop.xlane.xlu0 %551  ;;  %v796_v9 = vpop.permute.xlu1 %795 }
 0x4fa   :  { %4748 = vpow2.f32 %v555_v63  ;;  %v554_v3 = vsub.f32 %v543_v58, %v552_v2 }
 0x4fc   :  { %v557_v4 = vmul.f32 1.442695, %v554_v3 }
 0x4fd   :  { %v716_v10 = vpop.permute.xlu1 %715 }
 0x4fe   :  { %4750 = vpow2.f32 %v557_v4 }
 0x504   :  { %v4749_v5 = vpop.eup %4748 }
 0x505   :  { %v559_v6 = vsel %vm546_vm4, %v4749_v5, 0.0 }
 0x506   :  { %560 = vadd.xlane.f32.xlu0 %v559_v6 }
 0x508   :  { %v4751_v7 = vpop.eup %4750 }
 0x509   :  { %v562_v8 = vsel %vm546_vm4, %v4751_v7, 0.0 }
 0x50a   :  { %563 = vadd.xlane.f32.xlu1 %v562_v8 }
 0x51b   :  { %793 = vrot.lane.b32.xlu1 %v5559_v45, %s5231_s9 }
 0x51c   :  { %717 = vrot.lane.b32.xlu0 %v5553_v43, %s5230_s8 }
 0x593   :  { %v561_v11 = vpop.xlane.xlu0 %560 }
 0x594   :  { %4752 = vrcp.f32 %v561_v11 }
 0x597   :  { %v564_v12 = vpop.xlane.xlu1 %563  ;;  %v718_v15 = vpop.permute.xlu0 %717 }
 0x598   :  { %4754 = vrcp.f32 %v564_v12 }
 0x59b   :  { %v794_v18 = vpop.permute.xlu1 %793 }
 0x59e   :  { %v4753_v13 = vpop.eup %4752 }
 0x59f   :  { %v567_v14 = vmul.f32 %v4753_v13, %v4749_v5 }
 0x5a1   :  { %4312 = vmatmul.mubr.msk.f32.vlgmr.msra.gmra.mrb[4].mxu1 %vm546_vm4, %v567_v14 }
 0x5a2   :  { %v4755_v16 = vpop.eup %4754  ;;  %4320 = vmatpush3.xpose.msk.msra.mxu1 %vm394_vm2, %v718_v15  ;;  %4321 = vmatprep.mubr.msk.f32.mxu1 %vm5227_vm1, %v5226_v21 }
 0x5a3   :  { %v568_v17 = vmul.f32 %v4755_v16, %v4751_v7  ;;  %4329 = vmatprep.subr.mxu1 %v5226_v21 }
 0x5a5   :  { %4317 = vmatmul.mubr.msk.f32.vlgmr.msra.gmra.mrb[4].mxu0 %vm546_vm4, %v568_v17  ;;  %4322 = vmatmul.mubr.msk.f32.vlgmr.msra.gmra.mrb[6].mxu1 %vm394_vm2, %v716_v10 }
 0x5a6   :  { %4325 = vmatpush3.xpose.msk.msra.mxu0 %vm394_vm2, %v796_v9  ;;  %4326 = vmatprep.mubr.msk.f32.mxu0 %vm5227_vm1, %v5226_v21 }
 0x5a7   :  { %4334 = vmatprep.subr.mxu0 %v5226_v21  ;;  %4331 = vmatprep.mubr.msk.f32.mxu1 %vm5227_vm1, %v5226_v21 }
 0x5a9   :  { %4327 = vmatmul.mubr.msk.f32.vlgmr.msra.gmra.mrb[6].mxu0 %vm394_vm2, %v794_v18 }
 0x5aa   :  { %4336 = vmatprep.mubr.msk.f32.mxu0 %vm5227_vm1, %v5226_v21 }
 0x674   :  { %v5614_v19 = vpop.f32.mrb[4].mxu1 }
 0x675   :  { %v4313_v20 = vpop.f32.mrb[5].mxu1 }
 0x678   :  { %v5616_v22 = vpop.f32.mrb[4].mxu0  ;;  %v789_v23 = vpop.f32.mrb[6].mxu1 }
 0x679   :  { %v790_v24 = vadd.f32 %v789_v23, %v5582_v52  ;;  %v4318_v25 = vpop.f32.mrb[5].mxu0  ;;  %v4323_v26 = vpop.f32.mrb[7].mxu1 }
 0x67b   :  { %v871_v27 = vsel %vm546_vm4, %v790_v24, -inf }
 0x67c   :  { %v867_v28 = vpop.f32.mrb[6].mxu0  ;;  %872 = vmax.xlane.f32.xlu0 %v871_v27 }
 0x67d   :  { %v868_v29 = vadd.f32 %v867_v28, %v5582_v52  ;;  %v4328_v30 = vpop.f32.mrb[7].mxu0 }
 0x67f   :  { %v874_v31 = vsel %vm546_vm4, %v868_v29, -inf }
 0x680   :  { %875 = vmax.xlane.f32.xlu1 %v874_v31 }
 0x691   :  { %971 = vrot.lane.b32.xlu1 %v5563_v46, %s5231_s9 }
 0x692   :  { %894 = vrot.lane.b32.xlu0 %v5557_v44, %s5231_s9 }
 0x695   :  { %1049 = vrot.lane.b32.xlu1 %v5553_v43, %s5221_s6 }
 0x699   :  { %1127 = vrot.lane.b32.xlu1 %v5559_v45, %s5221_s6 }
 0x69d   :  { %1125 = vrot.lane.b32.xlu1 %v5559_v45, %s5232_s22 }
 0x709   :  { %v873_v32 = vpop.xlane.xlu0 %872 }
 0x70a   :  { %v877_v33 = vsub.f32 %v790_v24, %v873_v32 }
 0x70c   :  { %v879_v34 = vmul.f32 1.442695, %v877_v33 }
 0x70d   :  { %v876_v35 = vpop.xlane.xlu1 %875  ;;  %v895_v36 = vpop.permute.xlu0 %894 }
 0x70e   :  { %4756 = vpow2.f32 %v879_v34  ;;  %v878_v37 = vsub.f32 %v868_v29, %v876_v35  ;;  %4330 = vmatpush3.msra.mxu1 %v895_v36 }
 0x70f   :  { %4339 = vmatprep.subr.mxu1 %v5226_v21 }
 0x710   :  { %v881_v38 = vmul.f32 1.442695, %v878_v37 }
 0x711   :  { %v972_v39 = vpop.permute.xlu1 %971 }
 0x712   :  { %4758 = vpow2.f32 %v881_v38  ;;  %4335 = vmatpush3.msra.mxu0 %v972_v39 }
 0x713   :  { %4344 = vmatprep.subr.mxu0 %v5226_v21 }
 0x715   :  { %v1050_v51 = vpop.permute.xlu1 %1049 }
 0x718   :  { %v4757_v40 = vpop.eup %4756 }
 0x719   :  { %v883_v41 = vsel %vm546_vm4, %v4757_v40, 0.0  ;;  %v1128_v56 = vpop.permute.xlu1 %1127 }
 0x71a   :  { %884 = vadd.xlane.f32.xlu0 %v883_v41 }
 0x71c   :  { %v4759_v42 = vpop.eup %4758 }
 0x71d   :  { %v886_v47 = vsel %vm546_vm4, %v4759_v42, 0.0  ;;  %v1126_v59 = vpop.permute.xlu1 %1125 }
 0x71e   :  { %887 = vadd.xlane.f32.xlu0 %v886_v47 }
 0x734   :  { %1047 = vrot.lane.b32.xlu0 %v5553_v43, %s5232_s22 }
 0x7a7   :  { %v885_v48 = vpop.xlane.xlu0 %884 }
 0x7a8   :  { %4760 = vrcp.f32 %v885_v48 }
 0x7ab   :  { %v888_v50 = vpop.xlane.xlu0 %887 }
 0x7ac   :  { %4762 = vrcp.f32 %v888_v50 }
 0x7af   :  { %v1048_v58 = vpop.permute.xlu0 %1047 }
 0x7b2   :  { %v4761_v53 = vpop.eup %4760 }
 0x7b3   :  { %v891_v54 = vmul.f32 %v4761_v53, %v4757_v40 }
 0x7b5   :  { %4332 = vmatmul.mubr.msk.f32.vlgmr.msra.gmra.mrb[8].mxu1 %vm546_vm4, %v891_v54 }
 0x7b6   :  { %v4763_v55 = vpop.eup %4762  ;;  %4340 = vmatpush3.xpose.msk.msra.mxu1 %vm394_vm2, %v1050_v51  ;;  %4341 = vmatprep.mubr.msk.f32.mxu1 %vm5227_vm1, %v5226_v21 }
 0x7b7   :  { %v892_v57 = vmul.f32 %v4763_v55, %v4759_v42  ;;  %4349 = vmatprep.subr.mxu1 %v5226_v21 }
 0x7b9   :  { %4337 = vmatmul.mubr.msk.f32.vlgmr.msra.gmra.mrb[8].mxu0 %vm546_vm4, %v892_v57  ;;  %4342 = vmatmul.mubr.msk.f32.vlgmr.msra.gmra.mrb[10].mxu1 %vm394_vm2, %v1048_v58 }
 0x7ba   :  { %4345 = vmatpush3.xpose.msk.msra.mxu0 %vm394_vm2, %v1128_v56  ;;  %4346 = vmatprep.mubr.msk.f32.mxu0 %vm5227_vm1, %v5226_v21 }
 0x7bb   :  { %4354 = vmatprep.subr.mxu0 %v5226_v21  ;;  %4351 = vmatprep.mubr.msk.f32.mxu1 %vm5227_vm1, %v5226_v21 }
 0x7bd   :  { %4347 = vmatmul.mubr.msk.f32.vlgmr.msra.gmra.mrb[10].mxu0 %vm394_vm2, %v1126_v59 }
 0x7be   :  { %4356 = vmatprep.mubr.msk.f32.mxu0 %vm5227_vm1, %v5226_v21 }
 0x888   :  { %v5654_v60 = vpop.f32.mrb[8].mxu1 }
 0x889   :  { %v4333_v61 = vpop.f32.mrb[9].mxu1 }
 0x88c   :  { %v5656_v62 = vpop.f32.mrb[8].mxu0  ;;  %v1121_v63 = vpop.f32.mrb[10].mxu1 }
 0x88d   :  { %v1122_v2 = vadd.f32 %v1121_v63, %v5582_v52  ;;  %v4338_v3 = vpop.f32.mrb[9].mxu0  ;;  %v4343_v4 = vpop.f32.mrb[11].mxu1 }
 0x88f   :  { %v1203_v5 = vsel %vm546_vm4, %v1122_v2, -inf }
 0x890   :  { %v1199_v6 = vpop.f32.mrb[10].mxu0  ;;  %1204 = vmax.xlane.f32.xlu0 %v1203_v5 }
 0x891   :  { %v1200_v7 = vadd.f32 %v1199_v6, %v5582_v52  ;;  %v4348_v8 = vpop.f32.mrb[11].mxu0  ;;  %v1738_v6 = vld [vmem:[#allocation10] sm:$0xff] }
 0x893   :  { %v1206_v9 = vsel %vm546_vm4, %v1200_v7, -inf }
 0x894   :  { %1207 = vmax.xlane.f32.xlu1 %v1206_v9  ;;  %v1741_v9 = vld [vmem:[#allocation10 + $0x18] sm:$0xff] }
 0x8a5   :  { %1301 = vrot.lane.b32.xlu1 %v5563_v46, %s5232_s22 }
 0x8a6   :  { %1225 = vrot.lane.b32.xlu0 %v5557_v44, %s5232_s22 }
 0x8a9   :  { %1379 = vrot.lane.b32.xlu1 %v5553_v43, %s5205_s28 }
 0x8ad   :  { %1457 = vrot.lane.b32.xlu1 %v5559_v45, %s5205_s28 }
 0x8b1   :  { %1455 = vrot.lane.b32.xlu1 %v5559_v45, %s5233_s19 }
 0x91d   :  { %v1205_v10 = vpop.xlane.xlu0 %1204 }
 0x91e   :  { %v1209_v11 = vsub.f32 %v1122_v2, %v1205_v10 }
 0x920   :  { %v1211_v12 = vmul.f32 1.442695, %v1209_v11  ;;  %v1742_v11 = vld [vmem:[#allocation10 + $0x20] sm:$0xff] }
 0x921   :  { %v1208_v13 = vpop.xlane.xlu1 %1207  ;;  %v1226_v14 = vpop.permute.xlu0 %1225 }
 0x922   :  { %4764 = vpow2.f32 %v1211_v12  ;;  %v1210_v15 = vsub.f32 %v1200_v7, %v1208_v13  ;;  %4350 = vmatpush3.msra.mxu1 %v1226_v14  ;;  %v1740_v7 = vld [vmem:[#allocation10 + $0x10] sm:$0xff]  ;;  %v1743_v12 = vld [vmem:[#allocation10 + $0x28] sm:$0xff] }
 0x923   :  { %4359 = vmatprep.subr.mxu1 %v5226_v21  ;;  %v4590_v10 = vpack.c.bf16 %v1741_v9, %v1740_v7  ;;  %v4594_v13 = vpack.c.bf16 %v1743_v12, %v1742_v11  ;;  %v1744_v14 = vld [vmem:[#allocation10 + $0x30] sm:$0xff]  ;;  %v4131_v12 = vld [vmem:[#allocation13] ss:$0 sm:$0xff] }
 0x924   :  { %v1213_v16 = vmul.f32 1.442695, %v1210_v15  ;;  %v1745_v15 = vld [vmem:[#allocation10 + $0x38] sm:$0xff] }
 0x925   :  { %v1302_v17 = vpop.permute.xlu1 %1301 }
 0x926   :  { %4766 = vpow2.f32 %v1213_v16  ;;  %4355 = vmatpush3.msra.mxu0 %v1302_v17  ;;  %v4598_v16 = vpack.c.bf16 %v1745_v15, %v1744_v14  ;;  %v1993_v14 = vld [vmem:[#allocation17 + $0x18] sm:$0xff] }
 0x927   :  { %4364 = vmatprep.subr.mxu0 %v5226_v21 }
 0x929   :  { %v1380_v26 = vpop.permute.xlu1 %1379 }
 0x92c   :  { %v4765_v18 = vpop.eup %4764 }
 0x92d   :  { %v1215_v20 = vsel %vm546_vm4, %v4765_v18, 0.0  ;;  %v1458_v30 = vpop.permute.xlu1 %1457 }
 0x92e   :  { %1216 = vadd.xlane.f32.xlu0 %v1215_v20 }
 0x930   :  { %v4767_v45 = vpop.eup %4766 }
 0x931   :  { %v1218_v23 = vsel %vm546_vm4, %v4767_v45, 0.0  ;;  %v1456_v32 = vpop.permute.xlu1 %1455 }
 0x932   :  { %1219 = vadd.xlane.f32.xlu0 %v1218_v23 }
 0x948   :  { %1377 = vrot.lane.b32.xlu0 %v5553_v43, %s5233_s19 }
 0x9bb   :  { %v1217_v24 = vpop.xlane.xlu0 %1216 }
 0x9bc   :  { %4768 = vrcp.f32 %v1217_v24 }
 0x9bf   :  { %v1220_v25 = vpop.xlane.xlu0 %1219 }
 0x9c0   :  { %4770 = vrcp.f32 %v1220_v25 }
 0x9c3   :  { %v1378_v43 = vpop.permute.xlu0 %1377 }
 0x9c6   :  { %v4769_v27 = vpop.eup %4768 }
 0x9c7   :  { %v1223_v28 = vmul.f32 %v4769_v27, %v4765_v18 }
 0x9c9   :  { %4352 = vmatmul.mubr.msk.f32.vlgmr.msra.gmra.mrb[12].mxu1 %vm546_vm4, %v1223_v28 }
 0x9ca   :  { %v4771_v29 = vpop.eup %4770  ;;  %4360 = vmatpush3.xpose.msk.msra.mxu1 %vm394_vm2, %v1380_v26  ;;  %4361 = vmatprep.mubr.msk.f32.mxu1 %vm5227_vm1, %v5226_v21 }
 0x9cb   :  { %v1224_v31 = vmul.f32 %v4771_v29, %v4767_v45  ;;  %4369 = vmatprep.subr.mxu1 %v5226_v21 }
 0x9cd   :  { %4357 = vmatmul.mubr.msk.f32.vlgmr.msra.gmra.mrb[12].mxu0 %vm546_vm4, %v1224_v31  ;;  %4362 = vmatmul.mubr.msk.f32.vlgmr.msra.gmra.mrb[14].mxu1 %vm394_vm2, %v1378_v43 }
 0x9ce   :  { %4365 = vmatpush3.xpose.msk.msra.mxu0 %vm394_vm2, %v1458_v30  ;;  %4366 = vmatprep.mubr.msk.f32.mxu0 %vm5227_vm1, %v5226_v21 }
 0x9cf   :  { %4374 = vmatprep.subr.mxu0 %v5226_v21  ;;  %4371 = vmatprep.mubr.msk.f32.mxu1 %vm5227_vm1, %v5226_v21 }
 0x9d1   :  { %4367 = vmatmul.mubr.msk.f32.vlgmr.msra.gmra.mrb[14].mxu0 %vm394_vm2, %v1456_v32 }
 0x9d2   :  { %4376 = vmatprep.mubr.msk.f32.mxu0 %vm5227_vm1, %v5226_v21 }
 0xa9c   :  { %v1297_v33 = vpop.f32.mrb[12].mxu1 }
 0xa9d   :  { %v4353_v34 = vpop.f32.mrb[13].mxu1 }
 0xaa0   :  { %v1373_v35 = vpop.f32.mrb[12].mxu0  ;;  %v1451_v36 = vpop.f32.mrb[14].mxu1 }
 0xaa1   :  { %v1452_v37 = vadd.f32 %v1451_v36, %v5582_v52  ;;  %v4358_v38 = vpop.f32.mrb[13].mxu0  ;;  %v4363_v39 = vpop.f32.mrb[15].mxu1 }
 0xaa3   :  { %v1533_v40 = vsel %vm546_vm4, %v1452_v37, -inf }
 0xaa4   :  { %v1529_v41 = vpop.f32.mrb[14].mxu0  ;;  %1534 = vmax.xlane.f32.xlu0 %v1533_v40 }
 0xaa5   :  { %v1530_v42 = vadd.f32 %v1529_v41, %v5582_v52  ;;  %v4368_v47 = vpop.f32.mrb[15].mxu0 }
 0xaa7   :  { %v1536_v48 = vsel %vm546_vm4, %v1530_v42, -inf }
 0xaa8   :  { %1537 = vmax.xlane.f32.xlu1 %v1536_v48 }
 0xab9   :  { %1631 = vrot.lane.b32.xlu1 %v5563_v46, %s5233_s19 }
 0xabd   :  { %1709 = vrot.lane.b32.xlu1 %v5654_v60, %s5205_s28 }
 0xac1   :  { %1711 = vrot.lane.b32.xlu1 %v5656_v62, %s5205_s28 }
 0xac5   :  { %1719 = vrot.lane.b32.xlu1 %v1373_v35, %s5221_s6 }
 0xb31   :  { %v1535_v50 = vpop.xlane.xlu0 %1534 }
 0xb32   :  { %v1539_v51 = vsub.f32 %v1452_v37, %v1535_v50 }
 0xb34   :  { %v1541_v53 = vmul.f32 1.442695, %v1539_v51  ;;  %v1875_v51 = vld [vmem:[#allocation14 + $0x8] sm:$0xff] }
 0xb35   :  { %v1538_v54 = vpop.xlane.xlu1 %1537 }
 0xb36   :  { %4772 = vpow2.f32 %v1541_v53  ;;  %v1540_v55 = vsub.f32 %v1530_v42, %v1538_v54  ;;  %v1877_v53 = vld [vmem:[#allocation14 + $0x18] sm:$0xff] }
 0xb37   :  { %v4602_v54 = vpack.c.bf16 %v1877_v53, %v1875_v51 }
 0xb38   :  { %v1543_v56 = vmul.f32 1.442695, %v1540_v55  ;;  %v1874_v55 = vld [vmem:[#allocation14] sm:$0xff] }
 0xb39   :  { %v1632_v57 = vpop.permute.xlu1 %1631 }
 0xb3a   :  { %4774 = vpow2.f32 %v1543_v56  ;;  %4375 = vmatpush3.msra.mxu0 %v1632_v57  ;;  %v1876_v56 = vld [vmem:[#allocation14 + $0x10] sm:$0xff] }
 0xb3b   :  { %v4604_v57 = vpack.c.bf16 %v1876_v56, %v1874_v55  ;;  %4603 = vmatprep.subr.bf16.mxu0 %v4602_v54 }
 0xb3d   :  { %v1710_v23 = vpop.permute.xlu1 %1709 }
 0xb3e   :  { %v1731_v26 = vsel %vm394_vm2, %v5614_v19, %v1710_v23 }
 0xb40   :  { %v4773_v58 = vpop.eup %4772 }
 0xb41   :  { %v1545_v46 = vsel %vm546_vm4, %v4773_v58, 0.0  ;;  %v1712_v24 = vpop.permute.xlu1 %1711 }
 0xb42   :  { %1546 = vadd.xlane.f32.xlu0 %v1545_v46  ;;  %v1732_v31 = vsel %vm394_vm2, %v5616_v22, %v1712_v24  ;;  %v1881_v46 = vld [vmem:[#allocation14 + $0x38] sm:$0xff]  ;;  %v1994_v24 = vld [vmem:[#allocation17 + $0x20] sm:$0xff] }
 0xb44   :  { %v4775_v59 = vpop.eup %4774 }
 0xb45   :  { %v1548_v60 = vsel %vm546_vm4, %v4775_v59, 0.0  ;;  %v1720_v27 = vpop.permute.xlu1 %1719 }
 0xb46   :  { %1549 = vadd.xlane.f32.xlu0 %v1548_v60  ;;  %v1734_v43 = vsel %vm256_vm0, %v1732_v31, %v1720_v27  ;;  %v1996_v27 = vld [vmem:[#allocation17 + $0x30] sm:$0xff]  ;;  %v1999_v31 = vld [vmem:[#allocation17 + $0x48] sm:$0xff] }
 0xb5c   :  { %1555 = vrot.lane.b32.xlu0 %v5557_v44, %s5233_s19  ;;  %v1739_v44 = vld [vmem:[#allocation10 + $0x8] sm:$0xff] }
 0xb5d   :  { %v4586_v8 = vpack.c.bf16 %v1739_v44, %v1738_v6 }
 0xb60   :  { %1717 = vrot.lane.b32.xlu0 %v1297_v33, %s5221_s6 }
 0xbcf   :  { %v1547_v61 = vpop.xlane.xlu0 %1546 }
 0xbd0   :  { %4776 = vrcp.f32 %v1547_v61  ;;  %v1880_v61 = vld [vmem:[#allocation14 + $0x30] sm:$0xff] }
 0xbd3   :  { %v1550_v62 = vpop.xlane.xlu0 %1549 }
 0xbd4   :  { %4778 = vrcp.f32 %v1550_v62 }
 0xbd7   :  { %v1556_v63 = vpop.permute.xlu0 %1555 }
 0xbd8   :  { %4370 = vmatpush3.msra.mxu1 %v1556_v63  ;;  %v1990_v63 = vld [vmem:[#allocation17] sm:$0xff] }
 0xbd9   :  { %4587 = vmatprep.subr.bf16.mxu1 %v4586_v8 }
 0xbda   :  { %v4777_v2 = vpop.eup %4776 }
 0xbdb   :  { %v1553_v3 = vmul.f32 %v4777_v2, %v4773_v58  ;;  %v1718_v25 = vpop.permute.xlu0 %1717  ;;  %v1879_v58 = vld [vmem:[#allocation14 + $0x28] sm:$0xff] }
 0xbdc   :  { %v1733_v28 = vsel %vm256_vm0, %v1731_v26, %v1718_v25  ;;  %v4606_v60 = vpack.c.bf16 %v1881_v46, %v1879_v58  ;;  %v1991_v2 = vld [vmem:[#allocation17 + $0x8] sm:$0xff] }
 0xbdd   :  { %4372 = vmatmul.mubr.msk.f32.vlgmr.msra.gmra.mrb[16].mxu1 %vm546_vm4, %v1553_v3  ;;  %v4610_v3 = vpack.c.bf16 %v1991_v2, %v1990_v63  ;;  %v1995_v25 = vld [vmem:[#allocation17 + $0x28] sm:$0xff] }
 0xbde   :  { %v4779_v4 = vpop.eup %4778  ;;  %4589 = vmatpush3.bf16.msra.mxu1 %v4586_v8  ;;  %v4618_v26 = vpack.c.bf16 %v1995_v25, %v1994_v24  ;;  %v2140_v25 = vld [vmem:[#allocation8 + $0x48] sm:$0xff] }
 0xbdf   :  { %v1554_v5 = vmul.f32 %v4779_v4, %v4775_v59  ;;  %4591 = vmatprep.subr.bf16.mxu1 %v4590_v10  ;;  %v1878_v59 = vld [vmem:[#allocation14 + $0x20] sm:$0xff] }
 0xbe0   :  { %v4608_v62 = vpack.c.bf16 %v1880_v61, %v1878_v59 }
 0xbe1   :  { %4377 = vmatmul.mubr.msk.f32.vlgmr.msra.gmra.mrb[16].mxu0 %vm546_vm4, %v1554_v5 }
 0xbe2   :  { %1964 = vmatprep.mubr.f32.mxu0 %v5226_v21  ;;  %4593 = vmatpush3.bf16.msra.mxu1 %v4590_v10  ;;  %v4130_v10 = vld [vmem:[#allocation11] ss:$0 sm:$0xff] }
 0xbe3   :  { %4595 = vmatprep.subr.bf16.mxu1 %v4594_v13  ;;  %4605 = vmatpush1.bf16.msra.mxu0 %v4604_v57 }
 0xbe4   :  { %4607 = vmatprep.subr.bf16.mxu0 %v4606_v60 }
 0xbe6   :  { %4597 = vmatpush3.bf16.msra.mxu1 %v4594_v13  ;;  %v1992_v13 = vld [vmem:[#allocation17 + $0x10] sm:$0xff] }
 0xbe7   :  { %4599 = vmatprep.subr.bf16.mxu1 %v4598_v16  ;;  %4609 = vmatpush1.bf16.msra.mxu0 %v4608_v62 }
 0xbe8   :  { %4611 = vmatprep.subr.bf16.mxu0 %v4610_v3 }
 0xbea   :  { %4601 = vmatpush3.bf16.msra.mxu1 %v4598_v16 }
 0xcb0   :  { %v1627_v17 = vpop.f32.mrb[16].mxu1 }
 0xcb1   :  { %1725 = vrot.lane.b32.xlu0 %v1627_v17, %s5230_s8  ;;  %v4373_v18 = vpop.f32.mrb[17].mxu1 }
 0xcb4   :  { %v1703_v20 = vpop.f32.mrb[16].mxu0 }
 0xcb5   :  { %1727 = vrot.lane.b32.xlu1 %v1703_v20, %s5230_s8  ;;  %v4378_v45 = vpop.f32.mrb[17].mxu0  ;;  %v4614_v20 = vpack.c.bf16 %v1993_v14, %v1992_v13 }
 0xd23   :  { %v1726_v29 = vpop.permute.xlu0 %1725 }
 0xd24   :  { %v1736_v30 = vsel %vm1735_vm5, %v1733_v28, %v1726_v29  ;;  %v1997_v28 = vld [vmem:[#allocation17 + $0x38] sm:$0xff] }
 0xd25   :  { %4395 = vmatprep.mubr.msk.f32.mxu1 %vm1746_vm6, %v1736_v30  ;;  %v4622_v29 = vpack.c.bf16 %v1997_v28, %v1996_v27  ;;  %v1998_v30 = vld [vmem:[#allocation17 + $0x40] sm:$0xff]  ;;  %v2139_v28 = vld [vmem:[#allocation8 + $0x40] sm:$0xff] }
 0xd27   :  { %v1728_v32 = vpop.permute.xlu1 %1727 }
 0xd28   :  { %v1737_v33 = vsel %vm1735_vm5, %v1734_v43, %v1728_v32  ;;  %v4626_v43 = vpack.c.bf16 %v1999_v31, %v1998_v30  ;;  %v2000_v32 = vld [vmem:[#allocation17 + $0x50] sm:$0xff]  ;;  %v2144_v31 = vld [vmem:[#allocation8 + $0x68] sm:$0xff] }
 0xd29   :  { %4396 = vmatmul.mubr.msk.f32.vlgmr.msra.gmra.mrb[18].mxu1 %vm1746_vm6, %v1737_v33  ;;  %v2001_v33 = vld [vmem:[#allocation17 + $0x58] sm:$0xff] }
 0xd2a   :  { %2217 = vmatprep.mubr.f32.mxu1 %v5226_v21 }
 0xdfc   :  { %v4397_v19 = vpop.f32.mrb[18].mxu1 }
 0xdfd   :  { %v5727_v34 = vadd.f32 %v4397_v19, %v5533_v1  ;;  %v1819_v35 = vpop.f32.mrb[19].mxu1  ;;  %v4630_v19 = vpack.c.bf16 %v2001_v33, %v2000_v32  ;;  %v2143_v32 = vld [vmem:[#allocation8 + $0x60] sm:$0xff] }
 0xdfe   :  { %v5730_v36 = vadd.f32 %v1819_v35, %v5531_v0  ;;  %v2002_v35 = vld [vmem:[#allocation17 + $0x60] sm:$0xff] }
 0xdff   :  { %v1835_v22 = vsel %vm256_vm0, %v5727_v34, 0.0 }
 0xe00   :  { %1836 = vadd.xlane.f32.xlu1 %v1835_v22  ;;  %v1832_v37 = vsel %vm256_vm0, %v5730_v36, 0.0  ;;  %v2003_v22 = vld [vmem:[#allocation17 + $0x68] sm:$0xff] }
 0xe01   :  { %1833 = vadd.xlane.f32.xlu0 %v1832_v37  ;;  %v4634_v37 = vpack.c.bf16 %v2003_v22, %v2002_v35 }
 0xe8d   :  { %v1837_v38 = vpop.xlane.xlu1 %1836 }
 0xe8e   :  { %v1839_v39 = vmul.f32 0.03125, %v1837_v38  ;;  %v1834_v40 = vpop.xlane.xlu0 %1833  ;;  %v2004_v38 = vld [vmem:[#allocation17 + $0x70] sm:$0xff] }
 0xe8f   :  { %v1838_v41 = vmul.f32 0.03125, %v1834_v40 }
 0xe90   :  { %v1841_v42 = vsub.f32 %v5727_v34, %v1839_v39  ;;  %v2005_v39 = vld [vmem:[#allocation17 + $0x78] sm:$0xff] }
 0xe91   :  { %v1840_v1 = vsub.f32 %v5730_v36, %v1838_v41  ;;  %v4638_v40 = vpack.c.bf16 %v2005_v39, %v2004_v38  ;;  %v5745_v41 = vshrl.u32 %v250_v49, 7 }
 0xe92   :  { %v1843_v48 = vmul.f32 %v1841_v42, %v1841_v42 }
 0xe93   :  { %v1842_v47 = vmul.f32 %v1840_v1, %v1840_v1  ;;  %v1886_v57 = vsub.s32 0, %v5745_v41 }
 0xe94   :  { %v1847_v50 = vsel %vm256_vm0, %v1843_v48, 0.0 }
 0xe95   :  { %v1844_v0 = vsel %vm256_vm0, %v1842_v47, 0.0 }
 0xe96   :  { %1845 = vadd.xlane.f32.xlu0 %v1844_v0 }
 0xe9a   :  { %1848 = vadd.xlane.f32.xlu0 %v1847_v50 }
 0xf23   :  { %v1846_v4 = vpop.xlane.xlu0 %1845 }
 0xf24   :  { %v1850_v5 = vmul.f32 0.03125, %v1846_v4 }
 0xf26   :  { %v1852_v6 = vadd.f32 1e-05, %v1850_v5 }
 0xf27   :  { %v1849_v44 = vpop.xlane.xlu0 %1848 }
 0xf28   :  { %4780 = vrsqrt.f32 %v1852_v6  ;;  %v1851_v7 = vmul.f32 0.03125, %v1849_v44 }
 0xf2a   :  { %v1853_v8 = vadd.f32 1e-05, %v1851_v7  ;;  %v4134_v7 = vld [vmem:[#allocation19] ss:$0 sm:$0xff] }
 0xf2c   :  { %4782 = vrsqrt.f32 %v1853_v8 }
 0xf32   :  { %v4781_v9 = vpop.eup %4780 }
 0xf33   :  { %v1856_v11 = vmul.f32 %v4781_v9, %v1840_v1  ;;  %v1882_v1 = vld [vmem:[#allocation16] sm:$0x3] }
 0xf34   :  { %v1887_v49 = vrot.slane %v1882_v1, %v1886_v57 }
 0xf35   :  { %v1864_v15 = vmul.f32 %v4130_v10, %v1856_v11 }
 0xf36   :  { %v4783_v16 = vpop.eup %4782 }
 0xf37   :  { %v1872_v17 = vadd.f32 %v4131_v12, %v1864_v15  ;;  %v1857_v18 = vmul.f32 %v4783_v16, %v1841_v42  ;;  %v1890_v42 = vsub.s32 1, %v5745_v41 }
 0xf39   :  { %4132 = vmatmul.mubr.msk.f32.vlgmr.msra.gmra.mrb[18].mxu0 %vm256_vm0, %v1872_v17  ;;  %v1865_v45 = vmul.f32 %v4130_v10, %v1857_v18  ;;  %v1891_v47 = vrot.slane %v1882_v1, %v1890_v42 }
 0xf3a   :  { %1970 = vmatprep.mubr.f32.mxu0 %v5226_v21  ;;  %4613 = vmatpush3.bf16.msra.mxu0 %v4610_v3 }
 0xf3b   :  { %v1873_v23 = vadd.f32 %v4131_v12, %v1865_v45  ;;  %4615 = vmatprep.subr.bf16.mxu0 %v4614_v20 }
 0xf3d   :  { %4133 = vmatmul.mubr.msk.f32.gmra.mrb[20].mxu0 %vm256_vm0, %v1873_v23 }
 0xf3e   :  { %4617 = vmatpush3.bf16.msra.mxu0 %v4614_v20 }
 0xf3f   :  { %4619 = vmatprep.subr.bf16.mxu0 %v4618_v26 }
 0xf42   :  { %4621 = vmatpush3.bf16.msra.mxu0 %v4618_v26  ;;  %v2142_v26 = vld [vmem:[#allocation8 + $0x58] sm:$0xff] }
 0xf43   :  { %4623 = vmatprep.subr.bf16.mxu0 %v4622_v29  ;;  %v4642_v27 = vpack.c.bf16 %v2142_v26, %v2140_v25 }
 0xf45   :  { %4643 = vmatprep.subr.bf16.mxu1 %v4642_v27 }
 0xf46   :  { %4625 = vmatpush3.bf16.msra.mxu0 %v4622_v29  ;;  %v2141_v29 = vld [vmem:[#allocation8 + $0x50] sm:$0xff] }
 0xf47   :  { %4627 = vmatprep.subr.bf16.mxu0 %v4626_v43  ;;  %v4644_v30 = vpack.c.bf16 %v2141_v29, %v2139_v28 }
 0xf49   :  { %4645 = vmatpush1.bf16.msra.mxu1 %v4644_v30 }
 0xf4a   :  { %4629 = vmatpush3.bf16.msra.mxu0 %v4626_v43  ;;  %v2146_v43 = vld [vmem:[#allocation8 + $0x78] sm:$0xff] }
 0xf4b   :  { %4631 = vmatprep.subr.bf16.mxu0 %v4630_v19  ;;  %v4646_v33 = vpack.c.bf16 %v2146_v43, %v2144_v31 }
 0xf4d   :  { %4647 = vmatprep.subr.bf16.mxu1 %v4646_v33 }
 0xf4e   :  { %4633 = vmatpush3.bf16.msra.mxu0 %v4630_v19  ;;  %v2145_v19 = vld [vmem:[#allocation8 + $0x70] sm:$0xff] }
 0xf4f   :  { %4635 = vmatprep.subr.bf16.mxu0 %v4634_v37  ;;  %v4648_v35 = vpack.c.bf16 %v2145_v19, %v2143_v32 }
 0xf51   :  { %4649 = vmatpush1.bf16.msra.mxu1 %v4648_v35 }
 0xf52   :  { %4637 = vmatpush3.bf16.msra.mxu0 %v4634_v37  ;;  %4433 = vmatprep.subr.mxu1 %v5226_v21 }
 0xf53   :  { %4639 = vmatprep.subr.bf16.mxu0 %v4638_v40 }
 0xf56   :  { %4641 = vmatpush3.bf16.msra.mxu0 %v4638_v40 }
 0xf57   :  { %4453 = vmatprep.subr.mxu0 %v5226_v21 }
0x100c   :  { %v1966_v0 = vpop.f32.mrb[18].mxu0 }
0x100d   :  { %v1968_v48 = vpop.f32.mrb[19].mxu0  ;;  %v1967_v60 = vadd.f32 %v1966_v0, %v1887_v49 }
0x100e   :  { %v1969_v50 = vadd.f32 %v1968_v48, %v1891_v47  ;;  %v4135_v48 = vld [vmem:[#allocation5 + $0x1] ss:$0 sm:$0xff] }
0x1010   :  { %v1980_v51 = vmul.f32 0.70710677, %v1969_v50  ;;  %v1972_v53 = vpop.f32.mrb[20].mxu0  ;;  %v1977_v46 = vmul.f32 0.5, %v1969_v50 }
0x1011   :  { %v1974_v54 = vpop.f32.mrb[21].mxu0  ;;  %v1973_v4 = vadd.f32 %v1972_v53, %v1887_v49  ;;  %v4136_v53 = vld [vmem:[#allocation7 + $0x1] ss:$0 sm:$0xff] }
0x1012   :  { %4784 = verf.f32 %v1980_v51  ;;  %v1975_v55 = vadd.f32 %v1974_v54, %v1891_v47 }
0x1014   :  { %v1981_v56 = vmul.f32 0.70710677, %v1975_v55  ;;  %v1978_v63 = vmul.f32 0.5, %v1975_v55 }
0x1016   :  { %4786 = verf.f32 %v1981_v56 }
0x101c   :  { %v4785_v58 = vpop.eup %4784 }
0x101d   :  { %v1984_v59 = vadd.f32 1.0, %v4785_v58 }
0x101f   :  { %v1986_v61 = vmul.f32 %v1984_v59, %v1977_v46 }
0x1020   :  { %v4787_v62 = vpop.eup %4786 }
0x1021   :  { %v1985_v2 = vadd.f32 1.0, %v4787_v62  ;;  %v1988_v3 = vmul.f32 %v1986_v61, %v1967_v60 }
0x1023   :  { %v1987_v5 = vmul.f32 %v1985_v2, %v1978_v63  ;;  %4430 = vmatprep.mubr.f32.mxu0 %v1988_v3 }
0x1025   :  { %v1989_v6 = vmul.f32 %v1987_v5, %v1973_v4 }
0x1027   :  { %4431 = vmatmul.mubr.f32.vlgmr.msra.gmra.mrb[22].mxu0 %v1989_v6 }
0x1028   :  { %4455 = vmatprep.mubr.msk.f32.mxu0 %vm5227_vm1, %v5226_v21 }
0x10fa   :  { %v4432_v44 = vpop.f32.mrb[22].mxu0 }
0x10fb   :  { %v2082_v8 = vadd.f32 %v4432_v44, %v5727_v34  ;;  %v2072_v9 = vpop.f32.mrb[23].mxu0 }
0x10fc   :  { %v2081_v10 = vadd.f32 %v2072_v9, %v5730_v36 }
0x10fd   :  { %v5757_v11 = vadd.f32 %v4134_v7, %v2082_v8 }
0x10fe   :  { %v5759_v12 = vadd.f32 %v4134_v7, %v2081_v10 }
0x10ff   :  { %v2099_v13 = vsel %vm256_vm0, %v5757_v11, 0.0 }
0x1100   :  { %2100 = vadd.xlane.f32.xlu1 %v2099_v13  ;;  %v2096_v14 = vsel %vm256_vm0, %v5759_v12, 0.0 }
0x1101   :  { %2097 = vadd.xlane.f32.xlu0 %v2096_v14 }
0x118d   :  { %v2101_v15 = vpop.xlane.xlu1 %2100 }
0x118e   :  { %v2103_v16 = vmul.f32 0.03125, %v2101_v15  ;;  %v2098_v17 = vpop.xlane.xlu0 %2097 }
0x118f   :  { %v2102_v18 = vmul.f32 0.03125, %v2098_v17 }
0x1190   :  { %v2105_v34 = vsub.f32 %v5757_v11, %v2103_v16 }
0x1191   :  { %v2104_v36 = vsub.f32 %v5759_v12, %v2102_v18 }
0x1192   :  { %v2107_v20 = vmul.f32 %v2105_v34, %v2105_v34 }
0x1193   :  { %v2106_v45 = vmul.f32 %v2104_v36, %v2104_v36 }
0x1194   :  { %v2111_v23 = vsel %vm256_vm0, %v2107_v20, 0.0 }
0x1195   :  { %2112 = vadd.xlane.f32.xlu1 %v2111_v23  ;;  %v2108_v24 = vsel %vm256_vm0, %v2106_v45, 0.0 }
0x1196   :  { %2109 = vadd.xlane.f32.xlu0 %v2108_v24 }
0x1222   :  { %v2113_v22 = vpop.xlane.xlu1 %2112 }
0x1223   :  { %v2115_v37 = vmul.f32 0.03125, %v2113_v22  ;;  %v2110_v38 = vpop.xlane.xlu0 %2109 }
0x1224   :  { %v2114_v39 = vmul.f32 0.03125, %v2110_v38 }
0x1225   :  { %v2117_v40 = vadd.f32 1e-05, %v2115_v37 }
0x1226   :  { %v2116_v1 = vadd.f32 1e-05, %v2114_v39 }
0x1227   :  { %4788 = vrsqrt.f32 %v2117_v40 }
0x1228   :  { %4790 = vrsqrt.f32 %v2116_v1 }
0x1231   :  { %v4789_v47 = vpop.eup %4788 }
0x1232   :  { %v4791_v0 = vpop.eup %4790  ;;  %v2121_v51 = vmul.f32 %v4789_v47, %v2105_v34 }
0x1233   :  { %v2120_v50 = vmul.f32 %v4791_v0, %v2104_v36 }
0x1234   :  { %v2129_v56 = vmul.f32 %v4135_v48, %v2121_v51 }
0x1235   :  { %v2128_v54 = vmul.f32 %v4135_v48, %v2120_v50 }
0x1236   :  { %v2137_v49 = vadd.f32 %v4136_v53, %v2129_v56 }
0x1237   :  { %v2136_v55 = vadd.f32 %v4136_v53, %v2128_v54 }
0x1239   :  { %4137 = vmatmul.mubr.msk.f32.vlgmr.msra.gmra.mrb[20].mxu1 %vm256_vm0, %v2136_v55 }
0x123a   :  { %2223 = vmatprep.mubr.f32.mxu1 %v5226_v21 }
0x123d   :  { %4138 = vmatmul.mubr.msk.f32.gmra.mrb[22].mxu1 %vm256_vm0, %v2137_v49 }
0x123e   :  { %4435 = vmatprep.mubr.msk.f32.mxu1 %vm5227_vm1, %v5226_v21 }
0x130c   :  { %v5775_v58 = vpop.f32.mrb[20].mxu1 }
0x130d   :  { %2231 = vrot.lane.b32.xlu0 %v5775_v58, %s5228_s14  ;;  %v5779_v46 = vpop.f32.mrb[21].mxu1 }
0x1310   :  { %v5781_v59 = vpop.f32.mrb[22].mxu1 }
0x1311   :  { %2308 = vrot.lane.b32.xlu1 %v5781_v59, %s5228_s14  ;;  %v5785_v60 = vpop.f32.mrb[23].mxu1 }
0x137f   :  { %v2232_v61 = vpop.permute.xlu0 %2231 }
0x1380   :  { %4434 = vmatpush3.xpose.msk.msra.mxu1 %vm394_vm2, %v2232_v61 }
0x1381   :  { %4438 = vmatprep.subr.mxu1 %v5226_v21 }
0x1383   :  { %4436 = vmatmul.mubr.msk.f32.vlgmr.msra.gmra.mrb[24].mxu1 %vm394_vm2, %v5775_v58  ;;  %v2309_v62 = vpop.permute.xlu1 %2308 }
0x1384   :  { %4439 = vmatpush3.xpose.msk.msra.mxu1 %vm394_vm2, %v2309_v62  ;;  %4440 = vmatprep.mubr.msk.f32.mxu1 %vm5227_vm1, %v5226_v21 }
0x1385   :  { %4443 = vmatprep.subr.mxu1 %v5226_v21 }
0x1387   :  { %4441 = vmatmul.mubr.msk.f32.vlgmr.msra.gmra.mrb[26].mxu1 %vm394_vm2, %v5781_v59 }
0x1388   :  { %4444 = vmatpush3.msra.mxu1 %v5779_v46  ;;  %4445 = vmatprep.mubr.msk.f32.mxu1 %vm5227_vm1, %v5226_v21 }
0x1389   :  { %4448 = vmatprep.subr.mxu1 %v5226_v21 }
0x1456   :  { %v2303_v63 = vpop.f32.mrb[24].mxu1 }
0x1457   :  { %v2304_v2 = vadd.f32 %v2303_v63, %v5582_v52  ;;  %v4437_v3 = vpop.f32.mrb[25].mxu1 }
0x1459   :  { %v2384_v4 = vsel %vm546_vm4, %v2304_v2, -inf }
0x145a   :  { %2385 = vmax.xlane.f32.xlu1 %v2384_v4  ;;  %v2380_v5 = vpop.f32.mrb[26].mxu1 }
0x145b   :  { %v2381_v6 = vadd.f32 %v2380_v5, %v5582_v52  ;;  %v4442_v44 = vpop.f32.mrb[27].mxu1 }
0x145d   :  { %v2387_v7 = vsel %vm546_vm4, %v2381_v6, -inf }
0x145e   :  { %2388 = vmax.xlane.f32.xlu0 %v2387_v7 }
0x146b   :  { %2632 = vrot.lane.b32.xlu1 %v5781_v59, %s5230_s8 }
0x146f   :  { %2552 = vrot.lane.b32.xlu1 %v5775_v58, %s5231_s9 }
0x14e7   :  { %v2386_v8 = vpop.xlane.xlu1 %2385 }
0x14e8   :  { %v2390_v9 = vsub.f32 %v2304_v2, %v2386_v8 }
0x14ea   :  { %v2392_v10 = vmul.f32 1.442695, %v2390_v9 }
0x14eb   :  { %v2389_v13 = vpop.xlane.xlu0 %2388  ;;  %v2633_v36 = vpop.permute.xlu1 %2632 }
0x14ec   :  { %4792 = vpow2.f32 %v2392_v10  ;;  %v2391_v14 = vsub.f32 %v2381_v6, %v2389_v13 }
0x14ee   :  { %v2394_v15 = vmul.f32 1.442695, %v2391_v14 }
0x14ef   :  { %v2553_v20 = vpop.permute.xlu1 %2552 }
0x14f0   :  { %4794 = vpow2.f32 %v2394_v15 }
0x14f6   :  { %v4793_v16 = vpop.eup %4792 }
0x14f7   :  { %v2396_v17 = vsel %vm546_vm4, %v4793_v16, 0.0 }
0x14f8   :  { %2397 = vadd.xlane.f32.xlu0 %v2396_v17 }
0x14fa   :  { %v4795_v18 = vpop.eup %4794 }
0x14fb   :  { %v2399_v34 = vsel %vm546_vm4, %v4795_v18, 0.0 }
0x14fc   :  { %2400 = vadd.xlane.f32.xlu1 %v2399_v34 }
0x150d   :  { %2630 = vrot.lane.b32.xlu1 %v5781_v59, %s5231_s9 }
0x150e   :  { %2554 = vrot.lane.b32.xlu0 %v5775_v58, %s5230_s8 }
0x1585   :  { %v2398_v45 = vpop.xlane.xlu0 %2397 }
0x1586   :  { %4796 = vrcp.f32 %v2398_v45 }
0x1589   :  { %v2401_v23 = vpop.xlane.xlu1 %2400  ;;  %v2555_v24 = vpop.permute.xlu0 %2554 }
0x158a   :  { %4798 = vrcp.f32 %v2401_v23  ;;  %4454 = vmatpush3.xpose.msk.msra.mxu0 %vm394_vm2, %v2555_v24 }
0x158b   :  { %4463 = vmatprep.subr.mxu0 %v5226_v21 }
0x158d   :  { %4456 = vmatmul.mubr.msk.f32.vlgmr.msra.gmra.mrb[24].mxu0 %vm394_vm2, %v2553_v20  ;;  %v2631_v29 = vpop.permute.xlu1 %2630 }
0x158e   :  { %4465 = vmatprep.mubr.msk.f32.mxu0 %vm5227_vm1, %v5226_v21 }
0x1590   :  { %v4797_v25 = vpop.eup %4796 }
0x1591   :  { %v2404_v26 = vmul.f32 %v4797_v25, %v4793_v16 }
0x1593   :  { %4446 = vmatmul.mubr.msk.f32.vlgmr.msra.gmra.mrb[28].mxu1 %vm546_vm4, %v2404_v26 }
0x1594   :  { %v4799_v27 = vpop.eup %4798  ;;  %4449 = vmatpush3.msra.mxu1 %v5785_v60  ;;  %4450 = vmatprep.mubr.msk.f32.mxu1 %vm5227_vm1, %v5226_v21 }
0x1595   :  { %v2405_v28 = vmul.f32 %v4799_v27, %v4795_v18  ;;  %4458 = vmatprep.subr.mxu1 %v5226_v21 }
0x1597   :  { %4451 = vmatmul.mubr.msk.f32.vlgmr.msra.gmra.mrb[30].mxu1 %vm546_vm4, %v2405_v28 }
0x1598   :  { %4460 = vmatprep.mubr.msk.f32.mxu1 %vm5227_vm1, %v5226_v21 }
0x159b   :  { %4459 = vmatpush3.xpose.msk.msra.mxu1 %vm394_vm2, %v2633_v36 }
0x159c   :  { %4468 = vmatprep.subr.mxu1 %v5226_v21 }
0x159e   :  { %4461 = vmatmul.mubr.msk.f32.vlgmr.msra.gmra.mrb[32].mxu1 %vm394_vm2, %v2631_v29 }
0x159f   :  { %4470 = vmatprep.mubr.msk.f32.mxu1 %vm5227_vm1, %v5226_v21 }
0x1660   :  { %v2626_v30 = vpop.f32.mrb[24].mxu0 }
0x1661   :  { %v2627_v31 = vadd.f32 %v2626_v30, %v5582_v52  ;;  %v4457_v43 = vpop.f32.mrb[25].mxu0 }
0x1663   :  { %v2708_v32 = vsel %vm546_vm4, %v2627_v31, -inf }
0x1664   :  { %2709 = vmax.xlane.f32.xlu0 %v2708_v32 }
0x1666   :  { %v5835_v33 = vpop.f32.mrb[28].mxu1 }
0x1667   :  { %v4447_v19 = vpop.f32.mrb[29].mxu1 }
0x166a   :  { %v5837_v35 = vpop.f32.mrb[30].mxu1 }
0x166b   :  { %v4452_v22 = vpop.f32.mrb[31].mxu1 }
0x1671   :  { %v2704_v37 = vpop.f32.mrb[32].mxu1 }
0x1672   :  { %v2705_v38 = vadd.f32 %v2704_v37, %v5582_v52  ;;  %v4462_v39 = vpop.f32.mrb[33].mxu1 }
0x1674   :  { %v2711_v40 = vsel %vm546_vm4, %v2705_v38, -inf }
0x1675   :  { %2712 = vmax.xlane.f32.xlu1 %v2711_v40 }
0x1686   :  { %2808 = vrot.lane.b32.xlu1 %v5785_v60, %s5231_s9 }
0x168a   :  { %2886 = vrot.lane.b32.xlu1 %v5775_v58, %s5221_s6 }
0x168e   :  { %2964 = vrot.lane.b32.xlu1 %v5781_v59, %s5221_s6 }
0x1692   :  { %2962 = vrot.lane.b32.xlu1 %v5781_v59, %s5232_s22 }
0x16f1   :  { %v2710_v1 = vpop.xlane.xlu0 %2709 }
0x16f2   :  { %v2714_v47 = vsub.f32 %v2627_v31, %v2710_v1 }
0x16f4   :  { %v2716_v0 = vmul.f32 1.442695, %v2714_v47 }
0x16f6   :  { %4800 = vpow2.f32 %v2716_v0 }
0x1700   :  { %v4801_v48 = vpop.eup %4800 }
0x1701   :  { %v2720_v50 = vsel %vm546_vm4, %v4801_v48, 0.0 }
0x1702   :  { %v2713_v51 = vpop.xlane.xlu1 %2712  ;;  %2721 = vadd.xlane.f32.xlu0 %v2720_v50 }
0x1703   :  { %v2715_v54 = vsub.f32 %v2705_v38, %v2713_v51 }
0x1705   :  { %v2718_v55 = vmul.f32 1.442695, %v2715_v54 }
0x1706   :  { %v2809_v53 = vpop.permute.xlu1 %2808 }
0x1707   :  { %4469 = vmatpush3.msra.mxu1 %v2809_v53  ;;  %4802 = vpow2.f32 %v2718_v55 }
0x1708   :  { %4478 = vmatprep.subr.mxu1 %v5226_v21 }
0x170a   :  { %v2887_v3 = vpop.permute.xlu1 %2886 }
0x170e   :  { %v2965_v44 = vpop.permute.xlu1 %2964 }
0x1711   :  { %v4803_v56 = vpop.eup %4802 }
0x1712   :  { %v2723_v49 = vsel %vm546_vm4, %v4803_v56, 0.0  ;;  %v2963_v8 = vpop.permute.xlu1 %2962 }
0x1718   :  { %2731 = vrot.lane.b32.xlu0 %v5779_v46, %s5231_s9 }
0x1737   :  { %2724 = vadd.xlane.f32.xlu0 %v2723_v49 }
0x174d   :  { %2884 = vrot.lane.b32.xlu0 %v5775_v58, %s5232_s22 }
0x178f   :  { %v2722_v61 = vpop.xlane.xlu0 %2721 }
0x1790   :  { %4804 = vrcp.f32 %v2722_v61 }
0x1793   :  { %v2732_v62 = vpop.permute.xlu0 %2731 }
0x1794   :  { %4464 = vmatpush3.msra.mxu0 %v2732_v62 }
0x1795   :  { %4473 = vmatprep.subr.mxu0 %v5226_v21 }
0x179a   :  { %v4805_v63 = vpop.eup %4804 }
0x179b   :  { %v2728_v2 = vmul.f32 %v4805_v63, %v4801_v48 }
0x179d   :  { %4466 = vmatmul.mubr.msk.f32.vlgmr.msra.gmra.mrb[26].mxu0 %vm546_vm4, %v2728_v2 }
0x179e   :  { %4474 = vmatpush3.xpose.msk.msra.mxu0 %vm394_vm2, %v2887_v3  ;;  %4475 = vmatprep.mubr.msk.f32.mxu0 %vm5227_vm1, %v5226_v21 }
0x179f   :  { %4483 = vmatprep.subr.mxu0 %v5226_v21 }
0x17c4   :  { %v2725_v4 = vpop.xlane.xlu0 %2724 }
0x17c5   :  { %4806 = vrcp.f32 %v2725_v4 }
0x17c8   :  { %v2885_v5 = vpop.permute.xlu0 %2884 }
0x17c9   :  { %4476 = vmatmul.mubr.msk.f32.vlgmr.msra.gmra.mrb[28].mxu0 %vm394_vm2, %v2885_v5 }
0x17ca   :  { %4485 = vmatprep.mubr.msk.f32.mxu0 %vm5227_vm1, %v5226_v21 }
0x17cf   :  { %v4807_v6 = vpop.eup %4806 }
0x17d0   :  { %v2729_v7 = vmul.f32 %v4807_v6, %v4803_v56 }
0x17d2   :  { %4471 = vmatmul.mubr.msk.f32.vlgmr.msra.gmra.mrb[34].mxu1 %vm546_vm4, %v2729_v7 }
0x17d3   :  { %4479 = vmatpush3.xpose.msk.msra.mxu1 %vm394_vm2, %v2965_v44  ;;  %4480 = vmatprep.mubr.msk.f32.mxu1 %vm5227_vm1, %v5226_v21 }
0x17d4   :  { %4488 = vmatprep.subr.mxu1 %v5226_v21 }
0x17d6   :  { %4481 = vmatmul.mubr.msk.f32.vlgmr.msra.gmra.mrb[36].mxu1 %vm394_vm2, %v2963_v8 }
0x17d7   :  { %4490 = vmatprep.mubr.msk.f32.mxu1 %vm5227_vm1, %v5226_v21 }
0x1870   :  { %v5873_v9 = vpop.f32.mrb[26].mxu0 }
0x1871   :  { %v4467_v10 = vpop.f32.mrb[27].mxu0 }
0x189c   :  { %v2958_v13 = vpop.f32.mrb[28].mxu0 }
0x189d   :  { %v2959_v14 = vadd.f32 %v2958_v13, %v5582_v52  ;;  %v4477_v15 = vpop.f32.mrb[29].mxu0 }
0x189f   :  { %v3040_v16 = vsel %vm546_vm4, %v2959_v14, -inf }
0x18a0   :  { %3041 = vmax.xlane.f32.xlu0 %v3040_v16 }
0x18a5   :  { %v5877_v17 = vpop.f32.mrb[34].mxu1 }
0x18a6   :  { %v4472_v18 = vpop.f32.mrb[35].mxu1 }
0x18a9   :  { %v3036_v34 = vpop.f32.mrb[36].mxu1 }
0x18aa   :  { %v3037_v36 = vadd.f32 %v3036_v34, %v5582_v52  ;;  %v4482_v20 = vpop.f32.mrb[37].mxu1 }
0x18ab   :  { %v3576_v20 = vld [vmem:[#allocation10 + $0x48] sm:$0xff] }
0x18ac   :  { %v3043_v45 = vsel %vm546_vm4, %v3037_v36, -inf }
0x18ad   :  { %3044 = vmax.xlane.f32.xlu1 %v3043_v45  ;;  %v3577_v45 = vld [vmem:[#allocation10 + $0x50] sm:$0xff] }
0x18be   :  { %3138 = vrot.lane.b32.xlu1 %v5785_v60, %s5232_s22 }
0x18c2   :  { %3216 = vrot.lane.b32.xlu1 %v5775_v58, %s5205_s28 }
0x18c6   :  { %3294 = vrot.lane.b32.xlu1 %v5781_v59, %s5205_s28 }
0x18ca   :  { %3292 = vrot.lane.b32.xlu1 %v5781_v59, %s5233_s19 }
0x192d   :  { %v3042_v23 = vpop.xlane.xlu0 %3041 }
0x192e   :  { %v3046_v24 = vsub.f32 %v2959_v14, %v3042_v23  ;;  %v3578_v23 = vld [vmem:[#allocation10 + $0x58] sm:$0xff] }
0x1930   :  { %v3048_v25 = vmul.f32 1.442695, %v3046_v24  ;;  %v4654_v24 = vpack.c.bf16 %v3578_v23, %v3577_v45 }
0x1932   :  { %4808 = vpow2.f32 %v3048_v25  ;;  %v3579_v25 = vld [vmem:[#allocation10 + $0x60] sm:$0xff] }
0x193a   :  { %v3045_v26 = vpop.xlane.xlu1 %3044 }
0x193b   :  { %v3047_v30 = vsub.f32 %v3037_v36, %v3045_v26  ;;  %v3575_v36 = vld [vmem:[#allocation10 + $0x40] sm:$0xff]  ;;  %v3580_v26 = vld [vmem:[#allocation10 + $0x68] sm:$0xff] }
0x193c   :  { %v4809_v27 = vpop.eup %4808 }
0x193d   :  { %v3052_v28 = vsel %vm546_vm4, %v4809_v27, 0.0  ;;  %v3050_v31 = vmul.f32 1.442695, %v3047_v30 }
0x193e   :  { %3053 = vadd.xlane.f32.xlu0 %v3052_v28  ;;  %v3139_v29 = vpop.permute.xlu1 %3138  ;;  %v3581_v28 = vld [vmem:[#allocation10 + $0x70] sm:$0xff] }
0x193f   :  { %4489 = vmatpush3.msra.mxu1 %v3139_v29  ;;  %4810 = vpow2.f32 %v3050_v31  ;;  %v3582_v29 = vld [vmem:[#allocation10 + $0x78] sm:$0xff] }
0x1940   :  { %4498 = vmatprep.subr.mxu1 %v5226_v21  ;;  %v4662_v30 = vpack.c.bf16 %v3582_v29, %v3581_v28  ;;  %v4165_v28 = vld [vmem:[#allocation11 + $0x1] ss:$0 sm:$0xff] }
0x1942   :  { %v3217_v38 = vpop.permute.xlu1 %3216 }
0x1946   :  { %v3295_v1 = vpop.permute.xlu1 %3294 }
0x1949   :  { %v4811_v59 = vpop.eup %4810 }
0x194a   :  { %v3055_v43 = vsel %vm546_vm4, %v4811_v59, 0.0  ;;  %v3293_v0 = vpop.permute.xlu1 %3292 }
0x1954   :  { %3062 = vrot.lane.b32.xlu0 %v5779_v46, %s5232_s22 }
0x1973   :  { %3056 = vadd.xlane.f32.xlu0 %v3055_v43 }
0x1989   :  { %3214 = vrot.lane.b32.xlu0 %v5775_v58, %s5233_s19 }
0x19cb   :  { %v3054_v32 = vpop.xlane.xlu0 %3053 }
0x19cc   :  { %4812 = vrcp.f32 %v3054_v32 }
0x19cf   :  { %v3063_v19 = vpop.permute.xlu0 %3062 }
0x19d0   :  { %4484 = vmatpush3.msra.mxu0 %v3063_v19 }
0x19d1   :  { %4493 = vmatprep.subr.mxu0 %v5226_v21 }
0x19d6   :  { %v4813_v22 = vpop.eup %4812 }
0x19d7   :  { %v3060_v37 = vmul.f32 %v4813_v22, %v4809_v27  ;;  %v4658_v27 = vpack.c.bf16 %v3580_v26, %v3579_v25 }
0x19d9   :  { %4486 = vmatmul.mubr.msk.f32.vlgmr.msra.gmra.mrb[30].mxu0 %vm546_vm4, %v3060_v37 }
0x19da   :  { %4494 = vmatpush3.xpose.msk.msra.mxu0 %vm394_vm2, %v3217_v38  ;;  %4495 = vmatprep.mubr.msk.f32.mxu0 %vm5227_vm1, %v5226_v21 }
0x19db   :  { %4503 = vmatprep.subr.mxu0 %v5226_v21 }
0x1a00   :  { %v3057_v39 = vpop.xlane.xlu0 %3056 }
0x1a01   :  { %4814 = vrcp.f32 %v3057_v39 }
0x1a04   :  { %v3215_v58 = vpop.permute.xlu0 %3214 }
0x1a05   :  { %4496 = vmatmul.mubr.msk.f32.vlgmr.msra.gmra.mrb[32].mxu0 %vm394_vm2, %v3215_v58 }
0x1a06   :  { %4505 = vmatprep.mubr.msk.f32.mxu0 %vm5227_vm1, %v5226_v21 }
0x1a0b   :  { %v4815_v40 = vpop.eup %4814 }
0x1a0c   :  { %v3061_v47 = vmul.f32 %v4815_v40, %v4811_v59 }
0x1a0e   :  { %4491 = vmatmul.mubr.msk.f32.vlgmr.msra.gmra.mrb[38].mxu1 %vm546_vm4, %v3061_v47 }
0x1a0f   :  { %4499 = vmatpush3.xpose.msk.msra.mxu1 %vm394_vm2, %v3295_v1  ;;  %4500 = vmatprep.mubr.msk.f32.mxu1 %vm5227_vm1, %v5226_v21 }
0x1a10   :  { %4508 = vmatprep.subr.mxu1 %v5226_v21 }
0x1a12   :  { %4501 = vmatmul.mubr.msk.f32.vlgmr.msra.gmra.mrb[40].mxu1 %vm394_vm2, %v3293_v0 }
0x1a13   :  { %4510 = vmatprep.mubr.msk.f32.mxu1 %vm5227_vm1, %v5226_v21 }
0x1aac   :  { %v3134_v48 = vpop.f32.mrb[30].mxu0 }
0x1aad   :  { %v4487_v50 = vpop.f32.mrb[31].mxu0 }
0x1ad8   :  { %v3288_v51 = vpop.f32.mrb[32].mxu0 }
0x1ad9   :  { %v3289_v53 = vadd.f32 %v3288_v51, %v5582_v52  ;;  %v4497_v54 = vpop.f32.mrb[33].mxu0 }
0x1adb   :  { %v3370_v55 = vsel %vm546_vm4, %v3289_v53, -inf }
0x1adc   :  { %3371 = vmax.xlane.f32.xlu0 %v3370_v55 }
0x1ae1   :  { %v3210_v56 = vpop.f32.mrb[38].mxu1 }
0x1ae2   :  { %v4492_v49 = vpop.f32.mrb[39].mxu1 }
0x1ae5   :  { %v3366_v61 = vpop.f32.mrb[40].mxu1 }
0x1ae6   :  { %v3367_v62 = vadd.f32 %v3366_v61, %v5582_v52  ;;  %v4502_v63 = vpop.f32.mrb[41].mxu1 }
0x1ae8   :  { %v3373_v2 = vsel %vm546_vm4, %v3367_v62, -inf }
0x1ae9   :  { %3374 = vmax.xlane.f32.xlu1 %v3373_v2 }
0x1afa   :  { %3468 = vrot.lane.b32.xlu1 %v5785_v60, %s5233_s19 }
0x1afe   :  { %3546 = vrot.lane.b32.xlu1 %v5873_v9, %s5205_s28 }
0x1b02   :  { %3548 = vrot.lane.b32.xlu1 %v5877_v17, %s5205_s28  ;;  %s5235_s28 = smov [#allocation26]  }
0x1b06   :  { %3556 = vrot.lane.b32.xlu1 %v3210_v56, %s5221_s6 }
0x1b69   :  { %v3372_v3 = vpop.xlane.xlu0 %3371 }
0x1b6a   :  { %v3376_v4 = vsub.f32 %v3289_v53, %v3372_v3 }
0x1b6c   :  { %v3378_v5 = vmul.f32 1.442695, %v3376_v4 }
0x1b6e   :  { %4816 = vpow2.f32 %v3378_v5  ;;  %v3714_v5 = vld [vmem:[#allocation14 + $0x48] sm:$0xff] }
0x1b76   :  { %v3375_v52 = vpop.xlane.xlu1 %3374 }
0x1b77   :  { %v3377_v6 = vsub.f32 %v3367_v62, %v3375_v52  ;;  %v3716_v52 = vld [vmem:[#allocation14 + $0x58] sm:$0xff] }
0x1b78   :  { %v4817_v44 = vpop.eup %4816 }
0x1b79   :  { %v3380_v7 = vmul.f32 1.442695, %v3377_v6  ;;  %v3382_v8 = vsel %vm546_vm4, %v4817_v44, 0.0  ;;  %v4666_v6 = vpack.c.bf16 %v3716_v52, %v3714_v5 }
0x1b7a   :  { %3383 = vadd.xlane.f32.xlu0 %v3382_v8  ;;  %v3469_v60 = vpop.permute.xlu1 %3468 }
0x1b7b   :  { %4818 = vpow2.f32 %v3380_v7  ;;  %4509 = vmatpush3.msra.mxu1 %v3469_v60  ;;  %v3715_v7 = vld [vmem:[#allocation14 + $0x50] sm:$0xff]  ;;  %v3718_v60 = vld [vmem:[#allocation14 + $0x68] sm:$0xff] }
0x1b7e   :  { %v3547_v19 = vpop.permute.xlu1 %3546 }
0x1b7f   :  { %v3568_v38 = vsel %vm394_vm2, %v5835_v33, %v3547_v19 }
0x1b82   :  { %v3549_v37 = vpop.permute.xlu1 %3548 }
0x1b83   :  { %v3569_v47 = vsel %vm394_vm2, %v5837_v35, %v3549_v37  ;;  %v3834_v37 = vld [vmem:[#allocation17 + $0xa0] sm:$0xff] }
0x1b85   :  { %v4819_v9 = vpop.eup %4818 }
0x1b86   :  { %v3385_v10 = vsel %vm546_vm4, %v4819_v9, 0.0  ;;  %v3557_v1 = vpop.permute.xlu1 %3556 }
0x1b87   :  { %3386 = vadd.xlane.f32.xlu0 %v3385_v10  ;;  %v3571_v0 = vsel %vm256_vm0, %v3569_v47, %v3557_v1  ;;  %v3717_v10 = vld [vmem:[#allocation14 + $0x60] sm:$0xff] }
0x1b88   :  { %v3838_v47 = vld [vmem:[#allocation17 + $0xc0] sm:$0xff] }
0x1b9d   :  { %3392 = vrot.lane.b32.xlu0 %v5779_v46, %s5233_s19  ;;  %v4650_v46 = vpack.c.bf16 %v3576_v20, %v3575_v36  ;;  %v3833_v36 = vld [vmem:[#allocation17 + $0x98] sm:$0xff] }
0x1ba1   :  { %3554 = vrot.lane.b32.xlu0 %v3134_v48, %s5221_s6  ;;  %s4084_s6 = sshll.u32 %s5235_s28, 4  ;;  %s4085_s6 = int_to_ptr.vmem [resolvable:$true] %s4084_s6 }
0x1ba2   :  { %s5164_s13 = scalar_lea.vmem %s4085_s6, 32  ;;  %p5169_p9 = scmp.lt.s32.totalorder %s4085_s6, %s4085_s6 }
0x1ba3   :  { %p5165_p8 = scmp.ne.s32.totalorder %s4085_s6, %s5164_s13  ;;  %p5170_p10 = scmp.lt.s32.totalorder %s5164_s13, %s5164_s13 }
0x1ba5   :  { %p5171_p11 = por %p5170_p10, %p5169_p9 }
0x1ba7   :  { %p5172_p12 = pnand %p5171_p11, %p5165_p8 }
0x1c07   :  { %v3384_v13 = vpop.xlane.xlu0 %3383 }
0x1c08   :  { %4820 = vrcp.f32 %v3384_v13 }
0x1c12   :  { %v4821_v15 = vpop.eup %4820 }
0x1c13   :  { %v3390_v16 = vmul.f32 %v4821_v15, %v4817_v44  ;;  %v3713_v44 = vld [vmem:[#allocation14 + $0x40] sm:$0xff] }
0x1c14   :  { %v3387_v14 = vpop.xlane.xlu0 %3386  ;;  %v4668_v8 = vpack.c.bf16 %v3715_v7, %v3713_v44 }
0x1c15   :  { %4822 = vrcp.f32 %v3387_v14  ;;  %v3719_v14 = vld [vmem:[#allocation14 + $0x70] sm:$0xff] }
0x1c16   :  { %v4672_v15 = vpack.c.bf16 %v3719_v14, %v3717_v10 }
0x1c18   :  { %v3393_v17 = vpop.permute.xlu0 %3392 }
0x1c19   :  { %4504 = vmatpush3.msra.mxu0 %v3393_v17  ;;  %v3831_v17 = vld [vmem:[#allocation17 + $0x88] sm:$0xff] }
0x1c1a   :  { %4506 = vmatmul.mubr.msk.f32.vlgmr.msra.gmra.mrb[34].mxu0 %vm546_vm4, %v3390_v16  ;;  %4651 = vmatprep.subr.bf16.mxu0 %v4650_v46  ;;  %v3830_v16 = vld [vmem:[#allocation17 + $0x80] sm:$0xff] }
0x1c1b   :  { %4653 = vmatpush3.bf16.msra.mxu0 %v4650_v46 }
0x1c1c   :  { %4655 = vmatprep.subr.bf16.mxu0 %v4654_v24  ;;  %v3555_v22 = vpop.permute.xlu0 %3554 }
0x1c1d   :  { %v3570_v39 = vsel %vm256_vm0, %v3568_v38, %v3555_v22  ;;  %v3835_v38 = vld [vmem:[#allocation17 + $0xa8] sm:$0xff] }
0x1c1f   :  { %v4823_v18 = vpop.eup %4822  ;;  %4657 = vmatpush3.bf16.msra.mxu0 %v4654_v24 }
0x1c20   :  { %v3391_v34 = vmul.f32 %v4823_v18, %v4819_v9  ;;  %4659 = vmatprep.subr.bf16.mxu0 %v4658_v27  ;;  %v3720_v9 = vld [vmem:[#allocation14 + $0x78] sm:$0xff] }
0x1c21   :  { %v4670_v13 = vpack.c.bf16 %v3720_v9, %v3718_v60  ;;  %v3832_v18 = vld [vmem:[#allocation17 + $0x90] sm:$0xff] }
0x1c22   :  { %4511 = vmatmul.mubr.msk.f32.vlgmr.msra.gmra.mrb[42].mxu1 %vm546_vm4, %v3391_v34  ;;  %v4674_v34 = vpack.c.bf16 %v3831_v17, %v3830_v16  ;;  %v4678_v20 = vpack.c.bf16 %v3833_v36, %v3832_v18  ;;  %v4169_v36 = vld [vmem:[#allocation19 + $0x1] ss:$0 sm:$0xff] }
0x1c23   :  { %4661 = vmatpush3.bf16.msra.mxu0 %v4658_v27 }
0x1c24   :  { %4663 = vmatprep.subr.bf16.mxu0 %v4662_v30  ;;  %4675 = vmatprep.subr.bf16.mxu1 %v4674_v34 }
0x1c25   :  { %4677 = vmatpush3.bf16.msra.mxu1 %v4674_v34 }
0x1c26   :  { %4679 = vmatprep.subr.bf16.mxu1 %v4678_v20 }
0x1c27   :  { %4665 = vmatpush3.bf16.msra.mxu0 %v4662_v30  ;;  %v4166_v30 = vld [vmem:[#allocation13 + $0x1] ss:$0 sm:$0xff] }
0x1c28   :  { %4667 = vmatprep.subr.bf16.mxu0 %v4666_v6 }
0x1c29   :  { %4681 = vmatpush3.bf16.msra.mxu1 %v4678_v20 }
0x1ced   :  { %v3464_v31 = vpop.f32.mrb[34].mxu0 }
0x1cee   :  { %3562 = vrot.lane.b32.xlu0 %v3464_v31, %s5230_s8  ;;  %v4507_v59 = vpop.f32.mrb[35].mxu0 }
0x1cf5   :  { %v3540_v43 = vpop.f32.mrb[42].mxu1 }
0x1cf6   :  { %3564 = vrot.lane.b32.xlu1 %v3540_v43, %s5230_s8  ;;  %v4512_v32 = vpop.f32.mrb[43].mxu1 }
0x1d60   :  { %v3563_v58 = vpop.permute.xlu0 %3562 }
0x1d61   :  { %v3572_v40 = vsel %vm1735_vm5, %v3570_v39, %v3563_v58  ;;  %v4682_v39 = vpack.c.bf16 %v3835_v38, %v3834_v37  ;;  %v3836_v58 = vld [vmem:[#allocation17 + $0xb0] sm:$0xff]  ;;  %v5234_v37 = vmov 0.0|0.0  }
0x1d62   :  { %4529 = vmatprep.mubr.msk.f32.mxu0 %vm1746_vm6, %v3572_v40  ;;  %v3837_v40 = vld [vmem:[#allocation17 + $0xb8] sm:$0xff] }
0x1d63   :  { %4683 = vmatprep.subr.bf16.mxu1 %v4682_v39  ;;  %v4686_v1 = vpack.c.bf16 %v3837_v40, %v3836_v58 }
0x1d64   :  { %4685 = vmatpush3.bf16.msra.mxu1 %v4682_v39  ;;  %v3992_v39 = vld [vmem:[#allocation23 + $0x18] sm:$0xff] }
0x1d65   :  { %4687 = vmatprep.subr.bf16.mxu1 %v4686_v1 }
0x1d68   :  { %v3565_v48 = vpop.permute.xlu1 %3564  ;;  %4689 = vmatpush3.bf16.msra.mxu1 %v4686_v1 }
0x1d69   :  { %v3573_v50 = vsel %vm1735_vm5, %v3571_v0, %v3565_v48  ;;  %v3839_v0 = vld [vmem:[#allocation17 + $0xc8] sm:$0xff] }
0x1d6a   :  { %4530 = vmatmul.mubr.msk.f32.vlgmr.msra.gmra.mrb[36].mxu0 %vm1746_vm6, %v3573_v50  ;;  %v4690_v48 = vpack.c.bf16 %v3839_v0, %v3838_v47  ;;  %v3840_v50 = vld [vmem:[#allocation17 + $0xd0] sm:$0xff] }
0x1d6b   :  { %3804 = vmatprep.mubr.f32.mxu0 %v5226_v21  ;;  %4669 = vmatpush1.bf16.msra.mxu0 %v4668_v8 }
0x1d6c   :  { %4671 = vmatprep.subr.bf16.mxu0 %v4670_v13  ;;  %4691 = vmatprep.subr.bf16.mxu1 %v4690_v48 }
0x1d6d   :  { %4693 = vmatpush3.bf16.msra.mxu1 %v4690_v48  ;;  %v4170_v48 = vld [vmem:[#allocation20] ss:$0 sm:$0xff] }
0x1d6f   :  { %4673 = vmatpush1.bf16.msra.mxu0 %v4672_v15 }
0x1d70   :  { %4706 = vmatprep.subr.bf16.mxu0 %v5234_v37 }
0x1e3d   :  { %v4531_v33 = vpop.f32.mrb[36].mxu0 }
0x1e3e   :  { %v5945_v51 = vadd.f32 %v4531_v33, %v5757_v11  ;;  %v3655_v53 = vpop.f32.mrb[37].mxu0  ;;  %v3841_v33 = vld [vmem:[#allocation17 + $0xd8] sm:$0xff] }
0x1e3f   :  { %v5948_v54 = vadd.f32 %v3655_v53, %v5759_v12  ;;  %v4694_v53 = vpack.c.bf16 %v3841_v33, %v3840_v50 }
0x1e40   :  { %v3673_v35 = vsel %vm256_vm0, %v5945_v51, 0.0 }
0x1e41   :  { %3674 = vadd.xlane.f32.xlu1 %v3673_v35  ;;  %v3670_v55 = vsel %vm256_vm0, %v5948_v54, 0.0  ;;  %4695 = vmatprep.subr.bf16.mxu1 %v4694_v53  ;;  %v3843_v35 = vld [vmem:[#allocation17 + $0xe8] sm:$0xff] }
0x1e42   :  { %3671 = vadd.xlane.f32.xlu0 %v3670_v55  ;;  %4697 = vmatpush3.bf16.msra.mxu1 %v4694_v53 }
0x1ece   :  { %v3675_v56 = vpop.xlane.xlu1 %3674 }
0x1ecf   :  { %v3677_v49 = vmul.f32 0.03125, %v3675_v56  ;;  %v3672_v61 = vpop.xlane.xlu0 %3671  ;;  %v3844_v56 = vld [vmem:[#allocation17 + $0xf0] sm:$0xff] }
0x1ed0   :  { %v3676_v62 = vmul.f32 0.03125, %v3672_v61 }
0x1ed1   :  { %v3679_v63 = vsub.f32 %v5945_v51, %v3677_v49  ;;  %v3845_v49 = vld [vmem:[#allocation17 + $0xf8] sm:$0xff] }
0x1ed2   :  { %v3678_v11 = vsub.f32 %v5948_v54, %v3676_v62  ;;  %v4702_v61 = vpack.c.bf16 %v3845_v49, %v3844_v56  ;;  %v3722_v62 = vld [vmem:[#allocation16 + $0x2] sm:$0x3] }
0x1ed3   :  { %v3681_v3 = vmul.f32 %v3679_v63, %v3679_v63  ;;  %v3727_v44 = vrot.slane %v3722_v62, %v1886_v57 }
0x1ed4   :  { %v3680_v2 = vmul.f32 %v3678_v11, %v3678_v11 }
0x1ed5   :  { %v3685_v4 = vsel %vm256_vm0, %v3681_v3, 0.0 }
0x1ed6   :  { %v3682_v12 = vsel %vm256_vm0, %v3680_v2, 0.0 }
0x1ed7   :  { %3683 = vadd.xlane.f32.xlu0 %v3682_v12 }
0x1edb   :  { %3686 = vadd.xlane.f32.xlu0 %v3685_v4 }
0x1f64   :  { %v3684_v45 = vpop.xlane.xlu0 %3683 }
0x1f65   :  { %v3688_v46 = vmul.f32 0.03125, %v3684_v45 }
0x1f67   :  { %v3690_v23 = vadd.f32 1e-05, %v3688_v46 }
0x1f68   :  { %v3687_v24 = vpop.xlane.xlu0 %3686 }
0x1f69   :  { %4824 = vrsqrt.f32 %v3690_v23  ;;  %v3689_v25 = vmul.f32 0.03125, %v3687_v24 }
0x1f6b   :  { %v3691_v26 = vadd.f32 1e-05, %v3689_v25 }
0x1f6d   :  { %4826 = vrsqrt.f32 %v3691_v26 }
0x1f73   :  { %v4825_v27 = vpop.eup %4824 }
0x1f74   :  { %v3694_v29 = vmul.f32 %v4825_v27, %v3678_v11 }
0x1f76   :  { %v3702_v31 = vmul.f32 %v4165_v28, %v3694_v29 }
0x1f77   :  { %v4827_v59 = vpop.eup %4826 }
0x1f78   :  { %v3710_v43 = vadd.f32 %v4166_v30, %v3702_v31  ;;  %v3695_v32 = vmul.f32 %v4827_v59, %v3679_v63  ;;  %v3731_v63 = vrot.slane %v3722_v62, %v1890_v42 }
0x1f7a   :  { %4167 = vmatmul.mubr.msk.f32.vlgmr.msra.gmra.mrb[38].mxu0 %vm256_vm0, %v3710_v43  ;;  %v3703_v19 = vmul.f32 %v4165_v28, %v3695_v32  ;;  %v3989_v32 = vld [vmem:[#allocation23] sm:$0xff] }
0x1f7b   :  { %3810 = vmatprep.mubr.f32.mxu0 %v5226_v21 }
0x1f7c   :  { %v3711_v22 = vadd.f32 %v4166_v30, %v3703_v19  ;;  %v3990_v19 = vld [vmem:[#allocation23 + $0x8] sm:$0xff] }
0x1f7d   :  { %v4707_v38 = vpack.c.bf16 %v3990_v19, %v3989_v32 }
0x1f7e   :  { %4168 = vmatmul.mubr.msk.f32.gmra.mrb[40].mxu0 %vm256_vm0, %v3711_v22  ;;  %v3991_v22 = vld [vmem:[#allocation23 + $0x10] sm:$0xff] }
0x1f7f   :  { %4575 = vmatprep.mubr.msk.f32.mxu0 %vm5227_vm1, %v5226_v21  ;;  %v3842_v21 = vld [vmem:[#allocation17 + $0xe0] sm:$0xff]  ;;  %4708 = vmatpush3.bf16.msra.mxu0 %v4707_v38  ;;  %v4710_v58 = vpack.c.bf16 %v3992_v39, %v3991_v22 }
0x1f80   :  { %v4698_v55 = vpack.c.bf16 %v3843_v35, %v3842_v21  ;;  %4709 = vmatprep.subr.bf16.mxu0 %v5234_v37  ;;  %v4171_v35 = vld [vmem:[#allocation22] ss:$0 sm:$0xff] }
0x1f82   :  { %4699 = vmatprep.subr.bf16.mxu1 %v4698_v55 }
0x1f83   :  { %4701 = vmatpush3.bf16.msra.mxu1 %v4698_v55  ;;  %4711 = vmatpush3.bf16.msra.mxu0 %v4710_v58 }
0x1f84   :  { %4703 = vmatprep.subr.bf16.mxu1 %v4702_v61 }
0x1f87   :  { %4705 = vmatpush3.bf16.msra.mxu1 %v4702_v61 }
0x204d   :  { %v3806_v11 = vpop.f32.mrb[38].mxu0 }
0x204e   :  { %v3808_v2 = vpop.f32.mrb[39].mxu0  ;;  %v3807_v9 = vadd.f32 %v3806_v11, %v3727_v44 }
0x204f   :  { %v3809_v12 = vadd.f32 %v3808_v2, %v3731_v63  ;;  %v4172_v2 = vld [vmem:[#allocation25] ss:$0 sm:$0xff] }
0x2051   :  { %v3819_v3 = vmul.f32 0.70710677, %v3809_v12  ;;  %v3812_v4 = vpop.f32.mrb[40].mxu0  ;;  %v3817_v8 = vmul.f32 0.5, %v3809_v12 }
0x2052   :  { %v3814_v5 = vpop.f32.mrb[41].mxu0  ;;  %v3813_v16 = vadd.f32 %v3812_v4, %v3727_v44 }
0x2053   :  { %4828 = verf.f32 %v3819_v3  ;;  %v3815_v52 = vadd.f32 %v3814_v5, %v3731_v63 }
0x2055   :  { %v3820_v6 = vmul.f32 0.70710677, %v3815_v52  ;;  %v3818_v42 = vmul.f32 0.5, %v3815_v52 }
0x2057   :  { %4830 = verf.f32 %v3820_v6 }
0x205d   :  { %v4829_v7 = vpop.eup %4828 }
0x205e   :  { %v3823_v60 = vadd.f32 1.0, %v4829_v7 }
0x2060   :  { %v3825_v10 = vmul.f32 %v3823_v60, %v3817_v8 }
0x2061   :  { %v4831_v13 = vpop.eup %4830 }
0x2062   :  { %v3824_v14 = vadd.f32 1.0, %v4831_v13  ;;  %v3827_v15 = vmul.f32 %v3825_v10, %v3807_v9 }
0x2064   :  { %v3826_v17 = vmul.f32 %v3824_v14, %v3818_v42  ;;  %4564 = vmatprep.mubr.f32.mxu1 %v3827_v15 }
0x2066   :  { %v3828_v18 = vmul.f32 %v3826_v17, %v3813_v16 }
0x2068   :  { %4565 = vmatmul.mubr.f32.vlgmr.msra.gmra.mrb[44].mxu1 %v3828_v18 }
0x213b   :  { %v4566_v34 = vpop.f32.mrb[44].mxu1 }
0x213c   :  { %v3922_v20 = vadd.f32 %v4566_v34, %v5945_v51  ;;  %v3912_v41 = vpop.f32.mrb[45].mxu1 }
0x213d   :  { %v3921_v57 = vadd.f32 %v3912_v41, %v5948_v54 }
0x213e   :  { %v3932_v45 = vadd.f32 %v4169_v36, %v3922_v20 }
0x213f   :  { %v3931_v46 = vadd.f32 %v4169_v36, %v3921_v57 }
0x2140   :  { %v3937_v23 = vrot.slane %v3932_v45, 7 }
0x2142   :  { %v3939_v24 = vsel %vm3938_vm7, %v3937_v23, %v3931_v46 }
0x2143   :  { %v3942_v25 = vsel %vm3941_vm8, %v3939_v24, 0.0 }
0x2144   :  { %3943 = vadd.xlane.f32.xlu0 %v3942_v25 }
0x21d1   :  { %v3944_v26 = vpop.xlane.xlu0 %3943 }
0x21d2   :  { %v3945_v27 = vmul.f32 0.03125, %v3944_v26 }
0x21d4   :  { %v3947_v28 = vrot.slane %v3945_v27, 1  ;;  %v3950_v29 = vsub.f32 %v3931_v46, %v3945_v27 }
0x21d6   :  { %v3951_v30 = vsub.f32 %v3932_v45, %v3947_v28  ;;  %v3952_v59 = vmul.f32 %v3950_v29, %v3950_v29 }
0x21d8   :  { %v3953_v31 = vmul.f32 %v3951_v30, %v3951_v30 }
0x21da   :  { %v3956_v51 = vrot.slane %v3953_v31, 7 }
0x21dc   :  { %v3957_v43 = vsel %vm3938_vm7, %v3956_v51, %v3952_v59 }
0x21dd   :  { %v3959_v54 = vsel %vm3941_vm8, %v3957_v43, 0.0 }
0x21de   :  { %3960 = vadd.xlane.f32.xlu1 %v3959_v54 }
0x226b   :  { %v3961_v40 = vpop.xlane.xlu1 %3960 }
0x226c   :  { %v3962_v1 = vmul.f32 0.03125, %v3961_v40 }
0x226e   :  { %v3963_v47 = vadd.f32 1e-05, %v3962_v1 }
0x2270   :  { %4832 = vrsqrt.f32 %v3963_v47 }
0x227a   :  { %v4833_v0 = vpop.eup %4832 }
0x227b   :  { %v3966_v50 = vrot.slane %v4833_v0, 1  ;;  %v3969_v33 = vmul.f32 %v4833_v0, %v3950_v29 }
0x227d   :  { %v3970_v53 = vmul.f32 %v3966_v50, %v3951_v30  ;;  %v3977_v21 = vmul.f32 %v4170_v48, %v3969_v33 }
0x227f   :  { %v3978_v55 = vmul.f32 %v4170_v48, %v3970_v53  ;;  %v3985_v56 = vadd.f32 %v4171_v35, %v3977_v21 }
0x2281   :  { %v3986_v49 = vadd.f32 %v4171_v35, %v3978_v55  ;;  %v3987_v62 = vmax.f32 %v3985_v56, 0.0 }
0x2283   :  { %v3988_v61 = vmax.f32 %v3986_v49, 0.0 }
0x2285   :  { %v4002_v63 = vrot.slane %v3988_v61, 7 }
0x2287   :  { %v4003_v11 = vsel %vm3938_vm7, %v4002_v63, %v3987_v62 }
0x2288   :  { %4576 = vmatmul.mubr.msk.f32.vlgmr.msra.gmra.mrb[42].mxu0 %vm256_vm0, %v4003_v11 }
0x235b   :  { %v4072_v12 = vpop.f32.mrb[42].mxu0 }
0x235c   :  { %v4073_v3 = vadd.f32 %v4172_v2, %v4072_v12  ;;  %v4577_v4 = vpop.f32.mrb[43].mxu0 }
0x235e   :  { %4077 = vst.msk [vmem:[#allocation26] sm:$0x3] %vm4076_vm9, %v4073_v3 }
0x235f   :  { %5175 = shalt.err (!%p5172_p12)
}
0x2360   :  { %s5176_s20 = scalar_lea.hbm %s6000_s15, 32 }
0x2361   :  { %p5177_p13 = scmp.ne.s32.totalorder %s6000_s15, %s5176_s20  ;;  %p5180_p0 = scmp.lt.u32.totalorder %s5176_s20, %s6000_s15 }
0x2363   :  { %p5182_p1 = pnand %p5180_p0, %p5177_p13 }
0x2365   :  { %5185 = shalt.err (!%p5182_p1)
}
0x2366   :  { %4087 = dma.vmem_to_hbm [thread:$0]  %s4085_s6, 32, %s6000_s15, [#allocation4]  }
0x2367   :  { %5202 = dma.done.wait [#allocation4], 32  }
0x2368   :  { %5203 = vsyncadd [#allocation4], 4294967264 }
0x2369   :  { %4091 = vsyncpa [#allocation3], 1 }
0x236a   :  { %4092 = vsyncpa [#allocation6], 1 }
0x236b   :  { %4093 = vsyncpa [#allocation9], 1 }
0x236c   :  { %4094 = vsyncpa [#allocation12], 1 }
0x236d   :  { %4095 = vsyncpa [#allocation15], 1 }
0x236e   :  { %4096 = vsyncpa [#allocation18], 1 }
0x236f   :  { %4097 = vsyncpa [#allocation21], 1 }
0x2370   :  { %4098 = vsyncpa [#allocation24], 1 }
0x2371   :  { %4099 = vsyncpa [#allocation4], 1 }

</bundles_post_ra>
